<compile_context>
chip_gen: v7x
topology: tpu7x:2x2x1
jax: 0.10.0
libtpu: 0.0.40
codegen_flags: <defaults>
</compile_context>

<pallas_src>
import functools

import jax
import jax.numpy as jnp
from jax.experimental import pallas as pl
from jax.experimental.pallas import tpu as pltpu

EPS = 1e-5

# Single-buffer constant operands when the installed JAX supports
# BlockSpec(pipeline_mode=pl.Buffered(1)); probed once in __main__, flipped off otherwise.
_CONST_SINGLE_BUFFER = [True]


def _vmem_limit_bytes():
    # ~75% of physical VMEM, capped at 96 MiB: 128 MiB (v5e/v6e) -> 96 MiB, 64 MiB (v7x) -> 48 MiB.
    try:
        cap = int(pltpu.get_tpu_info().vmem_capacity_bytes)
        return min((cap * 3) // 4, 96 * 1024 * 1024)
    except Exception:
        return 48 * 1024 * 1024


def _compiler_params():
    return pltpu.CompilerParams(
        dimension_semantics=("parallel",),
        vmem_limit_bytes=_vmem_limit_bytes())


def _const_spec(shape):
    """BlockSpec for operands whose block index never changes (weights, BN affines).
    Single-buffered where supported so the constant is not double-buffered in VMEM."""
    index_map = lambda *_: (0,) * len(shape)
    if _CONST_SINGLE_BUFFER[0]:
        try:
            return pl.BlockSpec(shape, index_map, pipeline_mode=pl.Buffered(1))
        except Exception:
            _CONST_SINGLE_BUFFER[0] = False
    return pl.BlockSpec(shape, index_map)


def _pick_tile(m, target):
    """Largest multiple of 8 that divides m and is <= target (fallback: full m).
    TODO(synk): non-8-divisible M would need a masked tail tile instead of one big block."""
    t = min(m, max(8, (target // 8) * 8))
    while t >= 8:
        if m % t == 0:
            return t
        t -= 8
    return m


# ----------------------------- Pallas kernels ------------------------------

def _bn_relu_mm_stats_kernel(x_ref, a_ref, c_ref, w_ref, o_ref, ssum_ref, ssq_ref):
    """relu(x*a + c) @ w (1x1 conv) + per-tile partial batch stats of the output."""
    h = jnp.maximum(x_ref[...].astype(jnp.float32) * a_ref[...] + c_ref[...], 0.0)
    out = jnp.dot(h.astype(w_ref.dtype), w_ref[...],
                  preferred_element_type=jnp.float32)
    out_q = out.astype(o_ref.dtype)
    o_ref[...] = out_q
    # Stats of exactly what the next layer will read (post dtype rounding); two direct
    # full-block stores (no concatenate relayout).
    outf = out_q.astype(jnp.float32)
    ssum_ref[...] = jnp.sum(outf, axis=0, keepdims=True).reshape(1, 1, -1)
    ssq_ref[...] = jnp.sum(outf * outf, axis=0, keepdims=True).reshape(1, 1, -1)


def _bn_relu_conv3x3_stats_kernel(h_ref, a_ref, c_ref, w_ref, o_ref, ssum_ref, ssq_ref,
                                  xpad_ref):
    """bn2-affine + relu prologue, padding=1 in a persistent VMEM scratch (border-only
    re-zeroing), 3x3 conv as 9 accumulated per-tap MXU matmuls, stats epilogue for bn3."""
    H, W, C = h_ref.shape[1], h_ref.shape[2], h_ref.shape[3]
    Cout = o_ref.shape[3]

    # Prologue: BN affine + ReLU in f32 on the loaded image tile.
    g = jnp.maximum(h_ref[0].astype(jnp.float32) * a_ref[...] + c_ref[...], 0.0)  # (H,W,C)

    # Zero only the 1-element border; the interior is fully overwritten below.  Done every
    # step (cheap: ~2*(H+W)*C elems vs the full (H+2)(W+2)*C memset) so it stays correct if
    # the 'parallel' grid is split across TensorCores (each core owns its own scratch and
    # may never execute step 0).
    zrow = jnp.zeros((1, W + 2, C), xpad_ref.dtype)
    zcol = jnp.zeros((H + 2, 1, C), xpad_ref.dtype)
    xpad_ref[0:1, :, :] = zrow
    xpad_ref[H + 1:H + 2, :, :] = zrow
    xpad_ref[:, 0:1, :] = zcol
    xpad_ref[:, W + 1:W + 2, :] = zcol
    xpad_ref[pl.ds(1, H), pl.ds(1, W), :] = g

    # 3x3 conv: 9 shifted taps, each a (H*W, C) x (C, Cout) MXU matmul accumulated in f32.
    # (No (H*W, 9C) im2col buffer and no concatenate -> no extra VMEM load/store copies.)
    acc = None
    for k in range(9):
        kh, kw = k // 3, k % 3
        tap = xpad_ref[pl.ds(kh, H), pl.ds(kw, W), :].reshape(H * W, C)
        d = jnp.dot(tap.astype(w_ref.dtype), w_ref[k],
                    preferred_element_type=jnp.float32)
        acc = d if acc is None else acc + d

    out_q = acc.astype(o_ref.dtype)
    o_ref[...] = out_q.reshape(1, H, W, Cout)
    outf = out_q.astype(jnp.float32)
    ssum_ref[...] = jnp.sum(outf, axis=0, keepdims=True).reshape(1, 1, -1)
    ssq_ref[...] = jnp.sum(outf * outf, axis=0, keepdims=True).reshape(1, 1, -1)


def _bn_relu_mm_add_kernel(h_ref, a_ref, c_ref, w_ref, r_ref, o_ref):
    """relu(h*a + c) @ w (1x1 conv) + residual (output aliases the residual buffer)."""
    h = jnp.maximum(h_ref[...].astype(jnp.float32) * a_ref[...] + c_ref[...], 0.0)
    out = jnp.dot(h.astype(w_ref.dtype), w_ref[...],
                  preferred_element_type=jnp.float32)
    o_ref[...] = (out + r_ref[...]).astype(o_ref.dtype)


# ----------------------------- pallas_call glue -----------------------------

def _bn_relu_mm_stats(x2d, a, c, w, tm):
    M, Cin = x2d.shape
    Cout = w.shape[1]
    G = M // tm
    esz = jnp.dtype(w.dtype).itemsize
    return pl.pallas_call(
        _bn_relu_mm_stats_kernel,
        out_shape=(jax.ShapeDtypeStruct((M, Cout), w.dtype),
                   jax.ShapeDtypeStruct((G, 1, Cout), jnp.float32),
                   jax.ShapeDtypeStruct((G, 1, Cout), jnp.float32)),
        grid=(G,),
        in_specs=[pl.BlockSpec((tm, Cin), lambda i: (i, 0)),
                  _const_spec((1, Cin)),
                  _const_spec((1, Cin)),
                  _const_spec((Cin, Cout))],
        out_specs=(pl.BlockSpec((tm, Cout), lambda i: (i, 0)),
                   pl.BlockSpec((1, 1, Cout), lambda i: (i, 0, 0)),
                   pl.BlockSpec((1, 1, Cout), lambda i: (i, 0, 0))),
        compiler_params=_compiler_params(),
        cost_estimate=pl.CostEstimate(
            flops=2 * M * Cin * Cout + 4 * M * Cin,
            transcendentals=0,
            bytes_accessed=4 * M * Cin + esz * (M * Cout + Cin * Cout) + 8 * G * Cout),
    )(x2d, a, c, w)


def _bn_relu_conv3x3_stats(h_nhwc, a, c, w9):
    N, H, W, C = h_nhwc.shape
    Cout = w9.shape[2]
    esz = jnp.dtype(h_nhwc.dtype).itemsize
    return pl.pallas_call(
        _bn_relu_conv3x3_stats_kernel,
        out_shape=(jax.ShapeDtypeStruct((N, H, W, Cout), h_nhwc.dtype),
                   jax.ShapeDtypeStruct((N, 1, Cout), jnp.float32),
                   jax.ShapeDtypeStruct((N, 1, Cout), jnp.float32)),
        grid=(N,),
        in_specs=[pl.BlockSpec((1, H, W, C), lambda n: (n, 0, 0, 0)),
                  _const_spec((1, C)),
                  _const_spec((1, C)),
                  _const_spec((9, C, Cout))],
        out_specs=(pl.BlockSpec((1, H, W, Cout), lambda n: (n, 0, 0, 0)),
                   pl.BlockSpec((1, 1, Cout), lambda n: (n, 0, 0)),
                   pl.BlockSpec((1, 1, Cout), lambda n: (n, 0, 0))),
        # TODO(synk): for very large H*W on v7x (64 MiB VMEM), tile over image rows with a
        #             1-row halo instead of one whole image per grid step.
        scratch_shapes=[pltpu.VMEM((H + 2, W + 2, C), jnp.float32)],
        compiler_params=_compiler_params(),
        cost_estimate=pl.CostEstimate(
            flops=2 * N * H * W * 9 * C * Cout + 5 * N * H * W * C,
            transcendentals=0,
            bytes_accessed=esz * N * H * W * (C + Cout) + esz * 9 * C * Cout),
    )(h_nhwc, a, c, w9)


def _bn_relu_mm_add(h2d, a, c, w, res2d, tm):
    M, Cin = h2d.shape
    Cout = w.shape[1]
    G = M // tm
    esz = jnp.dtype(h2d.dtype).itemsize
    return pl.pallas_call(
        _bn_relu_mm_add_kernel,
        out_shape=jax.ShapeDtypeStruct((M, Cout), jnp.float32),
        grid=(G,),
        in_specs=[pl.BlockSpec((tm, Cin), lambda i: (i, 0)),
                  _const_spec((1, Cin)),
                  _const_spec((1, Cin)),
                  _const_spec((Cin, Cout)),
                  pl.BlockSpec((tm, Cout), lambda i: (i, 0))],
        out_specs=pl.BlockSpec((tm, Cout), lambda i: (i, 0)),
        # Output reuses the residual's HBM buffer (same (M, Cout) f32 shape).
        input_output_aliases={4: 0},
        compiler_params=_compiler_params(),
        cost_estimate=pl.CostEstimate(
            flops=2 * M * Cin * Cout + 5 * M * Cin,
            transcendentals=0,
            bytes_accessed=esz * (M * Cin + Cin * Cout) + 8 * M * Cout),
    )(h2d, a, c, w, res2d)


# ----------------------------- host-side helpers ----------------------------

def _blend(stacked, coeffs):
    # Curve parameter blending: p_t = sum_i coeffs_t[i] * p_i (tiny tensors, plain XLA).
    return jnp.einsum('b,b...->...', coeffs, stacked)


def _finish_stats(ssum, ssq, count):
    # TODO(synk): E[x^2]-E[x]^2 can cancel for large means; conv outputs are near zero-mean
    #             so this is benign here, but a centered second pass would be more robust.
    s = jnp.sum(ssum, axis=(0, 1))
    q = jnp.sum(ssq, axis=(0, 1))
    mean = s / count
    var = jnp.maximum(q / count - mean * mean, 0.0)          # biased variance
    return mean, var


def _affine(mean, var, gamma, beta):
    a = gamma * jax.lax.rsqrt(var + EPS)
    c = beta - a * mean
    return a[None, :].astype(jnp.float32), c[None, :].astype(jnp.float32)


def bottleneck_curve_forward(x_nchw, params, coeffs_t, stride=1, block_m=512,
                             matmul_dtype=jnp.bfloat16):
    """Pallas implementation of BottleneckCurve.forward (downsample=None, training-mode BN)."""
    assert stride == 1, "downsample=None (as in the test module) forces stride == 1"
    N, Cin, H, W = x_nchw.shape
    planes = params['conv1_w'].shape[1]
    expansion = 4
    assert Cin == planes * expansion

    M = N * H * W
    tm = _pick_tile(M, block_m)
    cdt = matmul_dtype

    # Curve-blended parameters (tiny tensors, plain XLA); conv weights cast to the MXU dtype.
    g1 = _blend(params['bn1_w'], coeffs_t); b1 = _blend(params['bn1_b'], coeffs_t)
    g2 = _blend(params['bn2_w'], coeffs_t); b2 = _blend(params['bn2_b'], coeffs_t)
    g3 = _blend(params['bn3_w'], coeffs_t); b3 = _blend(params['bn3_b'], coeffs_t)
    w1 = _blend(params['conv1_w'], coeffs_t)[:, :, 0, 0].T.astype(cdt)        # (Cin, planes)
    w2 = jnp.transpose(_blend(params['conv2_w'], coeffs_t), (2, 3, 1, 0))     # (3,3,in,out)
    w2 = w2.reshape(9, planes, planes).astype(cdt)                            # tap-major
    w3 = _blend(params['conv3_w'], coeffs_t)[:, :, 0, 0].T.astype(cdt)        # (planes, Cin)

    # NCHW -> channels-last (M, C).
    # TODO(synk): the NCHW<->NHWC transposes stay host-side to preserve the PyTorch API
    #             boundary; fold them into the first/last kernel (or keep the net NHWC).
    x2d = jnp.transpose(x_nchw, (0, 2, 3, 1)).reshape(M, Cin).astype(jnp.float32)

    # bn1 batch statistics: plain XLA reduction (fuses with the transpose above; no extra
    # Pallas pre-pass re-reading x from HBM).
    mean1 = jnp.mean(x2d, axis=0)
    var1 = jnp.var(x2d, axis=0)                                               # biased
    a1, c1 = _affine(mean1, var1, g1, b1)

    # pass 1: bn1-affine + relu + conv1 (1x1); bn2 partial stats come free from the epilogue.
    h1, s1, q1 = _bn_relu_mm_stats(x2d, a1, c1, w1, tm)
    mean2, var2 = _finish_stats(s1, q1, M)
    a2, c2 = _affine(mean2, var2, g2, b2)

    # pass 2: bn2-affine + relu + conv2 (3x3, pad=1) per image; bn3 partial stats epilogue.
    h1_nhwc = h1.reshape(N, H, W, planes)
    h3_nhwc, s2, q2 = _bn_relu_conv3x3_stats(h1_nhwc, a2, c2, w2)
    mean3, var3 = _finish_stats(s2, q2, M)
    a3, c3 = _affine(mean3, var3, g3, b3)

    # pass 3: bn3-affine + relu + conv3 (1x1) + residual.
    out2d = _bn_relu_mm_add(h3_nhwc.reshape(M, planes), a3, c3, w3, x2d, tm)

    # channels-last -> NCHW.
    return out2d.reshape(N, H, W, Cin).transpose(0, 3, 1, 2)


# ----------------------------- pure-JAX reference ---------------------------

def _reference_forward(x, params, coeffs_t, stride=1):
    def bn(x, w, b):
        mean = x.mean(axis=(0, 2, 3), keepdims=True)
        var = x.var(axis=(0, 2, 3), keepdims=True)                    # biased
        return ((x - mean) / jnp.sqrt(var + EPS) * w[None, :, None, None]
                + b[None, :, None, None])

    def conv(x, w, stride=1, padding=0):
        return jax.lax.conv_general_dilated(
            x, w, (stride, stride), [(padding, padding)] * 2,
            dimension_numbers=('NCHW', 'OIHW', 'NCHW'))

    relu = lambda v: jnp.maximum(v, 0.0)
    out = relu(bn(x, _blend(params['bn1_w'], coeffs_t), _blend(params['bn1_b'], coeffs_t)))
    out = conv(out, _blend(params['conv1_w'], coeffs_t))
    out = relu(bn(out, _blend(params['bn2_w'], coeffs_t), _blend(params['bn2_b'], coeffs_t)))
    out = conv(out, _blend(params['conv2_w'], coeffs_t), stride=stride, padding=1)
    out = relu(bn(out, _blend(params['bn3_w'], coeffs_t), _blend(params['bn3_b'], coeffs_t)))
    out = conv(out, _blend(params['conv3_w'], coeffs_t))
    return out + x


# ------------------------- feature probe (Buffered(1)) -----------------------

def _probe_copy_kernel(x_ref, o_ref):
    o_ref[...] = x_ref[...]


def _probe_single_buffered_constants():
    """Flip off single-buffered constant blocks if pipeline_mode=pl.Buffered(1) is not
    supported end-to-end by the installed JAX / Mosaic stack."""
    try:
        spec = pl.BlockSpec((8, 128), lambda i: (0, 0), pipeline_mode=pl.Buffered(1))
        out = pl.pallas_call(
            _probe_copy_kernel,
            out_shape=jax.ShapeDtypeStruct((16, 128), jnp.float32),
            grid=(2,),
            in_specs=[spec],
            out_specs=pl.BlockSpec((8, 128), lambda i: (i, 0)),
        )(jnp.zeros((8, 128), jnp.float32))
        jax.block_until_ready(out)
    except Exception:
        _CONST_SINGLE_BUFFER[0] = False


# ---------------------------------- main ------------------------------------

if __name__ == "__main__":
    # Small shapes consistent with the module: inplanes = planes * expansion, stride = 1.
    N, planes, H, W = 2, 4, 16, 16
    expansion = 4
    inplanes = planes * expansion      # 16
    num_bends = 3                      # fix_points = (True, False, True)

    key = jax.random.PRNGKey(0)
    ks = jax.random.split(key, 10)
    f32 = jnp.float32
    params = {
        'bn1_w':  (1.0 + 0.1 * jax.random.normal(ks[0], (num_bends, inplanes))).astype(f32),
        'bn1_b':  (0.1 * jax.random.normal(ks[1], (num_bends, inplanes))).astype(f32),
        'conv1_w': (0.2 * jax.random.normal(ks[2], (num_bends, planes, inplanes, 1, 1))).astype(f32),
        'bn2_w':  (1.0 + 0.1 * jax.random.normal(ks[3], (num_bends, planes))).astype(f32),
        'bn2_b':  (0.1 * jax.random.normal(ks[4], (num_bends, planes))).astype(f32),
        'conv2_w': (0.2 * jax.random.normal(ks[5], (num_bends, planes, planes, 3, 3))).astype(f32),
        'bn3_w':  (1.0 + 0.1 * jax.random.normal(ks[6], (num_bends, planes))).astype(f32),
        'bn3_b':  (0.1 * jax.random.normal(ks[7], (num_bends, planes))).astype(f32),
        'conv3_w': (0.2 * jax.random.normal(ks[8], (num_bends, planes * expansion, planes, 1, 1))).astype(f32),
    }
    x = jax.random.normal(ks[9], (N, inplanes, H, W), dtype=f32)

    # Bezier curve coefficients at t = 0.3 for 3 bends.
    t = 0.3
    coeffs_t = jnp.array([(1 - t) ** 2, 2 * t * (1 - t), t ** 2], dtype=f32)

    _probe_single_buffered_constants()

    ref = _reference_forward(x, params, coeffs_t, stride=1)

    # block_m=128 exercises a multi-tile grid (M = 2*16*16 = 512 -> 4 row tiles).
    # f32 MXU path: tight correctness gate against the f32 reference.
    fwd_f32 = jax.jit(functools.partial(bottleneck_curve_forward, stride=1, block_m=128,
                                        matmul_dtype=jnp.float32))
    out = jax.block_until_ready(fwd_f32(x, params, coeffs_t))
    assert out.shape == (N, planes * expansion, H, W), out.shape
    err32 = float(jnp.max(jnp.abs(out - ref)))
    assert jnp.allclose(out, ref, rtol=2e-2, atol=2e-2), f"f32 max abs err {err32}"

    # bf16 MXU path (the perf configuration: bf16 operands, f32 accumulation): sanity bound
    # reflecting the intentional reduced-precision matmuls.
    fwd_bf16 = jax.jit(functools.partial(bottleneck_curve_forward, stride=1, block_m=128,
                                         matmul_dtype=jnp.bfloat16))
    out_bf16 = jax.block_until_ready(fwd_bf16(x, params, coeffs_t))
    err16 = float(jnp.max(jnp.abs(out_bf16 - ref)))
    assert err16 < 2e-1, f"bf16 max abs err {err16}"

    print("KERNEL_OK")
</pallas_src>

<mosaic_0001>
module attributes {stable_mosaic.version = 11 : i64} {
  func.func @_probe_copy_kernel(%arg0: i32, %arg1: memref<8x128xf32, #tpu.memory_space<vmem>>, %arg2: memref<8x128xf32, #tpu.memory_space<vmem>>) attributes {dimension_semantics = [#tpu.dimension_semantics<arbitrary>], iteration_bounds = array<i64: 2>, scalar_prefetch = 0 : i64, scratch_operands = 0 : i64, tpu.core_type = #tpu.core_type<tc>, window_params = [{pipeline_mode = #tpu.pipeline_mode<synchronous>, transform_indices = @transform_0, window_bounds = array<i64: 8, 128>}, {transform_indices = @transform_1, window_bounds = array<i64: 8, 128>}]} {
    %c0 = arith.constant 0 : index
    %c0_0 = arith.constant 0 : index
    %0 = vector.load %arg1[%c0, %c0_0] : memref<8x128xf32, #tpu.memory_space<vmem>>, vector<8x128xf32>
    %c0_1 = arith.constant 0 : index
    %c0_2 = arith.constant 0 : index
    %1 = vector.load %arg2[%c0_1, %c0_2] : memref<8x128xf32, #tpu.memory_space<vmem>>, vector<8x128xf32>
    tpu.vector_store %arg2[%c0_1, %c0_2], %0 {strides = array<i32>} : memref<8x128xf32, #tpu.memory_space<vmem>>, vector<8x128xf32>,
    return
  }
  func.func @transform_0(%arg0: i32) -> (i32, i32) {
    %c0_i32 = arith.constant 0 : i32
    %c0_i32_0 = arith.constant 0 : i32
    %c0_i32_1 = arith.constant 0 : i32
    return %c0_i32, %c0_i32_0 : i32, i32
  }
  func.func @transform_1(%arg0: i32) -> (i32, i32) {
    %c0_i32 = arith.constant 0 : i32
    %c0_i32_0 = arith.constant 0 : i32
    return %arg0, %c0_i32 : i32, i32
  }
}

module attributes {stable_mosaic.version = 11 : i64} {
  func.func @_bn_relu_mm_stats_kernel(%arg0: i32, %arg1: memref<128x16xf32, #tpu.memory_space<vmem>>, %arg2: memref<1x16xf32, #tpu.memory_space<vmem>>, %arg3: memref<1x16xf32, #tpu.memory_space<vmem>>, %arg4: memref<16x4xf32, #tpu.memory_space<vmem>>, %arg5: memref<128x4xf32, #tpu.memory_space<vmem>>, %arg6: memref<1x1x4xf32, #tpu.memory_space<vmem>>, %arg7: memref<1x1x4xf32, #tpu.memory_space<vmem>>) attributes {dimension_semantics = [#tpu.dimension_semantics<parallel>], iteration_bounds = array<i64: 4>, scalar_prefetch = 0 : i64, scratch_operands = 0 : i64, tpu.core_type = #tpu.core_type<tc>, window_params = [{transform_indices = @transform_0, window_bounds = array<i64: 128, 16>}, {pipeline_mode = #tpu.pipeline_mode<synchronous>, transform_indices = @transform_1, window_bounds = array<i64: 1, 16>}, {pipeline_mode = #tpu.pipeline_mode<synchronous>, transform_indices = @transform_2, window_bounds = array<i64: 1, 16>}, {pipeline_mode = #tpu.pipeline_mode<synchronous>, transform_indices = @transform_3, window_bounds = array<i64: 16, 4>}, {transform_indices = @transform_4, window_bounds = array<i64: 128, 4>}, {transform_indices = @transform_5, window_bounds = array<i64: 1, 1, 4>}, {transform_indices = @transform_6, window_bounds = array<i64: 1, 1, 4>}]} {
    %c0 = arith.constant 0 : index
    %c0_0 = arith.constant 0 : index
    %0 = vector.load %arg1[%c0, %c0_0] : memref<128x16xf32, #tpu.memory_space<vmem>>, vector<128x16xf32>
    %c0_1 = arith.constant 0 : index
    %c0_2 = arith.constant 0 : index
    %1 = vector.load %arg2[%c0_1, %c0_2] : memref<1x16xf32, #tpu.memory_space<vmem>>, vector<1x16xf32>
    %2 = vector.broadcast %1 : vector<1x16xf32> to vector<128x16xf32>
    %3 = arith.mulf %0, %2 : vector<128x16xf32>
    %c0_3 = arith.constant 0 : index
    %c0_4 = arith.constant 0 : index
    %4 = vector.load %arg3[%c0_3, %c0_4] : memref<1x16xf32, #tpu.memory_space<vmem>>, vector<1x16xf32>
    %5 = vector.broadcast %4 : vector<1x16xf32> to vector<128x16xf32>
    %6 = arith.addf %3, %5 : vector<128x16xf32>
    %cst = arith.constant 0.000000e+00 : f32
    %7 = vector.broadcast %cst : f32 to vector<128x16xf32>
    %8 = arith.maximumf %6, %7 : vector<128x16xf32>
    %c0_5 = arith.constant 0 : index
    %c0_6 = arith.constant 0 : index
    %9 = vector.load %arg4[%c0_5, %c0_6] : memref<16x4xf32, #tpu.memory_space<vmem>>, vector<16x4xf32>
    %cst_7 = arith.constant dense<0.000000e+00> : vector<128x4xf32>
    %10 = tpu.matmul %8, %9, %cst_7 {dimension_numbers = #tpu.dot_dimension_numbers<[1], [0], [0], [1], [0, 0, 1, 1], [], []>} : vector<128x16xf32>, vector<16x4xf32>, vector<128x4xf32> -> vector<128x4xf32>
    %c0_8 = arith.constant 0 : index
    %c0_9 = arith.constant 0 : index
    %11 = vector.load %arg5[%c0_8, %c0_9] : memref<128x4xf32, #tpu.memory_space<vmem>>, vector<128x4xf32>
    tpu.vector_store %arg5[%c0_8, %c0_9], %10 {strides = array<i32>} : memref<128x4xf32, #tpu.memory_space<vmem>>, vector<128x4xf32>,
    %cst_10 = arith.constant dense<0.000000e+00> : vector<4xf32>
    %12 = vector.multi_reduction <add>, %10, %cst_10 [0] : vector<128x4xf32> to vector<4xf32>
    %13 = vector.shape_cast %12 : vector<4xf32> to vector<1x4xf32>
    %14 = vector.shape_cast %13 : vector<1x4xf32> to vector<1x1x4xf32>
    %c0_11 = arith.constant 0 : index
    %c0_12 = arith.constant 0 : index
    %c0_13 = arith.constant 0 : index
    %15 = vector.load %arg6[%c0_11, %c0_12, %c0_13] : memref<1x1x4xf32, #tpu.memory_space<vmem>>, vector<1x1x4xf32>
    tpu.vector_store %arg6[%c0_11, %c0_12, %c0_13], %14 {strides = array<i32>} : memref<1x1x4xf32, #tpu.memory_space<vmem>>, vector<1x1x4xf32>,
    %16 = arith.mulf %10, %10 : vector<128x4xf32>
    %cst_14 = arith.constant dense<0.000000e+00> : vector<4xf32>
    %17 = vector.multi_reduction <add>, %16, %cst_14 [0] : vector<128x4xf32> to vector<4xf32>
    %18 = vector.shape_cast %17 : vector<4xf32> to vector<1x4xf32>
    %19 = vector.shape_cast %18 : vector<1x4xf32> to vector<1x1x4xf32>
    %c0_15 = arith.constant 0 : index
    %c0_16 = arith.constant 0 : index
    %c0_17 = arith.constant 0 : index
    %20 = vector.load %arg7[%c0_15, %c0_16, %c0_17] : memref<1x1x4xf32, #tpu.memory_space<vmem>>, vector<1x1x4xf32>
    tpu.vector_store %arg7[%c0_15, %c0_16, %c0_17], %19 {strides = array<i32>} : memref<1x1x4xf32, #tpu.memory_space<vmem>>, vector<1x1x4xf32>,
    return
  }
  func.func @transform_0(%arg0: i32) -> (i32, i32) {
    %c0_i32 = arith.constant 0 : i32
    %c0_i32_0 = arith.constant 0 : i32
    return %arg0, %c0_i32 : i32, i32
  }
  func.func @transform_1(%arg0: i32) -> (i32, i32) {
    %c0_i32 = arith.constant 0 : i32
    %c0_i32_0 = arith.constant 0 : i32
    %c0_i32_1 = arith.constant 0 : i32
    return %c0_i32, %c0_i32_0 : i32, i32
  }
  func.func @transform_2(%arg0: i32) -> (i32, i32) {
    %c0_i32 = arith.constant 0 : i32
    %c0_i32_0 = arith.constant 0 : i32
    %c0_i32_1 = arith.constant 0 : i32
    return %c0_i32, %c0_i32_0 : i32, i32
  }
  func.func @transform_3(%arg0: i32) -> (i32, i32) {
    %c0_i32 = arith.constant 0 : i32
    %c0_i32_0 = arith.constant 0 : i32
    %c0_i32_1 = arith.constant 0 : i32
    return %c0_i32, %c0_i32_0 : i32, i32
  }
  func.func @transform_4(%arg0: i32) -> (i32, i32) {
    %c0_i32 = arith.constant 0 : i32
    %c0_i32_0 = arith.constant 0 : i32
    return %arg0, %c0_i32 : i32, i32
  }
  func.func @transform_5(%arg0: i32) -> (i32, i32, i32) {
    %c0_i32 = arith.constant 0 : i32
    %c0_i32_0 = arith.constant 0 : i32
    %c0_i32_1 = arith.constant 0 : i32
    return %arg0, %c0_i32, %c0_i32_0 : i32, i32, i32
  }
  func.func @transform_6(%arg0: i32) -> (i32, i32, i32) {
    %c0_i32 = arith.constant 0 : i32
    %c0_i32_0 = arith.constant 0 : i32
    %c0_i32_1 = arith.constant 0 : i32
    return %arg0, %c0_i32, %c0_i32_0 : i32, i32, i32
  }
}

module attributes {stable_mosaic.version = 11 : i64} {
  func.func @_bn_relu_conv3x3_stats_kernel(%arg0: i32, %arg1: memref<1x16x16x4xf32, #tpu.memory_space<vmem>>, %arg2: memref<1x4xf32, #tpu.memory_space<vmem>>, %arg3: memref<1x4xf32, #tpu.memory_space<vmem>>, %arg4: memref<9x4x4xf32, #tpu.memory_space<vmem>>, %arg5: memref<1x16x16x4xf32, #tpu.memory_space<vmem>>, %arg6: memref<1x1x4xf32, #tpu.memory_space<vmem>>, %arg7: memref<1x1x4xf32, #tpu.memory_space<vmem>>, %arg8: memref<18x18x4xf32, #tpu.memory_space<vmem>>) attributes {dimension_semantics = [#tpu.dimension_semantics<parallel>], iteration_bounds = array<i64: 2>, scalar_prefetch = 0 : i64, scratch_operands = 1 : i64, tpu.core_type = #tpu.core_type<tc>, window_params = [{transform_indices = @transform_0, window_bounds = array<i64: 1, 16, 16, 4>}, {pipeline_mode = #tpu.pipeline_mode<synchronous>, transform_indices = @transform_1, window_bounds = array<i64: 1, 4>}, {pipeline_mode = #tpu.pipeline_mode<synchronous>, transform_indices = @transform_2, window_bounds = array<i64: 1, 4>}, {pipeline_mode = #tpu.pipeline_mode<synchronous>, transform_indices = @transform_3, window_bounds = array<i64: 9, 4, 4>}, {transform_indices = @transform_4, window_bounds = array<i64: 1, 16, 16, 4>}, {transform_indices = @transform_5, window_bounds = array<i64: 1, 1, 4>}, {transform_indices = @transform_6, window_bounds = array<i64: 1, 1, 4>}]} {
    %c0 = arith.constant 0 : index
    %c0_0 = arith.constant 0 : index
    %c0_1 = arith.constant 0 : index
    %c0_2 = arith.constant 0 : index
    %0 = vector.load %arg1[%c0, %c0_0, %c0_1, %c0_2] : memref<1x16x16x4xf32, #tpu.memory_space<vmem>>, vector<1x16x16x4xf32>
    %1 = vector.shape_cast %0 : vector<1x16x16x4xf32> to vector<16x16x4xf32>
    %c0_3 = arith.constant 0 : index
    %c0_4 = arith.constant 0 : index
    %2 = vector.load %arg2[%c0_3, %c0_4] : memref<1x4xf32, #tpu.memory_space<vmem>>, vector<1x4xf32>
    %3 = vector.shape_cast %2 : vector<1x4xf32> to vector<1x1x4xf32>
    %4 = vector.broadcast %3 : vector<1x1x4xf32> to vector<16x16x4xf32>
    %5 = arith.mulf %1, %4 : vector<16x16x4xf32>
    %c0_5 = arith.constant 0 : index
    %c0_6 = arith.constant 0 : index
    %6 = vector.load %arg3[%c0_5, %c0_6] : memref<1x4xf32, #tpu.memory_space<vmem>>, vector<1x4xf32>
    %7 = vector.shape_cast %6 : vector<1x4xf32> to vector<1x1x4xf32>
    %8 = vector.broadcast %7 : vector<1x1x4xf32> to vector<16x16x4xf32>
    %9 = arith.addf %5, %8 : vector<16x16x4xf32>
    %cst = arith.constant 0.000000e+00 : f32
    %10 = vector.broadcast %cst : f32 to vector<16x16x4xf32>
    %11 = arith.maximumf %9, %10 : vector<16x16x4xf32>
    %cst_7 = arith.constant 0.000000e+00 : f32
    %12 = vector.broadcast %cst_7 : f32 to vector<1x18x4xf32>
    %cst_8 = arith.constant 0.000000e+00 : f32
    %13 = vector.broadcast %cst_8 : f32 to vector<18x1x4xf32>
    %c0_9 = arith.constant 0 : index
    %c0_10 = arith.constant 0 : index
    %c0_11 = arith.constant 0 : index
    %14 = vector.load %arg8[%c0_9, %c0_10, %c0_11] : memref<18x18x4xf32, #tpu.memory_space<vmem>>, vector<1x18x4xf32>
    tpu.vector_store %arg8[%c0_9, %c0_10, %c0_11], %12 {strides = array<i32>} : memref<18x18x4xf32, #tpu.memory_space<vmem>>, vector<1x18x4xf32>,
    %c17 = arith.constant 17 : index
    %c0_12 = arith.constant 0 : index
    %c0_13 = arith.constant 0 : index
    %15 = vector.load %arg8[%c17, %c0_12, %c0_13] : memref<18x18x4xf32, #tpu.memory_space<vmem>>, vector<1x18x4xf32>
    tpu.vector_store %arg8[%c17, %c0_12, %c0_13], %12 {strides = array<i32>} : memref<18x18x4xf32, #tpu.memory_space<vmem>>, vector<1x18x4xf32>,
    %c0_14 = arith.constant 0 : index
    %c0_15 = arith.constant 0 : index
    %c0_16 = arith.constant 0 : index
    %16 = vector.load %arg8[%c0_14, %c0_15, %c0_16] : memref<18x18x4xf32, #tpu.memory_space<vmem>>, vector<18x1x4xf32>
    tpu.vector_store %arg8[%c0_14, %c0_15, %c0_16], %13 {strides = array<i32>} : memref<18x18x4xf32, #tpu.memory_space<vmem>>, vector<18x1x4xf32>,
    %c0_17 = arith.constant 0 : index
    %c17_18 = arith.constant 17 : index
    %c0_19 = arith.constant 0 : index
    %17 = vector.load %arg8[%c0_17, %c17_18, %c0_19] : memref<18x18x4xf32, #tpu.memory_space<vmem>>, vector<18x1x4xf32>
    tpu.vector_store %arg8[%c0_17, %c17_18, %c0_19], %13 {strides = array<i32>} : memref<18x18x4xf32, #tpu.memory_space<vmem>>, vector<18x1x4xf32>,
    %c1 = arith.constant 1 : index
    %c1_20 = arith.constant 1 : index
    %c0_21 = arith.constant 0 : index
    %18 = vector.load %arg8[%c1, %c1_20, %c0_21] : memref<18x18x4xf32, #tpu.memory_space<vmem>>, vector<16x16x4xf32>
    tpu.vector_store %arg8[%c1, %c1_20, %c0_21], %11 {strides = array<i32>} : memref<18x18x4xf32, #tpu.memory_space<vmem>>, vector<16x16x4xf32>,
    %c0_22 = arith.constant 0 : index
    %c0_23 = arith.constant 0 : index
    %c0_24 = arith.constant 0 : index
    %19 = vector.load %arg8[%c0_22, %c0_23, %c0_24] : memref<18x18x4xf32, #tpu.memory_space<vmem>>, vector<16x16x4xf32>
    %20 = vector.shape_cast %19 : vector<16x16x4xf32> to vector<256x4xf32>
    %c0_25 = arith.constant 0 : index
    %c0_26 = arith.constant 0 : index
    %c0_27 = arith.constant 0 : index
    %21 = vector.load %arg4[%c0_25, %c0_26, %c0_27] : memref<9x4x4xf32, #tpu.memory_space<vmem>>, vector<1x4x4xf32>
    %22 = vector.shape_cast %21 : vector<1x4x4xf32> to vector<4x4xf32>
    %cst_28 = arith.constant dense<0.000000e+00> : vector<256x4xf32>
    %23 = tpu.matmul %20, %22, %cst_28 {dimension_numbers = #tpu.dot_dimension_numbers<[1], [0], [0], [1], [0, 0, 1, 1], [], []>} : vector<256x4xf32>, vector<4x4xf32>, vector<256x4xf32> -> vector<256x4xf32>
    %c0_29 = arith.constant 0 : index
    %c1_30 = arith.constant 1 : index
    %c0_31 = arith.constant 0 : index
    %24 = vector.load %arg8[%c0_29, %c1_30, %c0_31] : memref<18x18x4xf32, #tpu.memory_space<vmem>>, vector<16x16x4xf32>
    %25 = vector.shape_cast %24 : vector<16x16x4xf32> to vector<256x4xf32>
    %c1_32 = arith.constant 1 : index
    %c0_33 = arith.constant 0 : index
    %c0_34 = arith.constant 0 : index
    %26 = vector.load %arg4[%c1_32, %c0_33, %c0_34] : memref<9x4x4xf32, #tpu.memory_space<vmem>>, vector<1x4x4xf32>
    %27 = vector.shape_cast %26 : vector<1x4x4xf32> to vector<4x4xf32>
    %cst_35 = arith.constant dense<0.000000e+00> : vector<256x4xf32>
    %28 = tpu.matmul %25, %27, %cst_35 {dimension_numbers = #tpu.dot_dimension_numbers<[1], [0], [0], [1], [0, 0, 1, 1], [], []>} : vector<256x4xf32>, vector<4x4xf32>, vector<256x4xf32> -> vector<256x4xf32>
    %29 = arith.addf %23, %28 : vector<256x4xf32>
    %c0_36 = arith.constant 0 : index
    %c2 = arith.constant 2 : index
    %c0_37 = arith.constant 0 : index
    %30 = vector.load %arg8[%c0_36, %c2, %c0_37] : memref<18x18x4xf32, #tpu.memory_space<vmem>>, vector<16x16x4xf32>
    %31 = vector.shape_cast %30 : vector<16x16x4xf32> to vector<256x4xf32>
    %c2_38 = arith.constant 2 : index
    %c0_39 = arith.constant 0 : index
    %c0_40 = arith.constant 0 : index
    %32 = vector.load %arg4[%c2_38, %c0_39, %c0_40] : memref<9x4x4xf32, #tpu.memory_space<vmem>>, vector<1x4x4xf32>
    %33 = vector.shape_cast %32 : vector<1x4x4xf32> to vector<4x4xf32>
    %cst_41 = arith.constant dense<0.000000e+00> : vector<256x4xf32>
    %34 = tpu.matmul %31, %33, %cst_41 {dimension_numbers = #tpu.dot_dimension_numbers<[1], [0], [0], [1], [0, 0, 1, 1], [], []>} : vector<256x4xf32>, vector<4x4xf32>, vector<256x4xf32> -> vector<256x4xf32>
    %35 = arith.addf %29, %34 : vector<256x4xf32>
    %c1_42 = arith.constant 1 : index
    %c0_43 = arith.constant 0 : index
    %c0_44 = arith.constant 0 : index
    %36 = vector.load %arg8[%c1_42, %c0_43, %c0_44] : memref<18x18x4xf32, #tpu.memory_space<vmem>>, vector<16x16x4xf32>
    %37 = vector.shape_cast %36 : vector<16x16x4xf32> to vector<256x4xf32>
    %c3 = arith.constant 3 : index
    %c0_45 = arith.constant 0 : index
    %c0_46 = arith.constant 0 : index
    %38 = vector.load %arg4[%c3, %c0_45, %c0_46] : memref<9x4x4xf32, #tpu.memory_space<vmem>>, vector<1x4x4xf32>
    %39 = vector.shape_cast %38 : vector<1x4x4xf32> to vector<4x4xf32>
    %cst_47 = arith.constant dense<0.000000e+00> : vector<256x4xf32>
    %40 = tpu.matmul %37, %39, %cst_47 {dimension_numbers = #tpu.dot_dimension_numbers<[1], [0], [0], [1], [0, 0, 1, 1], [], []>} : vector<256x4xf32>, vector<4x4xf32>, vector<256x4xf32> -> vector<256x4xf32>
    %41 = arith.addf %35, %40 : vector<256x4xf32>
    %c1_48 = arith.constant 1 : index
    %c1_49 = arith.constant 1 : index
    %c0_50 = arith.constant 0 : index
    %42 = vector.load %arg8[%c1_48, %c1_49, %c0_50] : memref<18x18x4xf32, #tpu.memory_space<vmem>>, vector<16x16x4xf32>
    %43 = vector.shape_cast %42 : vector<16x16x4xf32> to vector<256x4xf32>
    %c4 = arith.constant 4 : index
    %c0_51 = arith.constant 0 : index
    %c0_52 = arith.constant 0 : index
    %44 = vector.load %arg4[%c4, %c0_51, %c0_52] : memref<9x4x4xf32, #tpu.memory_space<vmem>>, vector<1x4x4xf32>
    %45 = vector.shape_cast %44 : vector<1x4x4xf32> to vector<4x4xf32>
    %cst_53 = arith.constant dense<0.000000e+00> : vector<256x4xf32>
    %46 = tpu.matmul %43, %45, %cst_53 {dimension_numbers = #tpu.dot_dimension_numbers<[1], [0], [0], [1], [0, 0, 1, 1], [], []>} : vector<256x4xf32>, vector<4x4xf32>, vector<256x4xf32> -> vector<256x4xf32>
    %47 = arith.addf %41, %46 : vector<256x4xf32>
    %c1_54 = arith.constant 1 : index
    %c2_55 = arith.constant 2 : index
    %c0_56 = arith.constant 0 : index
    %48 = vector.load %arg8[%c1_54, %c2_55, %c0_56] : memref<18x18x4xf32, #tpu.memory_space<vmem>>, vector<16x16x4xf32>
    %49 = vector.shape_cast %48 : vector<16x16x4xf32> to vector<256x4xf32>
    %c5 = arith.constant 5 : index
    %c0_57 = arith.constant 0 : index
    %c0_58 = arith.constant 0 : index
    %50 = vector.load %arg4[%c5, %c0_57, %c0_58] : memref<9x4x4xf32, #tpu.memory_space<vmem>>, vector<1x4x4xf32>
    %51 = vector.shape_cast %50 : vector<1x4x4xf32> to vector<4x4xf32>
    %cst_59 = arith.constant dense<0.000000e+00> : vector<256x4xf32>
    %52 = tpu.matmul %49, %51, %cst_59 {dimension_numbers = #tpu.dot_dimension_numbers<[1], [0], [0], [1], [0, 0, 1, 1], [], []>} : vector<256x4xf32>, vector<4x4xf32>, vector<256x4xf32> -> vector<256x4xf32>
    %53 = arith.addf %47, %52 : vector<256x4xf32>
    %c2_60 = arith.constant 2 : index
    %c0_61 = arith.constant 0 : index
    %c0_62 = arith.constant 0 : index
    %54 = vector.load %arg8[%c2_60, %c0_61, %c0_62] : memref<18x18x4xf32, #tpu.memory_space<vmem>>, vector<16x16x4xf32>
    %55 = vector.shape_cast %54 : vector<16x16x4xf32> to vector<256x4xf32>
    %c6 = arith.constant 6 : index
    %c0_63 = arith.constant 0 : index
    %c0_64 = arith.constant 0 : index
    %56 = vector.load %arg4[%c6, %c0_63, %c0_64] : memref<9x4x4xf32, #tpu.memory_space<vmem>>, vector<1x4x4xf32>
    %57 = vector.shape_cast %56 : vector<1x4x4xf32> to vector<4x4xf32>
    %cst_65 = arith.constant dense<0.000000e+00> : vector<256x4xf32>
    %58 = tpu.matmul %55, %57, %cst_65 {dimension_numbers = #tpu.dot_dimension_numbers<[1], [0], [0], [1], [0, 0, 1, 1], [], []>} : vector<256x4xf32>, vector<4x4xf32>, vector<256x4xf32> -> vector<256x4xf32>
    %59 = arith.addf %53, %58 : vector<256x4xf32>
    %c2_66 = arith.constant 2 : index
    %c1_67 = arith.constant 1 : index
    %c0_68 = arith.constant 0 : index
    %60 = vector.load %arg8[%c2_66, %c1_67, %c0_68] : memref<18x18x4xf32, #tpu.memory_space<vmem>>, vector<16x16x4xf32>
    %61 = vector.shape_cast %60 : vector<16x16x4xf32> to vector<256x4xf32>
    %c7 = arith.constant 7 : index
    %c0_69 = arith.constant 0 : index
    %c0_70 = arith.constant 0 : index
    %62 = vector.load %arg4[%c7, %c0_69, %c0_70] : memref<9x4x4xf32, #tpu.memory_space<vmem>>, vector<1x4x4xf32>
    %63 = vector.shape_cast %62 : vector<1x4x4xf32> to vector<4x4xf32>
    %cst_71 = arith.constant dense<0.000000e+00> : vector<256x4xf32>
    %64 = tpu.matmul %61, %63, %cst_71 {dimension_numbers = #tpu.dot_dimension_numbers<[1], [0], [0], [1], [0, 0, 1, 1], [], []>} : vector<256x4xf32>, vector<4x4xf32>, vector<256x4xf32> -> vector<256x4xf32>
    %65 = arith.addf %59, %64 : vector<256x4xf32>
    %c2_72 = arith.constant 2 : index
    %c2_73 = arith.constant 2 : index
    %c0_74 = arith.constant 0 : index
    %66 = vector.load %arg8[%c2_72, %c2_73, %c0_74] : memref<18x18x4xf32, #tpu.memory_space<vmem>>, vector<16x16x4xf32>
    %67 = vector.shape_cast %66 : vector<16x16x4xf32> to vector<256x4xf32>
    %c8 = arith.constant 8 : index
    %c0_75 = arith.constant 0 : index
    %c0_76 = arith.constant 0 : index
    %68 = vector.load %arg4[%c8, %c0_75, %c0_76] : memref<9x4x4xf32, #tpu.memory_space<vmem>>, vector<1x4x4xf32>
    %69 = vector.shape_cast %68 : vector<1x4x4xf32> to vector<4x4xf32>
    %cst_77 = arith.constant dense<0.000000e+00> : vector<256x4xf32>
    %70 = tpu.matmul %67, %69, %cst_77 {dimension_numbers = #tpu.dot_dimension_numbers<[1], [0], [0], [1], [0, 0, 1, 1], [], []>} : vector<256x4xf32>, vector<4x4xf32>, vector<256x4xf32> -> vector<256x4xf32>
    %71 = arith.addf %65, %70 : vector<256x4xf32>
    %72 = vector.shape_cast %71 : vector<256x4xf32> to vector<1x16x16x4xf32>
    %c0_78 = arith.constant 0 : index
    %c0_79 = arith.constant 0 : index
    %c0_80 = arith.constant 0 : index
    %c0_81 = arith.constant 0 : index
    %73 = vector.load %arg5[%c0_78, %c0_79, %c0_80, %c0_81] : memref<1x16x16x4xf32, #tpu.memory_space<vmem>>, vector<1x16x16x4xf32>
    tpu.vector_store %arg5[%c0_78, %c0_79, %c0_80, %c0_81], %72 {strides = array<i32>} : memref<1x16x16x4xf32, #tpu.memory_space<vmem>>, vector<1x16x16x4xf32>,
    %cst_82 = arith.constant dense<0.000000e+00> : vector<4xf32>
    %74 = vector.multi_reduction <add>, %71, %cst_82 [0] : vector<256x4xf32> to vector<4xf32>
    %75 = vector.shape_cast %74 : vector<4xf32> to vector<1x4xf32>
    %76 = vector.shape_cast %75 : vector<1x4xf32> to vector<1x1x4xf32>
    %c0_83 = arith.constant 0 : index
    %c0_84 = arith.constant 0 : index
    %c0_85 = arith.constant 0 : index
    %77 = vector.load %arg6[%c0_83, %c0_84, %c0_85] : memref<1x1x4xf32, #tpu.memory_space<vmem>>, vector<1x1x4xf32>
    tpu.vector_store %arg6[%c0_83, %c0_84, %c0_85], %76 {strides = array<i32>} : memref<1x1x4xf32, #tpu.memory_space<vmem>>, vector<1x1x4xf32>,
    %78 = arith.mulf %71, %71 : vector<256x4xf32>
    %cst_86 = arith.constant dense<0.000000e+00> : vector<4xf32>
    %79 = vector.multi_reduction <add>, %78, %cst_86 [0] : vector<256x4xf32> to vector<4xf32>
    %80 = vector.shape_cast %79 : vector<4xf32> to vector<1x4xf32>
    %81 = vector.shape_cast %80 : vector<1x4xf32> to vector<1x1x4xf32>
    %c0_87 = arith.constant 0 : index
    %c0_88 = arith.constant 0 : index
    %c0_89 = arith.constant 0 : index
    %82 = vector.load %arg7[%c0_87, %c0_88, %c0_89] : memref<1x1x4xf32, #tpu.memory_space<vmem>>, vector<1x1x4xf32>
    tpu.vector_store %arg7[%c0_87, %c0_88, %c0_89], %81 {strides = array<i32>} : memref<1x1x4xf32, #tpu.memory_space<vmem>>, vector<1x1x4xf32>,
    return
  }
  func.func @transform_0(%arg0: i32) -> (i32, i32, i32, i32) {
    %c0_i32 = arith.constant 0 : i32
    %c0_i32_0 = arith.constant 0 : i32
    %c0_i32_1 = arith.constant 0 : i32
    %c0_i32_2 = arith.constant 0 : i32
    return %arg0, %c0_i32, %c0_i32_0, %c0_i32_1 : i32, i32, i32, i32
  }
  func.func @transform_1(%arg0: i32) -> (i32, i32) {
    %c0_i32 = arith.constant 0 : i32
    %c0_i32_0 = arith.constant 0 : i32
    %c0_i32_1 = arith.constant 0 : i32
    return %c0_i32, %c0_i32_0 : i32, i32
  }
  func.func @transform_2(%arg0: i32) -> (i32, i32) {
    %c0_i32 = arith.constant 0 : i32
    %c0_i32_0 = arith.constant 0 : i32
    %c0_i32_1 = arith.constant 0 : i32
    return %c0_i32, %c0_i32_0 : i32, i32
  }
  func.func @transform_3(%arg0: i32) -> (i32, i32, i32) {
    %c0_i32 = arith.constant 0 : i32
    %c0_i32_0 = arith.constant 0 : i32
    %c0_i32_1 = arith.constant 0 : i32
    %c0_i32_2 = arith.constant 0 : i32
    return %c0_i32, %c0_i32_0, %c0_i32_1 : i32, i32, i32
  }
  func.func @transform_4(%arg0: i32) -> (i32, i32, i32, i32) {
    %c0_i32 = arith.constant 0 : i32
    %c0_i32_0 = arith.constant 0 : i32
    %c0_i32_1 = arith.constant 0 : i32
    %c0_i32_2 = arith.constant 0 : i32
    return %arg0, %c0_i32, %c0_i32_0, %c0_i32_1 : i32, i32, i32, i32
  }
  func.func @transform_5(%arg0: i32) -> (i32, i32, i32) {
    %c0_i32 = arith.constant 0 : i32
    %c0_i32_0 = arith.constant 0 : i32
    %c0_i32_1 = arith.constant 0 : i32
    return %arg0, %c0_i32, %c0_i32_0 : i32, i32, i32
  }
  func.func @transform_6(%arg0: i32) -> (i32, i32, i32) {
    %c0_i32 = arith.constant 0 : i32
    %c0_i32_0 = arith.constant 0 : i32
    %c0_i32_1 = arith.constant 0 : i32
    return %arg0, %c0_i32, %c0_i32_0 : i32, i32, i32
  }
}

module attributes {stable_mosaic.version = 11 : i64} {
  func.func @_bn_relu_mm_add_kernel(%arg0: i32, %arg1: memref<128x4xf32, #tpu.memory_space<vmem>>, %arg2: memref<1x4xf32, #tpu.memory_space<vmem>>, %arg3: memref<1x4xf32, #tpu.memory_space<vmem>>, %arg4: memref<4x16xf32, #tpu.memory_space<vmem>>, %arg5: memref<128x16xf32, #tpu.memory_space<vmem>>, %arg6: memref<128x16xf32, #tpu.memory_space<vmem>>) attributes {dimension_semantics = [#tpu.dimension_semantics<parallel>], iteration_bounds = array<i64: 4>, scalar_prefetch = 0 : i64, scratch_operands = 0 : i64, tpu.core_type = #tpu.core_type<tc>, window_params = [{transform_indices = @transform_0, window_bounds = array<i64: 128, 4>}, {pipeline_mode = #tpu.pipeline_mode<synchronous>, transform_indices = @transform_1, window_bounds = array<i64: 1, 4>}, {pipeline_mode = #tpu.pipeline_mode<synchronous>, transform_indices = @transform_2, window_bounds = array<i64: 1, 4>}, {pipeline_mode = #tpu.pipeline_mode<synchronous>, transform_indices = @transform_3, window_bounds = array<i64: 4, 16>}, {transform_indices = @transform_4, window_bounds = array<i64: 128, 16>}, {transform_indices = @transform_5, window_bounds = array<i64: 128, 16>}]} {
    %c0 = arith.constant 0 : index
    %c0_0 = arith.constant 0 : index
    %0 = vector.load %arg1[%c0, %c0_0] : memref<128x4xf32, #tpu.memory_space<vmem>>, vector<128x4xf32>
    %c0_1 = arith.constant 0 : index
    %c0_2 = arith.constant 0 : index
    %1 = vector.load %arg2[%c0_1, %c0_2] : memref<1x4xf32, #tpu.memory_space<vmem>>, vector<1x4xf32>
    %2 = vector.broadcast %1 : vector<1x4xf32> to vector<128x4xf32>
    %3 = arith.mulf %0, %2 : vector<128x4xf32>
    %c0_3 = arith.constant 0 : index
    %c0_4 = arith.constant 0 : index
    %4 = vector.load %arg3[%c0_3, %c0_4] : memref<1x4xf32, #tpu.memory_space<vmem>>, vector<1x4xf32>
    %5 = vector.broadcast %4 : vector<1x4xf32> to vector<128x4xf32>
    %6 = arith.addf %3, %5 : vector<128x4xf32>
    %cst = arith.constant 0.000000e+00 : f32
    %7 = vector.broadcast %cst : f32 to vector<128x4xf32>
    %8 = arith.maximumf %6, %7 : vector<128x4xf32>
    %c0_5 = arith.constant 0 : index
    %c0_6 = arith.constant 0 : index
    %9 = vector.load %arg4[%c0_5, %c0_6] : memref<4x16xf32, #tpu.memory_space<vmem>>, vector<4x16xf32>
    %cst_7 = arith.constant dense<0.000000e+00> : vector<128x16xf32>
    %10 = tpu.matmul %8, %9, %cst_7 {dimension_numbers = #tpu.dot_dimension_numbers<[1], [0], [0], [1], [0, 0, 1, 1], [], []>} : vector<128x4xf32>, vector<4x16xf32>, vector<128x16xf32> -> vector<128x16xf32>
    %c0_8 = arith.constant 0 : index
    %c0_9 = arith.constant 0 : index
    %11 = vector.load %arg5[%c0_8, %c0_9] : memref<128x16xf32, #tpu.memory_space<vmem>>, vector<128x16xf32>
    %12 = arith.addf %10, %11 : vector<128x16xf32>
    %c0_10 = arith.constant 0 : index
    %c0_11 = arith.constant 0 : index
    %13 = vector.load %arg6[%c0_10, %c0_11] : memref<128x16xf32, #tpu.memory_space<vmem>>, vector<128x16xf32>
    tpu.vector_store %arg6[%c0_10, %c0_11], %12 {strides = array<i32>} : memref<128x16xf32, #tpu.memory_space<vmem>>, vector<128x16xf32>,
    return
  }
  func.func @transform_0(%arg0: i32) -> (i32, i32) {
    %c0_i32 = arith.constant 0 : i32
    %c0_i32_0 = arith.constant 0 : i32
    return %arg0, %c0_i32 : i32, i32
  }
  func.func @transform_1(%arg0: i32) -> (i32, i32) {
    %c0_i32 = arith.constant 0 : i32
    %c0_i32_0 = arith.constant 0 : i32
    %c0_i32_1 = arith.constant 0 : i32
    return %c0_i32, %c0_i32_0 : i32, i32
  }
  func.func @transform_2(%arg0: i32) -> (i32, i32) {
    %c0_i32 = arith.constant 0 : i32
    %c0_i32_0 = arith.constant 0 : i32
    %c0_i32_1 = arith.constant 0 : i32
    return %c0_i32, %c0_i32_0 : i32, i32
  }
  func.func @transform_3(%arg0: i32) -> (i32, i32) {
    %c0_i32 = arith.constant 0 : i32
    %c0_i32_0 = arith.constant 0 : i32
    %c0_i32_1 = arith.constant 0 : i32
    return %c0_i32, %c0_i32_0 : i32, i32
  }
  func.func @transform_4(%arg0: i32) -> (i32, i32) {
    %c0_i32 = arith.constant 0 : i32
    %c0_i32_0 = arith.constant 0 : i32
    return %arg0, %c0_i32 : i32, i32
  }
  func.func @transform_5(%arg0: i32) -> (i32, i32) {
    %c0_i32 = arith.constant 0 : i32
    %c0_i32_0 = arith.constant 0 : i32
    return %arg0, %c0_i32 : i32, i32
  }
}

</mosaic_0001>

<bundles_post_ra>
// kernel: tpu_custom_call.1
= control target key start
LH: loop header
LB: loop body
LE: loop exit
PB: predicated region body
PF: predicated region fallthrough
CT: control target
= control target key end

     0   :  { %6 = vsyncpa [#allocation3], 0  ;;  %s481_s0 = inlined_call_operand.hbm [shape: f32[8,128], index: 0, kind: input, shape index: {}]   ;;  %s482_s1 = inlined_call_operand.hbm [shape: f32[16,128], index: 1, kind: output, shape index: {}]  }
   0x1   :  { %7 = vsyncpa [#allocation4], 0 }
   0x2   :  { %9 = vsyncpa [#allocation4 + $0x1], 0  ;;  %s351_s6 = smov 0   ;;  %s353_s7 = smov 0  }
   0x3   :  { %s355_s8 = smov 0   ;;  %s357_s9 = smov 0  }
   0x4 LB: > { %s372_s10 = sadd.s32 4294967295, %s337_s9   ;;  %s183_s11 = sadd.s32 4294967294, %s337_s9   ;;  %s337_s9 = sphi %s357_s9, %s498_s9   ;;  %s333_s8 = sphi %s355_s8, %s497_s8   ;;  %s329_s7 = sphi %s353_s7, %s496_s7   ;;  %s325_s6 = sphi %s351_s6, %s495_s6  }
   0x5   : > { %s376_s12 = sadd.s32 1, %s337_s9   ;;  %s43_s13 = sadd.s32 1, %s333_s8 }
   0x6   : > { %s40_s14 = ssub.s32 %s337_s9, %s376_s12  ;;  %p53_p0 = scmp.ne.s32.totalorder %s333_s8, %s329_s7 }
   0x7   : > { %p41_p1 = scmp.eq.s32.totalorder %s40_s14, 0  ;;  %p54_p2 = scmp.eq.s32.totalorder %s372_s10, 1 }
   0x8   : > { %p59_p3 = scmp.ne.s32.totalorder %s329_s7, %s325_s6  ;;  %p60_p4 = scmp.eq.s32.totalorder %s183_s11, 1 }
   0x9   : > { %s387_s15 = scalar_select %p41_p1, %s333_s8, %s43_s13  }
   0xa   : > { %p389_p5 = por %p54_p2, %p53_p0  ;;  %p393_p6 = por %p60_p4, %p59_p3 }
   0xb   : > { %p184_p7 = scmp.ge.s32.totalorder %s337_s9, 1  ;;  %p67_p8 = scmp.lt.s32.totalorder %s337_s9, 3 }
   0xc   : > { %s486_s16 = scalar_select %p389_p5, 1, 0 }
   0xd   : > { %s487_s17 = scalar_select %p393_p6, 1, 0 }
   0xe   : > { %p483_p9 = scmp.eq.s32.totalorder %s372_s10, 0  ;;  %p400_p10 = pnand %p184_p7, %p67_p8 }
   0xf   : > { %s339_s19 = smov [#allocation2]   ;;  %s243_s24 = scalar_lea.hbm %s481_s0, 128 }
  0x10   : > { %s488_s18 = scalar_select %p400_p10, 1, 0 }
  0x11   : > { %s80_s20 = sshll.u32 %s339_s19, 4  ;;  %p199_p11 = pneg %p400_p10  ;;  %s81_s20 = int_to_ptr.vmem [resolvable:$true] %s80_s20 }
  0x12   : > { %p244_p13 = scmp.ne.s32.totalorder %s481_s0, %s243_s24  ;;  %p250_p3 = scmp.lt.u32.totalorder %s243_s24, %s481_s0 }
  0x13   : > { %p408_p12 = pnand %p483_p9, %p199_p11 }
  0x15   : > { %p245_p0 = pneg %p408_p12 }
  0x17   : > { %p246_p1 = pnand %p245_p0, %p244_p13 }
  0x19   : > { %p247_p2 = pneg %p246_p1 }
  0x1b   : > { %p252_p4 = pnand %p250_p3, %p247_p2 }
  0x1d   : > { %255 = shalt.err (!%p252_p4)
}
  0x1e   : > { %s256_s29 = scalar_lea.vmem %s81_s20, 128  ;;  %p264_p9 = scmp.lt.s32.totalorder %s81_s20, %s81_s20 }
  0x1f   : > { %p257_p7 = scmp.ne.s32.totalorder %s81_s20, %s256_s29  ;;  %p265_p6 = scmp.lt.s32.totalorder %s256_s29, %s256_s29 }
  0x21   : > { %p259_p8 = pnand %p257_p7, %p245_p0  ;;  %p266_p5 = por %p265_p6, %p264_p9 }
  0x23   : > { %p260_p11 = pneg %p259_p8 }
  0x25   : > { %p267_p10 = pnand %p266_p5, %p260_p11 }
  0x27   : > { %270 = shalt.err (!%p267_p10)
}
  0x28   : > { %202 = dma.hbm_to_vmem [thread:$0]  (!%p408_p12), %s481_s0, 128, %s81_s20, [#allocation3]  }
  0x29   : > { %p490_p13 = scmp.ne.s32.totalorder %s488_s18, 0 }
  0x2a   : > { %p491_p1 = scmp.eq.s32.totalorder (!%p490_p13), %s372_s10, 0 }
  0x2b   : > { %93 = sbr.rel (%p490_p13) target bundleno = 77 (0x4d), region = 24 }
  0x32   : > { %316 = dma.done.wait (%p491_p1), [#allocation3], 128   ;;  %p492_p0 = pmov %p491_p1 }
  0x33   : > { %s105_s3 = sand.u32 1, %s329_s7   ;;  %s190_s13 = sshll.u32 %s372_s10, 7  ;;  %v108_v0 = vld [vmem:[#allocation2] sm:$0xff] }
  0x34   : > { %318 = vsyncadd (%p492_p0), [#allocation3], 4294967168  ;;  %s188_s4 = sshll.u32 %s105_s3, 3  ;;  %s441_s18 = scalar_lea.hbm %s482_s1, %s190_s13 }
  0x35   : > { %s107_s5 = scalar_lea.vmem [#allocation5], %s188_s4  ;;  %s111_s20 = scalar_lea.sflag [#allocation4], %s105_s3 }
  0x36   : > { %s124_s11 = sshll.u32 %s107_s5, 4  ;;  %109 = vst [vmem:[%s107_s5] sm:$0xff] %v108_v0  ;;  %p493_p6 = scmp.ne.s32.totalorder %s486_s16, 0  ;;  %s436_s11 = int_to_ptr.vmem [resolvable:$true] %s124_s11 }
  0x37   : > { %s271_s21 = scalar_lea.vmem %s436_s11, 128  ;;  %s340_s22 = smov [#allocation5]  }
  0x38   : > { %p272_p5 = scmp.ne.s32.totalorder %s436_s11, %s271_s21  ;;  %s275_s10 = sshll.u32 %s340_s22, 4  ;;  %s276_s10 = int_to_ptr.vmem [resolvable:$false] %s275_s10 }
  0x39   : > { %s277_s23 = scalar_lea.vmem %s276_s10, 256  ;;  %p278_p12 = scmp.lt.s32.totalorder %s436_s11, %s276_s10 }
  0x3a   : > { %p273_p9 = pnand %p272_p5, %p493_p6  ;;  %p279_p2 = scmp.lt.s32.totalorder %s277_s23, %s271_s21 }
  0x3c   : > { %p274_p10 = pneg %p273_p9  ;;  %p280_p3 = por %p279_p2, %p278_p12 }
  0x3e   : > { %p281_p4 = pnand %p280_p3, %p274_p10 }
  0x40   : > { %284 = shalt.err (!%p281_p4)
}
  0x41   : > { %s285_s24 = scalar_lea.hbm %s441_s18, 128  ;;  %s289_s27 = scalar_lea.hbm %s482_s1, 256 }
  0x42   : > { %p286_p7 = scmp.ne.s32.totalorder %s441_s18, %s285_s24  ;;  %p290_p13 = scmp.lt.u32.totalorder %s441_s18, %s482_s1 }
  0x43   : > { %p291_p1 = scmp.lt.u32.totalorder %s289_s27, %s285_s24  ;;  %p293_p5 = scmp.lt.u32.totalorder %s285_s24, %s441_s18 }
  0x44   : > { %p287_p8 = pnand %p286_p7, %p493_p6 }
  0x45   : > { %p292_p0 = por %p291_p1, %p290_p13 }
  0x46   : > { %p288_p11 = pneg %p287_p8 }
  0x47   : > { %p294_p9 = por %p293_p5, %p292_p0 }
  0x49   : > { %p295_p10 = pnand %p294_p9, %p288_p11 }
  0x4b   : > { %298 = shalt.err (!%p295_p10)
}
  0x4c   : > { %197 = dma.vmem_to_hbm [thread:$0]  (%p493_p6), %s436_s11, 128, %s441_s18, %s111_s20  }
  0x4d PF: > { %p209_p12 = scmp.ge.s32.totalorder %s337_s9, 2  ;;  %s136_s30 = sand.u32 1, %s325_s6  }
  0x4e   : > { %p494_p2 = scmp.ne.s32.totalorder %s487_s17, 0  ;;  %s137_s2 = scalar_lea.sflag [#allocation4], %s136_s30 }
  0x50   : > { %p204_p3 = pnand %p209_p12, %p494_p2 }
  0x52   : > { %320 = dma.done.wait (!%p204_p3), %s137_s2, 128  }
  0x53   : > { %322 = vsyncadd (!%p204_p3), %s137_s2, 4294967168  ;;  %p12_p4 = scmp.ge.s32.totalorder %s376_s12, 4   ;;  %s495_s6 = smov %s329_s7 }
  0x54   : > { %s496_s7 = smov %s333_s8  ;;  %s497_s8 = smov %s387_s15 }
  0x55   : > { %s498_s9 = smov %s376_s12  ;;  %14 = sbr.rel (!%p12_p4) target bundleno = 4 (0x4), region = 61 }
  0x5c   :  { %142 = vsyncpa [#allocation3], 1 }
  0x5d   :  { %144 = vsyncpa [#allocation3 + $0x1], 1 }
  0x5e   :  { %145 = vsyncpa [#allocation4], 1 }
  0x5f   :  { %147 = vsyncpa [#allocation4 + $0x1], 1 }

// kernel: bottleneck_curve_forward.3
= control target key start
LH: loop header
LB: loop body
LE: loop exit
PB: predicated region body
PF: predicated region fallthrough
CT: control target
= control target key end

     0   :  { %s894_s21 = smov 0   ;;  %s1077_s0 = inlined_call_operand.vmem [shape: f32[512,16], index: 0, kind: input, shape index: {}]   ;;  %s1078_s1 = inlined_call_operand.vmem [shape: f32[1,16], index: 1, kind: input, shape index: {}]   ;;  %s1079_s2 = inlined_call_operand.vmem [shape: f32[1,16], index: 2, kind: input, shape index: {}]   ;;  %s1080_s3 = inlined_call_operand.vmem [shape: f32[16,4], index: 3, kind: input, shape index: {}]   ;;  %s1081_s4 = inlined_call_operand.vmem [shape: f32[512,4], index: 4, kind: output, shape index: {0}]   ;;  %s1082_s5 = inlined_call_operand.vmem [shape: f32[4,1,4], index: 5, kind: output, shape index: {1}]   ;;  %s1083_s6 = inlined_call_operand.vmem [shape: f32[4,1,4], index: 6, kind: output, shape index: {2}]  }
   0x1 LB: > { %s900_s22 = sadd.s32 4294967295, %s857_s21   ;;  %p766_p0 = scmp.ge.s32.totalorder %s857_s21, 1  ;;  %s857_s21 = sphi %s894_s21, %s17_s21  }
   0x2   : > { %p218_p1 = scmp.lt.s32.totalorder %s857_s21, 5 }
   0x4   : > { %p219_p2 = pnand %p766_p0, %p218_p1 }
   0x5   : > { %v350_v0 = vld [vmem:[%s1080_s3] sm:$0xff] (!%p219_p2)  ;;  %v351_v1 = vld [vmem:[%s1080_s3 + $0x8] sm:$0xff] (!%p219_p2)  ;;  %s767_s27 = sshll.u32 (!%p219_p2), %s900_s22, 4  ;;  %vm352_vm0 = vcmask (!%p219_p2), 130048   ;;  %vm546_vm1 = vcmask (!%p219_p2), 31744   ;;  %p266_p4 = scmp.lt.s32.totalorder (!%p219_p2), %s900_s22, 3 }
   0x6   : > { %222 = sbr.rel (%p219_p2) target bundleno = 285 (0x11d), region = 36  ;;  %v837_v2 = vpack.c.bf16 (!%p219_p2), %v351_v1, %v350_v0  ;;  %p255_p3 = scmp.lt.s32.totalorder (!%p219_p2), %s767_s27, 63  ;;  %v917_v3 = vld [vmem:[%s1078_s1] ss:$0 sm:$0xff] (!%p219_p2)  ;;  %vm600_vm2 = vcmask (!%p219_p2), 24576  }
   0x7   : > { %v929_v4 = vld [vmem:[%s1079_s2] ss:$0 sm:$0xff] (!%p219_p2) }
   0x8   : > { %838 = vmatprep.subr.bf16.mxu0 (!%p219_p2), %v837_v2  ;;  %841 = vmatprep.subr.bf16.mxu1 (!%p219_p2), %v837_v2 }
   0x9   : > { %840 = vmatpush3.bf16.msra.mxu0 (!%p219_p2), %v837_v2  ;;  %842 = vmatpush3.bf16.msra.mxu1 (!%p219_p2), %v837_v2 }
   0xd   : > { %s1085_s27 = smov (!%p255_p3, %s767_s27), 63  ;;  %s1087_s22 = smov (!%p266_p4, %s900_s22), 3 }
   0xe   : > { %s768_s28 = sshll.u32 %s1085_s27, 3  ;;  %s268_s17 = scalar_lea.vmem %s1082_s5, %s1087_s22 }
   0xf   : > { %s924_s9 = scalar_lea.vmem %s1077_s0, %s768_s28  ;;  %s1000_s14 = scalar_lea.vmem %s1081_s4, %s768_s28 }
  0x10   : > { %v272_v5 = vld [vmem:[%s924_s9] sm:$0xff]  ;;  %v273_v6 = vld [vmem:[%s924_s9 + $0x8] sm:$0xff]  ;;  %v274_v7 = vld [vmem:[%s924_s9 + $0x10] sm:$0xff]  ;;  %s271_s20 = scalar_lea.vmem %s1083_s6, %s1087_s22 }
  0x11   : > { %v295_v8 = vmul.f32 %v917_v3, %v272_v5  ;;  %v296_v9 = vmul.f32 %v917_v3, %v273_v6  ;;  %v297_v10 = vmul.f32 %v917_v3, %v274_v7  ;;  %v275_v11 = vld [vmem:[%s924_s9 + $0x18] sm:$0xff]  ;;  %v276_v12 = vld [vmem:[%s924_s9 + $0x20] sm:$0xff]  ;;  %v277_v13 = vld [vmem:[%s924_s9 + $0x28] sm:$0xff] }
  0x12   : > { %v298_v14 = vmul.f32 %v917_v3, %v275_v11  ;;  %v299_v15 = vmul.f32 %v917_v3, %v276_v12  ;;  %v300_v16 = vmul.f32 %v917_v3, %v277_v13  ;;  %v278_v17 = vld [vmem:[%s924_s9 + $0x30] sm:$0xff]  ;;  %v279_v21 = vld [vmem:[%s924_s9 + $0x38] sm:$0xff]  ;;  %v280_v24 = vld [vmem:[%s924_s9 + $0x40] sm:$0xff] }
  0x13   : > { %v318_v18 = vadd.f32 %v929_v4, %v295_v8  ;;  %v319_v19 = vadd.f32 %v929_v4, %v296_v9  ;;  %v320_v20 = vadd.f32 %v929_v4, %v297_v10  ;;  %v301_v23 = vmul.f32 %v917_v3, %v278_v17  ;;  %v281_v25 = vld [vmem:[%s924_s9 + $0x48] sm:$0xff]  ;;  %v282_v26 = vld [vmem:[%s924_s9 + $0x50] sm:$0xff]  ;;  %v283_v31 = vld [vmem:[%s924_s9 + $0x58] sm:$0xff] }
  0x14   : > { %v321_v22 = vadd.f32 %v929_v4, %v298_v14  ;;  %v322_v30 = vadd.f32 %v929_v4, %v299_v15  ;;  %v284_v32 = vld [vmem:[%s924_s9 + $0x60] sm:$0xff]  ;;  %v323_v33 = vadd.f32 %v929_v4, %v300_v16  ;;  %v302_v34 = vmul.f32 %v917_v3, %v279_v21  ;;  %v285_v38 = vld [vmem:[%s924_s9 + $0x68] sm:$0xff]  ;;  %v286_v39 = vld [vmem:[%s924_s9 + $0x70] sm:$0xff] }
  0x15   : > { %v334_v27 = vmax.f32 %v318_v18, 0.0  ;;  %v335_v28 = vmax.f32 %v319_v19, 0.0  ;;  %v336_v29 = vmax.f32 %v320_v20, 0.0  ;;  %v303_v35 = vmul.f32 %v917_v3, %v280_v24  ;;  %v287_v55 = vld [vmem:[%s924_s9 + $0x78] sm:$0xff] }
  0x16   : > { %v304_v36 = vmul.f32 %v917_v3, %v281_v25  ;;  %v305_v37 = vmul.f32 %v917_v3, %v282_v26  ;;  %v337_v40 = vmax.f32 %v321_v22, 0.0  ;;  %v324_v41 = vadd.f32 %v929_v4, %v301_v23 }
  0x17   : > { %813 = vmatprep.mubr.msk.f32.mxu0 %vm352_vm0, %v334_v27  ;;  %v306_v42 = vmul.f32 %v917_v3, %v283_v31  ;;  %v307_v43 = vmul.f32 %v917_v3, %v284_v32  ;;  %v338_v44 = vmax.f32 %v322_v30, 0.0  ;;  %v326_v45 = vadd.f32 %v929_v4, %v303_v35 }
  0x18   : > { %814 = vmatmul.mubr.msk.f32.vlgmr.msra.gmra.mrb[0].mxu0 %vm352_vm0, %v335_v28  ;;  %v327_v46 = vadd.f32 %v929_v4, %v304_v36  ;;  %v328_v47 = vadd.f32 %v929_v4, %v305_v37  ;;  %v308_v49 = vmul.f32 %v917_v3, %v285_v38  ;;  %v309_v50 = vmul.f32 %v917_v3, %v286_v39 }
  0x19   : > { %816 = vmatprep.mubr.msk.f32.mxu0 %vm352_vm0, %v336_v29  ;;  %v329_v48 = vadd.f32 %v929_v4, %v306_v42  ;;  %v342_v51 = vmax.f32 %v326_v45, 0.0  ;;  %v330_v54 = vadd.f32 %v929_v4, %v307_v43  ;;  %v339_v56 = vmax.f32 %v323_v33, 0.0 }
  0x1a   : > { %v343_v52 = vmax.f32 %v327_v46, 0.0  ;;  %v344_v53 = vmax.f32 %v328_v47, 0.0  ;;  %v325_v57 = vadd.f32 %v929_v4, %v302_v34  ;;  %v340_v58 = vmax.f32 %v324_v41, 0.0 }
  0x1b   : > { %825 = vmatprep.mubr.msk.f32.mxu1 %vm352_vm0, %v342_v51  ;;  %v345_v59 = vmax.f32 %v329_v48, 0.0  ;;  %v331_v60 = vadd.f32 %v929_v4, %v308_v49  ;;  %v310_v61 = vmul.f32 %v917_v3, %v287_v55  ;;  %v346_v62 = vmax.f32 %v330_v54, 0.0 }
  0x1c   : > { %817 = vmatmul.mubr.msk.f32.gmra.mrb[2].mxu0 %vm352_vm0, %v337_v40  ;;  %826 = vmatmul.mubr.msk.f32.vlgmr.msra.gmra.mrb[0].mxu1 %vm352_vm0, %v343_v52  ;;  %v332_v63 = vadd.f32 %v929_v4, %v309_v50  ;;  %v341_v0 = vmax.f32 %v325_v57, 0.0 }
  0x1d   : > { %819 = vmatprep.mubr.msk.f32.mxu0 %vm352_vm0, %v338_v44  ;;  %828 = vmatprep.mubr.msk.f32.mxu1 %vm352_vm0, %v344_v53  ;;  %v347_v1 = vmax.f32 %v331_v60, 0.0  ;;  %v333_v2 = vadd.f32 %v929_v4, %v310_v61 }
  0x1e   : > { %v348_v5 = vmax.f32 %v332_v63, 0.0 }
  0x1f   : > { %v349_v3 = vmax.f32 %v333_v2, 0.0 }
  0x20   : > { %820 = vmatmul.mubr.msk.f32.gmra.mrb[4].mxu0 %vm352_vm0, %v339_v56  ;;  %829 = vmatmul.mubr.msk.f32.gmra.mrb[2].mxu1 %vm352_vm0, %v345_v59 }
  0x21   : > { %822 = vmatprep.mubr.msk.f32.mxu0 %vm352_vm0, %v340_v58  ;;  %831 = vmatprep.mubr.msk.f32.mxu1 %vm352_vm0, %v346_v62 }
  0x24   : > { %823 = vmatmul.mubr.msk.f32.gmra.mrb[6].mxu0 %vm352_vm0, %v341_v0  ;;  %832 = vmatmul.mubr.msk.f32.gmra.mrb[4].mxu1 %vm352_vm0, %v347_v1 }
  0x25   : > { %834 = vmatprep.mubr.msk.f32.mxu1 %vm352_vm0, %v348_v5 }
  0x28   : > { %835 = vmatmul.mubr.msk.f32.gmra.mrb[6].mxu1 %vm352_vm0, %v349_v3 }
  0xeb   : > { %v815_v4 = vpop.f32.mrb[0].mxu0 }
  0xec   : > { %548 = vst.msk [vmem:[%s1000_s14 + $0x8] sm:$0xff] %vm546_vm1, %v815_v4  ;;  %v564_v6 = vsel %vm546_vm1, %v815_v4, 0.0  ;;  %v603_v7 = vmul.f32 %v815_v4, %v815_v4  ;;  %v467_v8 = vpop.f32.mrb[1].mxu0 }
  0xed   : > { %547 = vst.msk [vmem:[%s1000_s14] sm:$0xff] %vm546_vm1, %v467_v8  ;;  %v563_v9 = vsel %vm546_vm1, %v467_v8, 0.0  ;;  %v602_v10 = vmul.f32 %v467_v8, %v467_v8 }
  0xee   : > { %v619_v11 = vsel %vm546_vm1, %v603_v7, 0.0  ;;  %v565_v12 = vadd.f32 %v564_v6, %v563_v9 }
  0xef   : > { %v618_v13 = vsel %vm546_vm1, %v602_v10, 0.0  ;;  %v818_v14 = vpop.f32.mrb[2].mxu0  ;;  %v827_v20 = vpop.f32.mrb[0].mxu1 }
  0xf0   : > { %v620_v15 = vadd.f32 %v619_v11, %v618_v13  ;;  %550 = vst.msk [vmem:[%s1000_s14 + $0x18] sm:$0xff] %vm546_vm1, %v818_v14  ;;  %v477_v16 = vpop.f32.mrb[3].mxu0  ;;  %v605_v17 = vmul.f32 %v818_v14, %v818_v14  ;;  %556 = vst.msk [vmem:[%s1000_s14 + $0x48] sm:$0xff] %vm546_vm1, %v827_v20  ;;  %v507_v22 = vpop.f32.mrb[1].mxu1  ;;  %v568_v23 = vsel %vm546_vm1, %v818_v14, 0.0  ;;  %v611_v58 = vmul.f32 %v827_v20, %v827_v20 }
  0xf1   : > { %549 = vst.msk [vmem:[%s1000_s14 + $0x10] sm:$0xff] %vm546_vm1, %v477_v16  ;;  %v566_v18 = vsel %vm546_vm1, %v477_v16, 0.0  ;;  %v604_v19 = vmul.f32 %v477_v16, %v477_v16  ;;  %555 = vst.msk [vmem:[%s1000_s14 + $0x40] sm:$0xff] %vm546_vm1, %v507_v22  ;;  %v610_v43 = vmul.f32 %v507_v22, %v507_v22  ;;  %v578_v54 = vsel %vm546_vm1, %v507_v22, 0.0 }
  0xf2   : > { %v567_v21 = vadd.f32 %v566_v18, %v565_v12  ;;  %v623_v29 = vsel %vm546_vm1, %v605_v17, 0.0  ;;  %v580_v1 = vsel %vm546_vm1, %v827_v20, 0.0  ;;  %v635_v4 = vsel %vm546_vm1, %v611_v58, 0.0 }
  0xf3   : > { %v621_v24 = vsel %vm546_vm1, %v604_v19, 0.0  ;;  %v821_v25 = vpop.f32.mrb[4].mxu0  ;;  %v830_v33 = vpop.f32.mrb[2].mxu1  ;;  %v633_v59 = vsel %vm546_vm1, %v610_v43, 0.0 }
  0xf4   : > { %v622_v26 = vadd.f32 %v621_v24, %v620_v15  ;;  %552 = vst.msk [vmem:[%s1000_s14 + $0x28] sm:$0xff] %vm546_vm1, %v821_v25  ;;  %v487_v27 = vpop.f32.mrb[5].mxu0  ;;  %v569_v28 = vadd.f32 %v568_v23, %v567_v21  ;;  %v607_v30 = vmul.f32 %v821_v25, %v821_v25  ;;  %558 = vst.msk [vmem:[%s1000_s14 + $0x58] sm:$0xff] %vm546_vm1, %v830_v33  ;;  %v517_v36 = vpop.f32.mrb[3].mxu1  ;;  %v572_v37 = vsel %vm546_vm1, %v821_v25, 0.0 }
  0xf5   : > { %551 = vst.msk [vmem:[%s1000_s14 + $0x20] sm:$0xff] %vm546_vm1, %v487_v27  ;;  %v570_v31 = vsel %vm546_vm1, %v487_v27, 0.0  ;;  %v606_v32 = vmul.f32 %v487_v27, %v487_v27  ;;  %557 = vst.msk [vmem:[%s1000_s14 + $0x50] sm:$0xff] %vm546_vm1, %v517_v36  ;;  %v612_v60 = vmul.f32 %v517_v36, %v517_v36  ;;  %v582_v2 = vsel %vm546_vm1, %v517_v36, 0.0 }
  0xf6   : > { %v571_v34 = vadd.f32 %v570_v31, %v569_v28  ;;  %v624_v35 = vadd.f32 %v623_v29, %v622_v26  ;;  %v627_v44 = vsel %vm546_vm1, %v607_v30, 0.0  ;;  %v613_v6 = vmul.f32 %v830_v33, %v830_v33 }
  0xf7   : > { %v625_v38 = vsel %vm546_vm1, %v606_v32, 0.0  ;;  %v824_v39 = vpop.f32.mrb[6].mxu0  ;;  %v833_v48 = vpop.f32.mrb[4].mxu1  ;;  %v637_v7 = vsel %vm546_vm1, %v612_v60, 0.0  ;;  %v584_v11 = vsel %vm546_vm1, %v830_v33, 0.0 }
  0xf8   : > { %v626_v40 = vadd.f32 %v625_v38, %v624_v35  ;;  %554 = vst.msk [vmem:[%s1000_s14 + $0x38] sm:$0xff] %vm546_vm1, %v824_v39  ;;  %v497_v41 = vpop.f32.mrb[7].mxu0  ;;  %v573_v42 = vadd.f32 %v572_v37, %v571_v34  ;;  %v609_v45 = vmul.f32 %v824_v39, %v824_v39  ;;  %560 = vst.msk [vmem:[%s1000_s14 + $0x68] sm:$0xff] %vm546_vm1, %v833_v48  ;;  %v527_v51 = vpop.f32.mrb[5].mxu1  ;;  %v576_v52 = vsel %vm546_vm1, %v824_v39, 0.0 }
  0xf9   : > { %553 = vst.msk [vmem:[%s1000_s14 + $0x30] sm:$0xff] %vm546_vm1, %v497_v41  ;;  %v574_v46 = vsel %vm546_vm1, %v497_v41, 0.0  ;;  %v608_v47 = vmul.f32 %v497_v41, %v497_v41  ;;  %559 = vst.msk [vmem:[%s1000_s14 + $0x60] sm:$0xff] %vm546_vm1, %v527_v51  ;;  %v614_v8 = vmul.f32 %v527_v51, %v527_v51  ;;  %v586_v12 = vsel %vm546_vm1, %v527_v51, 0.0 }
  0xfa   : > { %v575_v49 = vadd.f32 %v574_v46, %v573_v42  ;;  %v628_v50 = vadd.f32 %v627_v44, %v626_v40  ;;  %v631_v57 = vsel %vm546_vm1, %v609_v45, 0.0  ;;  %v639_v15 = vsel %vm546_vm1, %v613_v6, 0.0 }
  0xfb   : > { %v629_v53 = vsel %vm546_vm1, %v608_v47, 0.0  ;;  %v836_v61 = vpop.f32.mrb[6].mxu1  ;;  %v615_v16 = vmul.f32 %v833_v48, %v833_v48  ;;  %v641_v17 = vsel %vm546_vm1, %v614_v8, 0.0  ;;  %v588_v21 = vsel %vm546_vm1, %v833_v48, 0.0 }
  0xfc   : > { %v577_v55 = vadd.f32 %v576_v52, %v575_v49  ;;  %v630_v56 = vadd.f32 %v629_v53, %v628_v50  ;;  %562 = vst.msk [vmem:[%s1000_s14 + $0x78] sm:$0xff] %vm546_vm1, %v836_v61  ;;  %v537_v0 = vpop.f32.mrb[7].mxu1  ;;  %v617_v26 = vmul.f32 %v836_v61, %v836_v61  ;;  %v592_v30 = vsel %vm546_vm1, %v836_v61, 0.0 }
  0xfd   : > { %561 = vst.msk [vmem:[%s1000_s14 + $0x70] sm:$0xff] %vm546_vm1, %v537_v0  ;;  %v616_v18 = vmul.f32 %v537_v0, %v537_v0  ;;  %v590_v22 = vsel %vm546_vm1, %v537_v0, 0.0  ;;  %v643_v25 = vsel %vm546_vm1, %v615_v16, 0.0 }
  0xfe   : > { %v632_v62 = vadd.f32 %v631_v57, %v630_v56  ;;  %v579_v63 = vadd.f32 %v578_v54, %v577_v55  ;;  %v647_v33 = vsel %vm546_vm1, %v617_v26, 0.0 }
  0xff   : > { %v645_v27 = vsel %vm546_vm1, %v616_v18, 0.0 }
 0x100   : > { %v634_v5 = vadd.f32 %v633_v59, %v632_v62  ;;  %v581_v3 = vadd.f32 %v580_v1, %v579_v63 }
 0x102   : > { %v583_v9 = vadd.f32 %v582_v2, %v581_v3  ;;  %v636_v10 = vadd.f32 %v635_v4, %v634_v5 }
 0x104   : > { %v638_v13 = vadd.f32 %v637_v7, %v636_v10  ;;  %v585_v14 = vadd.f32 %v584_v11, %v583_v9 }
 0x106   : > { %v587_v19 = vadd.f32 %v586_v12, %v585_v14  ;;  %v640_v20 = vadd.f32 %v639_v15, %v638_v13 }
 0x108   : > { %v642_v23 = vadd.f32 %v641_v17, %v640_v20  ;;  %v589_v24 = vadd.f32 %v588_v21, %v587_v19 }
 0x10a   : > { %v591_v28 = vadd.f32 %v590_v22, %v589_v24  ;;  %v644_v29 = vadd.f32 %v643_v25, %v642_v23 }
 0x10c   : > { %v593_v31 = vadd.f32 %v592_v30, %v591_v28  ;;  %v646_v32 = vadd.f32 %v645_v27, %v644_v29 }
 0x10e   : > { %v594_v34 = vrot.slane %v593_v31, 4  ;;  %v648_v35 = vadd.f32 %v647_v33, %v646_v32 }
 0x110   : > { %v595_v36 = vadd.f32 %v594_v34, %v593_v31  ;;  %v649_v37 = vrot.slane %v648_v35, 4 }
 0x112   : > { %v596_v38 = vrot.slane %v595_v36, 2  ;;  %v650_v39 = vadd.f32 %v649_v37, %v648_v35 }
 0x114   : > { %v597_v40 = vadd.f32 %v596_v38, %v595_v36  ;;  %v651_v41 = vrot.slane %v650_v39, 2 }
 0x116   : > { %v598_v42 = vrot.slane %v597_v40, 1  ;;  %v652_v43 = vadd.f32 %v651_v41, %v650_v39 }
 0x118   : > { %v599_v44 = vadd.f32 %v598_v42, %v597_v40  ;;  %v653_v45 = vrot.slane %v652_v43, 1 }
 0x11a   : > { %601 = vst.msk [vmem:[%s268_s17] sm:$0x1] %vm600_vm2, %v599_v44  ;;  %v654_v46 = vadd.f32 %v653_v45, %v652_v43 }
 0x11c   : > { %655 = vst.msk [vmem:[%s271_s20] sm:$0x1] %vm600_vm2, %v654_v46 }
 0x11d PF: > { %s17_s21 = sadd.s32 1, %s857_s21  }
 0x11e   : > { %p14_p5 = scmp.ge.s32.totalorder %s17_s21, 6  }
 0x120   :  { %16 = sbr.rel (!%p14_p5) target bundleno = 1 (0x1), region = 90 }

// kernel: bottleneck_curve_forward.5
= control target key start
LH: loop header
LB: loop body
LE: loop exit
PB: predicated region body
PF: predicated region fallthrough
CT: control target
= control target key end

     0   :  { %s751_s18 = smov 0   ;;  %s889_s0 = inlined_call_operand.vmem [shape: f32[512,4], index: 0, kind: input, shape index: {}]   ;;  %s890_s1 = inlined_call_operand.vmem [shape: f32[1,4], index: 1, kind: input, shape index: {}]   ;;  %s891_s2 = inlined_call_operand.vmem [shape: f32[1,4], index: 2, kind: input, shape index: {}]   ;;  %s892_s3 = inlined_call_operand.vmem [shape: f32[4,16], index: 3, kind: input, shape index: {}]   ;;  %s893_s4 = inlined_call_operand.vmem [shape: f32[512,16], index: 4, kind: input, shape index: {}, may-alias: {4,5}]   ;;  %s894_s5 = inlined_call_operand.vmem [shape: f32[512,16], index: 5, kind: output, shape index: {}, may-alias: {4,5}]  }
   0x1 LB: > { %s628_s19 = sadd.s32 4294967295, %s719_s18   ;;  %p632_p0 = scmp.ge.s32.totalorder %s719_s18, 1  ;;  %s719_s18 = sphi %s751_s18, %s15_s18  }
   0x2   : > { %p199_p1 = scmp.lt.s32.totalorder %s719_s18, 5 }
   0x4   : > { %p200_p2 = pnand %p632_p0, %p199_p1 }
   0x5   : > { %v328_v0 = vld [vmem:[%s892_s3] sm:$0xf] (!%p200_p2)  ;;  %vm394_vm0 = vcmask (!%p200_p2), 1043456   ;;  %s633_s22 = sshll.u32 (!%p200_p2), %s628_s19, 4  ;;  %vm345_vm1 = vcmask (!%p200_p2), 31744   ;;  %vm543_vm2 = vcmask (!%p200_p2), 130048  }
   0x6   : > { %203 = sbr.rel (%p200_p2) target bundleno = 253 (0xfd), region = 40  ;;  %677 = vmatprep.subr.msk.mxu0 (!%p200_p2), %vm394_vm0, %v328_v0  ;;  %703 = vmatprep.subr.msk.mxu1 (!%p200_p2), %vm394_vm0, %v328_v0  ;;  %p233_p3 = scmp.lt.s32.totalorder (!%p200_p2), %s633_s22, 63  ;;  %v767_v1 = vld [vmem:[%s890_s1] ss:$0 sm:$0xff] (!%p200_p2) }
   0x7   : > { %678 = vmatpush3.msk.msra.mxu0 (!%p200_p2), %vm394_vm0, %v328_v0  ;;  %704 = vmatpush3.msk.msra.mxu1 (!%p200_p2), %vm394_vm0, %v328_v0  ;;  %v778_v2 = vld [vmem:[%s891_s2] ss:$0 sm:$0xff] (!%p200_p2) }
   0xd   : > { %s896_s22 = smov (!%p233_p3, %s633_s22), 63 }
   0xe   : > { %s762_s23 = sshll.u32 %s896_s22, 3 }
   0xf   : > { %s773_s28 = scalar_lea.vmem %s889_s0, %s762_s23  ;;  %s242_s8 = scalar_lea.vmem %s893_s4, %s762_s23 }
  0x10   : > { %v250_v3 = vld [vmem:[%s773_s28] sm:$0xff]  ;;  %v251_v5 = vld [vmem:[%s773_s28 + $0x8] sm:$0xff]  ;;  %v252_v10 = vld [vmem:[%s773_s28 + $0x10] sm:$0xff]  ;;  %s852_s11 = scalar_lea.vmem %s894_s5, %s762_s23 }
  0x11   : > { %v258_v4 = vld [vmem:[%s773_s28 + $0x40] sm:$0xff]  ;;  %v273_v6 = vmul.f32 %v767_v1, %v250_v3  ;;  %v274_v8 = vmul.f32 %v767_v1, %v251_v5  ;;  %v259_v9 = vld [vmem:[%s773_s28 + $0x48] sm:$0xff]  ;;  %v260_v11 = vld [vmem:[%s773_s28 + $0x50] sm:$0xff]  ;;  %v275_v13 = vmul.f32 %v767_v1, %v252_v10 }
  0x12   : > { %v281_v7 = vmul.f32 %v767_v1, %v258_v4  ;;  %v282_v12 = vmul.f32 %v767_v1, %v259_v9  ;;  %v283_v14 = vmul.f32 %v767_v1, %v260_v11  ;;  %v253_v15 = vld [vmem:[%s773_s28 + $0x18] sm:$0xff]  ;;  %v254_v25 = vld [vmem:[%s773_s28 + $0x20] sm:$0xff]  ;;  %v255_v27 = vld [vmem:[%s773_s28 + $0x28] sm:$0xff] }
  0x13   : > { %v261_v16 = vld [vmem:[%s773_s28 + $0x58] sm:$0xff]  ;;  %v296_v17 = vadd.f32 %v778_v2, %v273_v6  ;;  %v297_v19 = vadd.f32 %v778_v2, %v274_v8  ;;  %v276_v20 = vmul.f32 %v767_v1, %v253_v15  ;;  %v298_v22 = vadd.f32 %v778_v2, %v275_v13  ;;  %v262_v26 = vld [vmem:[%s773_s28 + $0x60] sm:$0xff]  ;;  %v263_v32 = vld [vmem:[%s773_s28 + $0x68] sm:$0xff] }
  0x14   : > { %v304_v18 = vadd.f32 %v778_v2, %v281_v7  ;;  %v305_v21 = vadd.f32 %v778_v2, %v282_v12  ;;  %v306_v23 = vadd.f32 %v778_v2, %v283_v14  ;;  %v284_v24 = vmul.f32 %v767_v1, %v261_v16  ;;  %v256_v33 = vld [vmem:[%s773_s28 + $0x30] sm:$0xff]  ;;  %v257_v43 = vld [vmem:[%s773_s28 + $0x38] sm:$0xff]  ;;  %v338_v4 = vld [vmem:[%s242_s8 + $0x48] sm:$0xff] }
  0x15   : > { %v312_v28 = vmax.f32 %v296_v17, 0.0  ;;  %v313_v30 = vmax.f32 %v297_v19, 0.0  ;;  %v299_v31 = vadd.f32 %v778_v2, %v276_v20  ;;  %v264_v34 = vld [vmem:[%s773_s28 + $0x70] sm:$0xff]  ;;  %v314_v36 = vmax.f32 %v298_v22, 0.0  ;;  %v265_v48 = vld [vmem:[%s773_s28 + $0x78] sm:$0xff]  ;;  %v329_v5 = vld [vmem:[%s242_s8] sm:$0xff] }
  0x16   : > { %v320_v29 = vmax.f32 %v304_v18, 0.0  ;;  %v321_v35 = vmax.f32 %v305_v21, 0.0  ;;  %v322_v37 = vmax.f32 %v306_v23, 0.0  ;;  %v307_v38 = vadd.f32 %v778_v2, %v284_v24  ;;  %v337_v6 = vld [vmem:[%s242_s8 + $0x40] sm:$0xff]  ;;  %v332_v7 = vld [vmem:[%s242_s8 + $0x18] sm:$0xff]  ;;  %v331_v9 = vld [vmem:[%s242_s8 + $0x10] sm:$0xff] }
  0x17   : > { %679 = vmatprep.mubr.msk.f32.mxu0 %vm345_vm1, %v312_v28  ;;  %v315_v39 = vmax.f32 %v299_v31, 0.0  ;;  %v277_v40 = vmul.f32 %v767_v1, %v254_v25  ;;  %v285_v41 = vmul.f32 %v767_v1, %v262_v26  ;;  %v278_v42 = vmul.f32 %v767_v1, %v255_v27  ;;  %v340_v8 = vld [vmem:[%s242_s8 + $0x58] sm:$0xff]  ;;  %v339_v10 = vld [vmem:[%s242_s8 + $0x50] sm:$0xff]  ;;  %v334_v11 = vld [vmem:[%s242_s8 + $0x28] sm:$0xff] }
  0x18   : > { %691 = vmatprep.mubr.msk.f32.mxu1 %vm345_vm1, %v320_v29  ;;  %680 = vmatmul.mubr.msk.f32.vlgmr.msra.gmra.mrb[0].mxu0 %vm345_vm1, %v313_v30  ;;  %v323_v44 = vmax.f32 %v307_v38, 0.0  ;;  %v286_v45 = vmul.f32 %v767_v1, %v263_v32  ;;  %v279_v46 = vmul.f32 %v767_v1, %v256_v33  ;;  %v287_v47 = vmul.f32 %v767_v1, %v264_v34  ;;  %v342_v12 = vld [vmem:[%s242_s8 + $0x68] sm:$0xff]  ;;  %v333_v13 = vld [vmem:[%s242_s8 + $0x20] sm:$0xff]  ;;  %v336_v15 = vld [vmem:[%s242_s8 + $0x38] sm:$0xff] }
  0x19   : > { %692 = vmatmul.mubr.msk.f32.vlgmr.msra.gmra.mrb[0].mxu1 %vm345_vm1, %v321_v35  ;;  %682 = vmatprep.mubr.msk.f32.mxu0 %vm345_vm1, %v314_v36  ;;  %v300_v49 = vadd.f32 %v778_v2, %v277_v40  ;;  %v308_v50 = vadd.f32 %v778_v2, %v285_v41  ;;  %v301_v51 = vadd.f32 %v778_v2, %v278_v42  ;;  %v341_v14 = vld [vmem:[%s242_s8 + $0x60] sm:$0xff]  ;;  %v344_v18 = vld [vmem:[%s242_s8 + $0x78] sm:$0xff]  ;;  %v335_v19 = vld [vmem:[%s242_s8 + $0x30] sm:$0xff] }
  0x1a   : > { %694 = vmatprep.mubr.msk.f32.mxu1 %vm345_vm1, %v322_v37  ;;  %v309_v52 = vadd.f32 %v778_v2, %v286_v45  ;;  %v302_v53 = vadd.f32 %v778_v2, %v279_v46  ;;  %v310_v54 = vadd.f32 %v778_v2, %v287_v47  ;;  %v280_v55 = vmul.f32 %v767_v1, %v257_v43  ;;  %v343_v20 = vld [vmem:[%s242_s8 + $0x70] sm:$0xff] }
  0x1b   : > { %v316_v56 = vmax.f32 %v300_v49, 0.0  ;;  %v324_v57 = vmax.f32 %v308_v50, 0.0  ;;  %v288_v58 = vmul.f32 %v767_v1, %v265_v48  ;;  %v317_v59 = vmax.f32 %v301_v51, 0.0 }
  0x1c   : > { %683 = vmatmul.mubr.msk.f32.gmra.mrb[2].mxu0 %vm345_vm1, %v315_v39  ;;  %v325_v60 = vmax.f32 %v309_v52, 0.0  ;;  %v303_v61 = vadd.f32 %v778_v2, %v280_v55  ;;  %v318_v62 = vmax.f32 %v302_v53, 0.0  ;;  %v326_v63 = vmax.f32 %v310_v54, 0.0 }
  0x1d   : > { %695 = vmatmul.mubr.msk.f32.gmra.mrb[2].mxu1 %vm345_vm1, %v323_v44  ;;  %685 = vmatprep.mubr.msk.f32.mxu0 %vm345_vm1, %v316_v56  ;;  %v311_v0 = vadd.f32 %v778_v2, %v288_v58  ;;  %v330_v2 = vld [vmem:[%s242_s8 + $0x8] sm:$0xff] }
  0x1e   : > { %697 = vmatprep.mubr.msk.f32.mxu1 %vm345_vm1, %v324_v57  ;;  %v319_v1 = vmax.f32 %v303_v61, 0.0 }
  0x1f   : > { %v327_v3 = vmax.f32 %v311_v0, 0.0 }
  0x20   : > { %686 = vmatmul.mubr.msk.f32.gmra.mrb[4].mxu0 %vm345_vm1, %v317_v59 }
  0x21   : > { %698 = vmatmul.mubr.msk.f32.gmra.mrb[4].mxu1 %vm345_vm1, %v325_v60  ;;  %688 = vmatprep.mubr.msk.f32.mxu0 %vm345_vm1, %v318_v62 }
  0x22   : > { %700 = vmatprep.mubr.msk.f32.mxu1 %vm345_vm1, %v326_v63 }
  0x24   : > { %689 = vmatmul.mubr.msk.f32.gmra.mrb[6].mxu0 %vm345_vm1, %v319_v1 }
  0x25   : > { %701 = vmatmul.mubr.msk.f32.gmra.mrb[6].mxu1 %vm345_vm1, %v327_v3 }
  0xeb   : > { %v681_v16 = vpop.f32.mrb[0].mxu0 }
  0xec   : > { %v693_v17 = vpop.f32.mrb[0].mxu1  ;;  %v470_v21 = vadd.f32 %v681_v16, %v330_v2  ;;  %v464_v23 = vpop.f32.mrb[1].mxu0 }
  0xed   : > { %v510_v22 = vadd.f32 %v693_v17, %v338_v4  ;;  %v504_v24 = vpop.f32.mrb[1].mxu1  ;;  %v465_v25 = vadd.f32 %v464_v23, %v329_v5 }
  0xee   : > { %v505_v26 = vadd.f32 %v504_v24, %v337_v6  ;;  %545 = vst.msk [vmem:[%s852_s11 + $0x8] sm:$0xff] %vm543_vm2, %v470_v21 }
  0xef   : > { %553 = vst.msk [vmem:[%s852_s11 + $0x48] sm:$0xff] %vm543_vm2, %v510_v22  ;;  %v684_v27 = vpop.f32.mrb[2].mxu0  ;;  %544 = vst.msk [vmem:[%s852_s11] sm:$0xff] %vm543_vm2, %v465_v25 }
  0xf0   : > { %v696_v28 = vpop.f32.mrb[2].mxu1  ;;  %552 = vst.msk [vmem:[%s852_s11 + $0x40] sm:$0xff] %vm543_vm2, %v505_v26  ;;  %v480_v29 = vadd.f32 %v684_v27, %v332_v7  ;;  %v474_v31 = vpop.f32.mrb[3].mxu0 }
  0xf1   : > { %v520_v30 = vadd.f32 %v696_v28, %v340_v8  ;;  %v514_v32 = vpop.f32.mrb[3].mxu1  ;;  %v475_v33 = vadd.f32 %v474_v31, %v331_v9 }
  0xf2   : > { %v515_v34 = vadd.f32 %v514_v32, %v339_v10  ;;  %547 = vst.msk [vmem:[%s852_s11 + $0x18] sm:$0xff] %vm543_vm2, %v480_v29 }
  0xf3   : > { %555 = vst.msk [vmem:[%s852_s11 + $0x58] sm:$0xff] %vm543_vm2, %v520_v30  ;;  %v687_v35 = vpop.f32.mrb[4].mxu0  ;;  %546 = vst.msk [vmem:[%s852_s11 + $0x10] sm:$0xff] %vm543_vm2, %v475_v33 }
  0xf4   : > { %v699_v36 = vpop.f32.mrb[4].mxu1  ;;  %554 = vst.msk [vmem:[%s852_s11 + $0x50] sm:$0xff] %vm543_vm2, %v515_v34  ;;  %v490_v37 = vadd.f32 %v687_v35, %v334_v11  ;;  %v484_v39 = vpop.f32.mrb[5].mxu0 }
  0xf5   : > { %v530_v38 = vadd.f32 %v699_v36, %v342_v12  ;;  %v524_v40 = vpop.f32.mrb[5].mxu1  ;;  %v485_v41 = vadd.f32 %v484_v39, %v333_v13 }
  0xf6   : > { %v525_v42 = vadd.f32 %v524_v40, %v341_v14  ;;  %549 = vst.msk [vmem:[%s852_s11 + $0x28] sm:$0xff] %vm543_vm2, %v490_v37 }
  0xf7   : > { %557 = vst.msk [vmem:[%s852_s11 + $0x68] sm:$0xff] %vm543_vm2, %v530_v38  ;;  %v690_v43 = vpop.f32.mrb[6].mxu0  ;;  %548 = vst.msk [vmem:[%s852_s11 + $0x20] sm:$0xff] %vm543_vm2, %v485_v41 }
  0xf8   : > { %v702_v44 = vpop.f32.mrb[6].mxu1  ;;  %556 = vst.msk [vmem:[%s852_s11 + $0x60] sm:$0xff] %vm543_vm2, %v525_v42  ;;  %v500_v45 = vadd.f32 %v690_v43, %v336_v15  ;;  %v494_v47 = vpop.f32.mrb[7].mxu0 }
  0xf9   : > { %v540_v46 = vadd.f32 %v702_v44, %v344_v18  ;;  %v534_v48 = vpop.f32.mrb[7].mxu1  ;;  %v495_v49 = vadd.f32 %v494_v47, %v335_v19 }
  0xfa   : > { %v535_v50 = vadd.f32 %v534_v48, %v343_v20  ;;  %551 = vst.msk [vmem:[%s852_s11 + $0x38] sm:$0xff] %vm543_vm2, %v500_v45 }
  0xfb   : > { %559 = vst.msk [vmem:[%s852_s11 + $0x78] sm:$0xff] %vm543_vm2, %v540_v46  ;;  %550 = vst.msk [vmem:[%s852_s11 + $0x30] sm:$0xff] %vm543_vm2, %v495_v49 }
  0xfc   : > { %558 = vst.msk [vmem:[%s852_s11 + $0x70] sm:$0xff] %vm543_vm2, %v535_v50 }
  0xfd PF: > { %s15_s18 = sadd.s32 1, %s719_s18  }
  0xfe   : > { %p12_p4 = scmp.ge.s32.totalorder %s15_s18, 6  }
 0x100   :  { %14 = sbr.rel (!%p12_p4) target bundleno = 1 (0x1), region = 73 }

// kernel: bottleneck_curve_forward.4
= control target key start
LH: loop header
LB: loop body
LE: loop exit
PB: predicated region body
PF: predicated region fallthrough
CT: control target
= control target key end

     0   :  { %s5625_s21 = smov 0   ;;  %s6826_s0 = inlined_call_operand.vmem [shape: f32[2,16,16,4], index: 0, kind: input, shape index: {}]   ;;  %s6827_s1 = inlined_call_operand.vmem [shape: f32[1,4], index: 1, kind: input, shape index: {}]   ;;  %s6828_s2 = inlined_call_operand.vmem [shape: f32[1,4], index: 2, kind: input, shape index: {}]   ;;  %s6829_s3 = inlined_call_operand.vmem [shape: f32[9,4,4], index: 3, kind: input, shape index: {}]   ;;  %s6830_s4 = inlined_call_operand.vmem [shape: f32[2,16,16,4], index: 4, kind: output, shape index: {0}]   ;;  %s6831_s5 = inlined_call_operand.vmem [shape: f32[2,1,4], index: 5, kind: output, shape index: {1}]   ;;  %s6832_s6 = inlined_call_operand.vmem [shape: f32[2,1,4], index: 6, kind: output, shape index: {2}]  }
   0x1 LB: > { %s4246_s22 = sadd.s32 4294967295, %s5587_s21   ;;  %p4250_p0 = scmp.ge.s32.totalorder %s5587_s21, 1  ;;  %s5587_s21 = sphi %s5625_s21, %s17_s21  }
   0x2   : > { %p217_p1 = scmp.lt.s32.totalorder %s5587_s21, 3 }
   0x4   : > { %p218_p2 = pnand %p4250_p0, %p217_p1 }
   0x6   : > { %221 = sbr.rel (%p218_p2) target bundleno = 563 (0x233), region = 36 }
   0xd   : > { %v4257_v0 = vld [vmem:[%s6829_s3 + $0x4] sm:$0xf]  ;;  %vm653_vm0 = vcmask 1043456   ;;  %vm411_vm1 = vcmask 31744   ;;  %vm414_vm2 = vcmask 25600   ;;  %v5589_v1 = vmov 0.0  }
   0xe   : > { %4863 = vmatprep.subr.msk.mxu1 %vm653_vm0, %v4257_v0  ;;  %412 = vst.msk [vmem:[#allocation2] sm:$0xff] %vm411_vm1, %v5589_v1  ;;  %413 = vst.msk [vmem:[#allocation2 + $0x8] sm:$0xff] %vm411_vm1, %v5589_v1  ;;  %vm420_vm3 = vcmask 24576   ;;  %v5644_v2 = vld [vmem:[%s6829_s3 + $0x10] sm:$0xf]  ;;  %p5648_p3 = scmp.lt.s32.totalorder %s4246_s22, 1 }
   0xf   : > { %417 = vst.msk [vmem:[#allocation2 + $0x198] sm:$0xff] %vm411_vm1, %v5589_v1  ;;  %418 = vst.msk [vmem:[#allocation2 + $0x1a0] sm:$0xff] %vm411_vm1, %v5589_v1  ;;  %4864 = vmatpush3.msk.msra.mxu1 %vm653_vm0, %v4257_v0  ;;  %5063 = vmatprep.subr.msk.mxu0 %vm653_vm0, %v5644_v2  ;;  %v522_v3 = vld [vmem:[%s6829_s3] sm:$0xf]  ;;  %v5697_v4 = vld [vmem:[%s6829_s3 + $0x14] sm:$0xf] }
  0x10   : > { %415 = vst.msk [vmem:[#allocation2 + $0x10] sm:$0x3] %vm414_vm2, %v5589_v1  ;;  %419 = vst.msk [vmem:[#allocation2 + $0x1a8] sm:$0x3] %vm414_vm2, %v5589_v1  ;;  %5064 = vmatpush3.msk.msra.mxu0 %vm653_vm0, %v5644_v2  ;;  %s6939_s22 = smov (!%p5648_p3, %s4246_s22), 1  ;;  %4913 = vmatprep.subr.msk.mxu1 %vm653_vm0, %v522_v3 }
  0x11   : > { %439 = vst.msk [vmem:[#allocation2 + $0x11] sm:$0x1] %vm420_vm3, %v5589_v1  ;;  %421 = vst.msk [vmem:[#allocation2] sm:$0x1] %vm420_vm3, %v5589_v1  ;;  %5113 = vmatprep.subr.msk.mxu0 %vm653_vm0, %v5697_v4  ;;  %s4564_s8 = sshll.u32 %s6939_s22, 8  ;;  %s265_s11 = scalar_lea.vmem %s6831_s5, %s6939_s22 }
  0x12   : > { %422 = vst.msk [vmem:[#allocation2 + $0x18] sm:$0x1] %vm420_vm3, %v5589_v1  ;;  %423 = vst.msk [vmem:[#allocation2 + $0x30] sm:$0x1] %vm420_vm3, %v5589_v1  ;;  %v5714_v5 = vld [vmem:[%s6827_s1] ss:$0 sm:$0xff]  ;;  %s5721_s13 = scalar_lea.vmem %s6826_s0, %s4564_s8  ;;  %s6675_s9 = scalar_lea.vmem %s6830_s4, %s4564_s8 }
  0x13   : > { %424 = vst.msk [vmem:[#allocation2 + $0x48] sm:$0x1] %vm420_vm3, %v5589_v1  ;;  %425 = vst.msk [vmem:[#allocation2 + $0x60] sm:$0x1] %vm420_vm3, %v5589_v1  ;;  %v5726_v6 = vld [vmem:[%s6828_s2] ss:$0 sm:$0xff]  ;;  %s268_s14 = scalar_lea.vmem %s6832_s6, %s6939_s22 }
  0x14   : > { %426 = vst.msk [vmem:[#allocation2 + $0x78] sm:$0x1] %vm420_vm3, %v5589_v1  ;;  %427 = vst.msk [vmem:[#allocation2 + $0x90] sm:$0x1] %vm420_vm3, %v5589_v1  ;;  %v269_v7 = vld [vmem:[%s5721_s13] sm:$0xff]  ;;  %v270_v8 = vld [vmem:[%s5721_s13 + $0x8] sm:$0xff] }
  0x15   : > { %428 = vst.msk [vmem:[#allocation2 + $0xa8] sm:$0x1] %vm420_vm3, %v5589_v1  ;;  %429 = vst.msk [vmem:[#allocation2 + $0xc0] sm:$0x1] %vm420_vm3, %v5589_v1  ;;  %v271_v9 = vld [vmem:[%s5721_s13 + $0x10] sm:$0xff]  ;;  %v523_v11 = vld [vmem:[#allocation2 + $0x1] sm:$0xff]  ;;  %v308_v13 = vmul.f32 %v5714_v5, %v269_v7  ;;  %v309_v14 = vmul.f32 %v5714_v5, %v270_v8 }
  0x16   : > { %430 = vst.msk [vmem:[#allocation2 + $0xd8] sm:$0x1] %vm420_vm3, %v5589_v1  ;;  %431 = vst.msk [vmem:[#allocation2 + $0xf0] sm:$0x1] %vm420_vm3, %v5589_v1  ;;  %v5734_v10 = vld [vmem:[%s6829_s3 + $0x8] sm:$0xf]  ;;  %v310_v15 = vmul.f32 %v5714_v5, %v271_v9  ;;  %4865 = vmatprep.mubr.msk.f32.mxu1 %vm411_vm1, %v523_v11 }
  0x17   : > { %432 = vst.msk [vmem:[#allocation2 + $0x108] sm:$0x1] %vm420_vm3, %v5589_v1  ;;  %433 = vst.msk [vmem:[#allocation2 + $0x120] sm:$0x1] %vm420_vm3, %v5589_v1  ;;  %v524_v12 = vld [vmem:[#allocation2 + $0x9] sm:$0xff]  ;;  %v272_v16 = vld [vmem:[%s5721_s13 + $0x18] sm:$0xff]  ;;  %v347_v21 = vadd.f32 %v5726_v6, %v308_v13  ;;  %v348_v22 = vadd.f32 %v5726_v6, %v309_v14 }
  0x18   : > { %434 = vst.msk [vmem:[#allocation2 + $0x138] sm:$0x1] %vm420_vm3, %v5589_v1  ;;  %435 = vst.msk [vmem:[#allocation2 + $0x150] sm:$0x1] %vm420_vm3, %v5589_v1  ;;  %v311_v17 = vmul.f32 %v5714_v5, %v272_v16  ;;  %v273_v18 = vld [vmem:[%s5721_s13 + $0x20] sm:$0xff]  ;;  %v274_v19 = vld [vmem:[%s5721_s13 + $0x28] sm:$0xff]  ;;  %4866 = vmatmul.mubr.msk.f32.vlgmr.msra.gmra.mrb[0].mxu1 %vm411_vm1, %v524_v12  ;;  %v349_v23 = vadd.f32 %v5726_v6, %v310_v15 }
  0x19   : > { %436 = vst.msk [vmem:[#allocation2 + $0x168] sm:$0x1] %vm420_vm3, %v5589_v1  ;;  %437 = vst.msk [vmem:[#allocation2 + $0x180] sm:$0x1] %vm420_vm3, %v5589_v1  ;;  %v275_v20 = vld [vmem:[%s5721_s13 + $0x30] sm:$0xff]  ;;  %v312_v24 = vmul.f32 %v5714_v5, %v273_v18  ;;  %v276_v25 = vld [vmem:[%s5721_s13 + $0x38] sm:$0xff]  ;;  %4914 = vmatpush3.msk.msra.mxu1 %vm653_vm0, %v522_v3  ;;  %v313_v27 = vmul.f32 %v5714_v5, %v274_v19 }
  0x1a   : > { %438 = vst.msk [vmem:[#allocation2 + $0x198] sm:$0x1] %vm420_vm3, %v5589_v1  ;;  %440 = vst.msk [vmem:[#allocation2 + $0x29] sm:$0x1] %vm420_vm3, %v5589_v1  ;;  %v350_v26 = vadd.f32 %v5726_v6, %v311_v17  ;;  %v314_v28 = vmul.f32 %v5714_v5, %v275_v20  ;;  %v315_v29 = vmul.f32 %v5714_v5, %v276_v25  ;;  %v277_v30 = vld [vmem:[%s5721_s13 + $0x40] sm:$0xff]  ;;  %v278_v31 = vld [vmem:[%s5721_s13 + $0x48] sm:$0xff]  ;;  %4963 = vmatprep.subr.msk.mxu1 %vm653_vm0, %v5734_v10 }
  0x1b   : > { %441 = vst.msk [vmem:[#allocation2 + $0x41] sm:$0x1] %vm420_vm3, %v5589_v1  ;;  %442 = vst.msk [vmem:[#allocation2 + $0x59] sm:$0x1] %vm420_vm3, %v5589_v1  ;;  %v279_v32 = vld [vmem:[%s5721_s13 + $0x50] sm:$0xff]  ;;  %v379_v33 = vmax.f32 %v347_v21, 0.0  ;;  %v351_v36 = vadd.f32 %v5726_v6, %v312_v24  ;;  %v352_v39 = vadd.f32 %v5726_v6, %v313_v27  ;;  %v316_v44 = vmul.f32 %v5714_v5, %v277_v30 }
  0x1c   : > { %443 = vst.msk [vmem:[#allocation2 + $0x71] sm:$0x1] %vm420_vm3, %v5589_v1  ;;  %444 = vst.msk [vmem:[#allocation2 + $0x89] sm:$0x1] %vm420_vm3, %v5589_v1  ;;  %v380_v34 = vmax.f32 %v348_v22, 0.0  ;;  %v381_v35 = vmax.f32 %v349_v23, 0.0  ;;  %v353_v40 = vadd.f32 %v5726_v6, %v314_v28  ;;  %v354_v41 = vadd.f32 %v5726_v6, %v315_v29 }
  0x1d   : > { %445 = vst.msk [vmem:[#allocation2 + $0xa1] sm:$0x1] %vm420_vm3, %v5589_v1  ;;  %446 = vst.msk [vmem:[#allocation2 + $0xb9] sm:$0x1] %vm420_vm3, %v5589_v1  ;;  %v280_v37 = vld [vmem:[%s5721_s13 + $0x58] sm:$0xff]  ;;  %v382_v38 = vmax.f32 %v350_v26, 0.0  ;;  %v317_v45 = vmul.f32 %v5714_v5, %v278_v31  ;;  %v318_v46 = vmul.f32 %v5714_v5, %v279_v32  ;;  %v355_v54 = vadd.f32 %v5726_v6, %v316_v44 }
  0x1e   : > { %447 = vst.msk [vmem:[#allocation2 + $0xd1] sm:$0x1] %vm420_vm3, %v5589_v1  ;;  %448 = vst.msk [vmem:[#allocation2 + $0xe9] sm:$0x1] %vm420_vm3, %v5589_v1  ;;  %v281_v42 = vld [vmem:[%s5721_s13 + $0x60] sm:$0xff]  ;;  %v383_v43 = vmax.f32 %v351_v36, 0.0  ;;  %v319_v53 = vmul.f32 %v5714_v5, %v280_v37 }
  0x1f   : > { %449 = vst.msk [vmem:[#allocation2 + $0x101] sm:$0x1] %vm420_vm3, %v5589_v1  ;;  %450 = vst.msk [vmem:[#allocation2 + $0x119] sm:$0x1] %vm420_vm3, %v5589_v1  ;;  %v282_v47 = vld [vmem:[%s5721_s13 + $0x68] sm:$0xff]  ;;  %v283_v48 = vld [vmem:[%s5721_s13 + $0x70] sm:$0xff]  ;;  %v356_v55 = vadd.f32 %v5726_v6, %v317_v45  ;;  %v357_v56 = vadd.f32 %v5726_v6, %v318_v46  ;;  %v320_v57 = vmul.f32 %v5714_v5, %v281_v42 }
  0x20   : > { %451 = vst.msk [vmem:[#allocation2 + $0x131] sm:$0x1] %vm420_vm3, %v5589_v1  ;;  %452 = vst.msk [vmem:[#allocation2 + $0x149] sm:$0x1] %vm420_vm3, %v5589_v1  ;;  %v284_v49 = vld [vmem:[%s5721_s13 + $0x78] sm:$0xff]  ;;  %v384_v50 = vmax.f32 %v352_v39, 0.0  ;;  %v358_v58 = vadd.f32 %v5726_v6, %v319_v53  ;;  %v321_v59 = vmul.f32 %v5714_v5, %v282_v47  ;;  %v322_v60 = vmul.f32 %v5714_v5, %v283_v48 }
  0x21   : > { %453 = vst.msk [vmem:[#allocation2 + $0x161] sm:$0x1] %vm420_vm3, %v5589_v1  ;;  %454 = vst.msk [vmem:[#allocation2 + $0x179] sm:$0x1] %vm420_vm3, %v5589_v1  ;;  %v385_v51 = vmax.f32 %v353_v40, 0.0  ;;  %v386_v52 = vmax.f32 %v354_v41, 0.0  ;;  %v323_v61 = vmul.f32 %v5714_v5, %v284_v49  ;;  %v359_v8 = vadd.f32 %v5726_v6, %v320_v57 }
  0x22   : > { %455 = vst.msk [vmem:[#allocation2 + $0x191] sm:$0x1] %vm420_vm3, %v5589_v1  ;;  %456 = vst.msk [vmem:[#allocation2 + $0x1a9] sm:$0x1] %vm420_vm3, %v5589_v1  ;;  %v285_v62 = vld [vmem:[%s5721_s13 + $0x80] sm:$0xff]  ;;  %v286_v63 = vld [vmem:[%s5721_s13 + $0x88] sm:$0xff]  ;;  %v360_v12 = vadd.f32 %v5726_v6, %v321_v59  ;;  %v361_v13 = vadd.f32 %v5726_v6, %v322_v60 }
  0x23   : > { %458 = vst.msk [vmem:[#allocation2 + $0x19] sm:$0xff] %vm411_vm1, %v379_v33  ;;  %459 = vst.msk [vmem:[#allocation2 + $0x21] sm:$0xff] %vm411_vm1, %v380_v34  ;;  %v287_v0 = vld [vmem:[%s5721_s13 + $0x90] sm:$0xff]  ;;  %v387_v1 = vmax.f32 %v355_v54, 0.0  ;;  %v388_v3 = vmax.f32 %v356_v55, 0.0  ;;  %v389_v7 = vmax.f32 %v357_v56, 0.0  ;;  %v362_v14 = vadd.f32 %v5726_v6, %v323_v61 }
  0x24   : > { %460 = vst.msk [vmem:[#allocation2 + $0x31] sm:$0xff] %vm411_vm1, %v381_v35  ;;  %461 = vst.msk [vmem:[#allocation2 + $0x39] sm:$0xff] %vm411_vm1, %v382_v38  ;;  %v288_v9 = vld [vmem:[%s5721_s13 + $0x98] sm:$0xff]  ;;  %v390_v11 = vmax.f32 %v358_v58, 0.0  ;;  %v391_v15 = vmax.f32 %v359_v8, 0.0  ;;  %v324_v16 = vmul.f32 %v5714_v5, %v285_v62  ;;  %v325_v17 = vmul.f32 %v5714_v5, %v286_v63  ;;  %v289_v19 = vld [vmem:[%s5721_s13 + $0xa0] sm:$0xff] }
  0x25   : > { %462 = vst.msk [vmem:[#allocation2 + $0x49] sm:$0xff] %vm411_vm1, %v383_v43  ;;  %463 = vst.msk [vmem:[#allocation2 + $0x51] sm:$0xff] %vm411_vm1, %v384_v50  ;;  %v326_v18 = vmul.f32 %v5714_v5, %v287_v0  ;;  %v290_v20 = vld [vmem:[%s5721_s13 + $0xa8] sm:$0xff]  ;;  %v291_v21 = vld [vmem:[%s5721_s13 + $0xb0] sm:$0xff]  ;;  %v392_v25 = vmax.f32 %v360_v12, 0.0  ;;  %v393_v26 = vmax.f32 %v361_v13, 0.0  ;;  %v327_v28 = vmul.f32 %v5714_v5, %v288_v9 }
  0x26   : > { %464 = vst.msk [vmem:[#allocation2 + $0x61] sm:$0xff] %vm411_vm1, %v385_v51  ;;  %465 = vst.msk [vmem:[#allocation2 + $0x69] sm:$0xff] %vm411_vm1, %v386_v52  ;;  %v394_v27 = vmax.f32 %v362_v14, 0.0  ;;  %v363_v29 = vadd.f32 %v5726_v6, %v324_v16  ;;  %v5818_v30 = vld [vmem:[%s6829_s3 + $0x18] sm:$0xf]  ;;  %v364_v31 = vadd.f32 %v5726_v6, %v325_v17  ;;  %v328_v35 = vmul.f32 %v5714_v5, %v289_v19  ;;  %v293_v37 = vld [vmem:[%s5721_s13 + $0xc0] sm:$0xff] }
  0x27   : > { %466 = vst.msk [vmem:[#allocation2 + $0x79] sm:$0xff] %vm411_vm1, %v387_v1  ;;  %467 = vst.msk [vmem:[#allocation2 + $0x81] sm:$0xff] %vm411_vm1, %v388_v3  ;;  %v365_v32 = vadd.f32 %v5726_v6, %v326_v18  ;;  %v292_v33 = vld [vmem:[%s5721_s13 + $0xb8] sm:$0xff]  ;;  %v366_v34 = vadd.f32 %v5726_v6, %v327_v28  ;;  %v329_v36 = vmul.f32 %v5714_v5, %v290_v20  ;;  %v294_v38 = vld [vmem:[%s5721_s13 + $0xc8] sm:$0xff] }
  0x28   : > { %468 = vst.msk [vmem:[#allocation2 + $0x91] sm:$0xff] %vm411_vm1, %v389_v7  ;;  %469 = vst.msk [vmem:[#allocation2 + $0x99] sm:$0xff] %vm411_vm1, %v390_v11  ;;  %v295_v39 = vld [vmem:[%s5721_s13 + $0xd0] sm:$0xff]  ;;  %v395_v41 = vmax.f32 %v363_v29, 0.0  ;;  %v396_v42 = vmax.f32 %v364_v31, 0.0  ;;  %v330_v44 = vmul.f32 %v5714_v5, %v291_v21  ;;  %v296_v45 = vld [vmem:[%s5721_s13 + $0xd8] sm:$0xff]  ;;  %v367_v47 = vadd.f32 %v5726_v6, %v328_v35 }
  0x29   : > { %470 = vst.msk [vmem:[#allocation2 + $0xa9] sm:$0xff] %vm411_vm1, %v391_v15  ;;  %471 = vst.msk [vmem:[#allocation2 + $0xb1] sm:$0xff] %vm411_vm1, %v392_v25  ;;  %v397_v43 = vmax.f32 %v365_v32, 0.0  ;;  %v368_v48 = vadd.f32 %v5726_v6, %v329_v36  ;;  %v331_v49 = vmul.f32 %v5714_v5, %v292_v33  ;;  %v332_v51 = vmul.f32 %v5714_v5, %v293_v37  ;;  %v297_v54 = vld [vmem:[%s5721_s13 + $0xe0] sm:$0xff]  ;;  %v298_v55 = vld [vmem:[%s5721_s13 + $0xe8] sm:$0xff] }
  0x2a   : > { %v525_v22 = vld [vmem:[#allocation2 + $0x19] sm:$0xff]  ;;  %v526_v23 = vld [vmem:[#allocation2 + $0x21] sm:$0xff]  ;;  %472 = vst.msk [vmem:[#allocation2 + $0xc1] sm:$0xff] %vm411_vm1, %v393_v26  ;;  %473 = vst.msk [vmem:[#allocation2 + $0xc9] sm:$0xff] %vm411_vm1, %v394_v27  ;;  %v369_v50 = vadd.f32 %v5726_v6, %v330_v44  ;;  %v333_v52 = vmul.f32 %v5714_v5, %v294_v38  ;;  %v334_v53 = vmul.f32 %v5714_v5, %v295_v39  ;;  %v399_v56 = vmax.f32 %v367_v47, 0.0 }
  0x2b   : > { %v5807_v24 = vld [vmem:[#allocation2 + $0x31] sm:$0xff]  ;;  %4868 = vmatprep.mubr.msk.f32.mxu1 %vm411_vm1, %v525_v22  ;;  %5065 = vmatprep.mubr.msk.f32.mxu0 %vm411_vm1, %v525_v22  ;;  %v5838_v40 = vld [vmem:[#allocation2 + $0x39] sm:$0xff]  ;;  %474 = vst.msk [vmem:[#allocation2 + $0xd9] sm:$0xff] %vm411_vm1, %v395_v41  ;;  %475 = vst.msk [vmem:[#allocation2 + $0xe1] sm:$0xff] %vm411_vm1, %v396_v42  ;;  %v400_v57 = vmax.f32 %v368_v48, 0.0  ;;  %v370_v58 = vadd.f32 %v5726_v6, %v331_v49  ;;  %v335_v59 = vmul.f32 %v5714_v5, %v296_v45 }
  0x2c   : > { %4869 = vmatmul.mubr.msk.f32.gmra.mrb[2].mxu1 %vm411_vm1, %v526_v23  ;;  %5066 = vmatmul.mubr.msk.f32.vlgmr.msra.gmra.mrb[0].mxu0 %vm411_vm1, %v526_v23  ;;  %v5844_v46 = vld [vmem:[#allocation2 + $0x49] sm:$0xff]  ;;  %476 = vst.msk [vmem:[#allocation2 + $0xf1] sm:$0xff] %vm411_vm1, %v397_v43  ;;  %v5872_v61 = vld [vmem:[#allocation2 + $0x51] sm:$0xff]  ;;  %v401_v62 = vmax.f32 %v369_v50, 0.0  ;;  %v371_v63 = vadd.f32 %v5726_v6, %v332_v51  ;;  %v372_v0 = vadd.f32 %v5726_v6, %v333_v52  ;;  %478 = vst.msk [vmem:[#allocation2 + $0x109] sm:$0xff] %vm411_vm1, %v399_v56 }
  0x2d   : > { %5114 = vmatpush3.msk.msra.mxu0 %vm653_vm0, %v5697_v4  ;;  %4871 = vmatprep.mubr.msk.f32.mxu1 %vm411_vm1, %v5807_v24  ;;  %v398_v4 = vmax.f32 %v366_v34, 0.0  ;;  %v299_v60 = vld [vmem:[%s5721_s13 + $0xf0] sm:$0xff]  ;;  %v373_v1 = vadd.f32 %v5726_v6, %v334_v53  ;;  %v300_v3 = vld [vmem:[%s5721_s13 + $0xf8] sm:$0xff]  ;;  %v5878_v7 = vld [vmem:[#allocation2 + $0x61] sm:$0xff]  ;;  %479 = vst.msk [vmem:[#allocation2 + $0x111] sm:$0xff] %vm411_vm1, %v400_v57  ;;  %v402_v8 = vmax.f32 %v370_v58, 0.0  ;;  %v374_v9 = vadd.f32 %v5726_v6, %v335_v59 }
  0x2e   : > { %5068 = vmatprep.mubr.msk.f32.mxu0 %vm411_vm1, %v5807_v24  ;;  %5163 = vmatprep.subr.msk.mxu0 %vm653_vm0, %v5818_v30  ;;  %v336_v11 = vmul.f32 %v5714_v5, %v297_v54  ;;  %v337_v12 = vmul.f32 %v5714_v5, %v298_v55  ;;  %480 = vst.msk [vmem:[#allocation2 + $0x121] sm:$0xff] %vm411_vm1, %v401_v62  ;;  %v403_v13 = vmax.f32 %v371_v63, 0.0  ;;  %v404_v14 = vmax.f32 %v372_v0, 0.0  ;;  %v5899_v21 = vld [vmem:[#allocation2 + $0x69] sm:$0xff]  ;;  %v5905_v23 = vld [vmem:[#allocation2 + $0x79] sm:$0xff]  ;;  %v5919_v29 = vld [vmem:[#allocation2 + $0x81] sm:$0xff] }
  0x2f   : > { %477 = vst.msk [vmem:[#allocation2 + $0xf9] sm:$0xff] %vm411_vm1, %v398_v4  ;;  %v405_v15 = vmax.f32 %v373_v1, 0.0  ;;  %v338_v16 = vmul.f32 %v5714_v5, %v299_v60  ;;  %481 = vst.msk [vmem:[#allocation2 + $0x129] sm:$0xff] %vm411_vm1, %v402_v8  ;;  %v406_v17 = vmax.f32 %v374_v9, 0.0  ;;  %v339_v20 = vmul.f32 %v5714_v5, %v300_v3  ;;  %v5933_v31 = vld [vmem:[#allocation2 + $0x99] sm:$0xff]  ;;  %v5973_v39 = vld [vmem:[#allocation2 + $0x22] sm:$0xff] }
  0x30   : > { %4872 = vmatmul.mubr.msk.f32.gmra.mrb[4].mxu1 %vm411_vm1, %v5838_v40  ;;  %5069 = vmatmul.mubr.msk.f32.gmra.mrb[2].mxu0 %vm411_vm1, %v5838_v40  ;;  %v375_v18 = vadd.f32 %v5726_v6, %v336_v11  ;;  %v376_v19 = vadd.f32 %v5726_v6, %v337_v12  ;;  %482 = vst.msk [vmem:[#allocation2 + $0x139] sm:$0xff] %vm411_vm1, %v403_v13  ;;  %483 = vst.msk [vmem:[#allocation2 + $0x141] sm:$0xff] %vm411_vm1, %v404_v14  ;;  %v5935_v32 = vld [vmem:[#allocation2 + $0xa9] sm:$0xff]  ;;  %v5945_v33 = vld [vmem:[#allocation2 + $0xb1] sm:$0xff] }
  0x31   : > { %4874 = vmatprep.mubr.msk.f32.mxu1 %vm411_vm1, %v5844_v46  ;;  %5071 = vmatprep.mubr.msk.f32.mxu0 %vm411_vm1, %v5844_v46  ;;  %484 = vst.msk [vmem:[#allocation2 + $0x151] sm:$0xff] %vm411_vm1, %v405_v15  ;;  %v377_v22 = vadd.f32 %v5726_v6, %v338_v16  ;;  %485 = vst.msk [vmem:[#allocation2 + $0x159] sm:$0xff] %vm411_vm1, %v406_v17  ;;  %v378_v26 = vadd.f32 %v5726_v6, %v339_v20  ;;  %v5922_v6 = vld [vmem:[#allocation2 + $0x91] sm:$0xff]  ;;  %v5947_v34 = vld [vmem:[#allocation2 + $0xc1] sm:$0xff] }
  0x32   : > { %v407_v5 = vmax.f32 %v375_v18, 0.0  ;;  %v408_v25 = vmax.f32 %v376_v19, 0.0  ;;  %v5957_v35 = vld [vmem:[#allocation2 + $0xc9] sm:$0xff]  ;;  %v5959_v36 = vld [vmem:[#allocation2 + $0xd9] sm:$0xff]  ;;  %v5971_v38 = vld [vmem:[#allocation2 + $0xe1] sm:$0xff] }
  0x33   : > { %v409_v27 = vmax.f32 %v377_v22, 0.0  ;;  %v410_v28 = vmax.f32 %v378_v26, 0.0  ;;  %6876 = vst [vmem:[#allocation3_spill] sm:$0xff] %v5957_v35  ;;  %6877 = vst [vmem:[#allocation4_spill] sm:$0xff] %v5959_v36  ;;  %v5961_v37 = vld [vmem:[#allocation2 + $0x1a] sm:$0xff]  ;;  %v5975_v41 = vld [vmem:[#allocation2 + $0xf1] sm:$0xff] }
  0x34   : > { %4875 = vmatmul.mubr.msk.f32.gmra.mrb[6].mxu1 %vm411_vm1, %v5872_v61  ;;  %5072 = vmatmul.mubr.msk.f32.gmra.mrb[4].mxu0 %vm411_vm1, %v5872_v61  ;;  %486 = vst.msk [vmem:[#allocation2 + $0x169] sm:$0xff] %vm411_vm1, %v407_v5  ;;  %487 = vst.msk [vmem:[#allocation2 + $0x171] sm:$0xff] %vm411_vm1, %v408_v25  ;;  %v5977_v42 = vld [vmem:[#allocation2 + $0x32] sm:$0xff]  ;;  %v5982_v43 = vld [vmem:[%s6829_s3 + $0x1c] sm:$0xf] }
  0x35   : > { %4877 = vmatprep.mubr.msk.f32.mxu1 %vm411_vm1, %v5878_v7  ;;  %5074 = vmatprep.mubr.msk.f32.mxu0 %vm411_vm1, %v5878_v7  ;;  %488 = vst.msk [vmem:[#allocation2 + $0x181] sm:$0xff] %vm411_vm1, %v409_v27  ;;  %489 = vst.msk [vmem:[#allocation2 + $0x189] sm:$0xff] %vm411_vm1, %v410_v28  ;;  %v5994_v45 = vld [vmem:[#allocation2 + $0x3a] sm:$0xff]  ;;  %v5998_v4 = vld [vmem:[#allocation2 + $0x109] sm:$0xff] }
  0x36   : > { %6878 = vst [vmem:[#allocation5_spill] sm:$0xff] %v5971_v38  ;;  %6879 = vst [vmem:[#allocation6_spill] sm:$0xff] %v5975_v41  ;;  %v5992_v44 = vld [vmem:[#allocation2 + $0xf9] sm:$0xff]  ;;  %v6000_v47 = vld [vmem:[#allocation2 + $0x4a] sm:$0xff] }
  0x37   : > { %6880 = vst [vmem:[#allocation7_spill] sm:$0xff] %v5992_v44  ;;  %6881 = vst [vmem:[#allocation8_spill] sm:$0xff] %v5998_v4  ;;  %v6014_v48 = vld [vmem:[#allocation2 + $0x52] sm:$0xff]  ;;  %v6016_v49 = vld [vmem:[#allocation2 + $0x121] sm:$0xff] }
  0x38   : > { %4878 = vmatmul.mubr.msk.f32.gmra.mrb[8].mxu1 %vm411_vm1, %v5899_v21  ;;  %5075 = vmatmul.mubr.msk.f32.gmra.mrb[6].mxu0 %vm411_vm1, %v5899_v21  ;;  %6883 = vst [vmem:[#allocation10_spill] sm:$0xff] %v6016_v49  ;;  %v6018_v50 = vld [vmem:[#allocation2 + $0x62] sm:$0xff]  ;;  %v6030_v52 = vld [vmem:[#allocation2 + $0x6a] sm:$0xff]  ;;  %v6032_v53 = vld [vmem:[#allocation2 + $0x139] sm:$0xff] }
  0x39   : > { %4880 = vmatprep.mubr.msk.f32.mxu1 %vm411_vm1, %v5905_v23  ;;  %5077 = vmatprep.mubr.msk.f32.mxu0 %vm411_vm1, %v5905_v23  ;;  %v6028_v51 = vld [vmem:[#allocation2 + $0x129] sm:$0xff]  ;;  %6885 = vst [vmem:[#allocation12_spill] sm:$0xff] %v6032_v53  ;;  %v6034_v54 = vld [vmem:[#allocation2 + $0x7a] sm:$0xff]  ;;  %v6048_v57 = vld [vmem:[#allocation2 + $0x151] sm:$0xff] }
  0x3a   : > { %6884 = vst [vmem:[#allocation11_spill] sm:$0xff] %v6028_v51  ;;  %v6044_v55 = vld [vmem:[#allocation2 + $0x141] sm:$0xff]  ;;  %6887 = vst [vmem:[#allocation14_spill] sm:$0xff] %v6048_v57  ;;  %v6050_v58 = vld [vmem:[#allocation2 + $0x92] sm:$0xff] }
  0x3b   : > { %6886 = vst [vmem:[#allocation13_spill] sm:$0xff] %v6044_v55  ;;  %v6046_v56 = vld [vmem:[#allocation2 + $0x82] sm:$0xff]  ;;  %v6060_v59 = vld [vmem:[#allocation2 + $0x159] sm:$0xff]  ;;  %v6066_v63 = vld [vmem:[#allocation2 + $0xaa] sm:$0xff] }
  0x3c   : > { %4881 = vmatmul.mubr.msk.f32.gmra.mrb[10].mxu1 %vm411_vm1, %v5919_v29  ;;  %5078 = vmatmul.mubr.msk.f32.gmra.mrb[8].mxu0 %vm411_vm1, %v5919_v29  ;;  %6888 = vst [vmem:[#allocation15_spill] sm:$0xff] %v6060_v59  ;;  %v6062_v60 = vld [vmem:[#allocation2 + $0x9a] sm:$0xff]  ;;  %v6064_v62 = vld [vmem:[#allocation2 + $0x169] sm:$0xff]  ;;  %v6076_v0 = vld [vmem:[#allocation2 + $0x171] sm:$0xff] }
  0x3d   : > { %4883 = vmatprep.mubr.msk.f32.mxu1 %vm411_vm1, %v5922_v6  ;;  %5080 = vmatprep.mubr.msk.f32.mxu0 %vm411_vm1, %v5922_v6  ;;  %6889 = vst [vmem:[#allocation16_spill] sm:$0xff] %v6064_v62  ;;  %6890 = vst [vmem:[#allocation17_spill] sm:$0xff] %v6076_v0  ;;  %v6078_v1 = vld [vmem:[#allocation2 + $0xb2] sm:$0xff]  ;;  %v490_v3 = vld [vmem:[#allocation2] sm:$0xff] }
  0x3e   : > { %v6080_v8 = vld [vmem:[#allocation2 + $0xc2] sm:$0xff]  ;;  %v6089_v11 = vld [vmem:[#allocation2 + $0xca] sm:$0xff]  ;;  %v6091_v12 = vld [vmem:[#allocation2 + $0x18] sm:$0xff] }
  0x3f   : > { %v491_v9 = vld [vmem:[#allocation2 + $0x8] sm:$0xff]  ;;  %6891 = vst [vmem:[#allocation18_spill] sm:$0xff] %v6091_v12  ;;  %v6093_v13 = vld [vmem:[#allocation2 + $0xda] sm:$0xff]  ;;  %v6113_v17 = vld [vmem:[#allocation2 + $0x30] sm:$0xff] }
  0x40   : > { %4884 = vmatmul.mubr.msk.f32.gmra.mrb[12].mxu1 %vm411_vm1, %v5933_v31  ;;  %5081 = vmatmul.mubr.msk.f32.gmra.mrb[10].mxu0 %vm411_vm1, %v5933_v31  ;;  %v6101_v14 = vld [vmem:[%s6829_s3 + $0xc] sm:$0xf]  ;;  %v6107_v15 = vld [vmem:[#allocation2 + $0x20] sm:$0xff]  ;;  %6893 = vst [vmem:[#allocation20_spill] sm:$0xff] %v6113_v17  ;;  %v6115_v18 = vld [vmem:[#allocation2 + $0xf2] sm:$0xff] }
  0x41   : > { %4886 = vmatprep.mubr.msk.f32.mxu1 %vm411_vm1, %v5935_v32  ;;  %5083 = vmatprep.mubr.msk.f32.mxu0 %vm411_vm1, %v5935_v32  ;;  %6892 = vst [vmem:[#allocation19_spill] sm:$0xff] %v6107_v15  ;;  %v6109_v16 = vld [vmem:[#allocation2 + $0xe2] sm:$0xff]  ;;  %v6129_v19 = vld [vmem:[#allocation2 + $0xfa] sm:$0xff]  ;;  %v6133_v22 = vld [vmem:[#allocation2 + $0x10a] sm:$0xff] }
  0x42   : > { %v6131_v20 = vld [vmem:[#allocation2 + $0x48] sm:$0xff]  ;;  %v6143_v5 = vld [vmem:[#allocation2 + $0x50] sm:$0xff]  ;;  %v6147_v26 = vld [vmem:[#allocation2 + $0x60] sm:$0xff] }
  0x43   : > { %6895 = vst [vmem:[#allocation22_spill] sm:$0xff] %v6131_v20  ;;  %6896 = vst [vmem:[#allocation23_spill] sm:$0xff] %v6143_v5  ;;  %v6145_v25 = vld [vmem:[#allocation2 + $0x112] sm:$0xff]  ;;  %v6149_v27 = vld [vmem:[#allocation2 + $0x122] sm:$0xff] }
  0x44   : > { %4887 = vmatmul.mubr.msk.f32.gmra.mrb[14].mxu1 %vm411_vm1, %v5945_v33  ;;  %5084 = vmatmul.mubr.msk.f32.gmra.mrb[12].mxu0 %vm411_vm1, %v5945_v33  ;;  %6897 = vst [vmem:[#allocation24_spill] sm:$0xff] %v6147_v26  ;;  %v6159_v28 = vld [vmem:[#allocation2 + $0x68] sm:$0xff] }
  0x45   : > { %4889 = vmatprep.mubr.msk.f32.mxu1 %vm411_vm1, %v5947_v34  ;;  %5086 = vmatprep.mubr.msk.f32.mxu0 %vm411_vm1, %v5947_v34  ;;  %6898 = vst [vmem:[#allocation25_spill] sm:$0xff] %v6159_v28 }
  0x48   : > { %4890 = vmatmul.mubr.msk.f32.gmra.mrb[16].mxu1 %vm411_vm1, %v5957_v35  ;;  %5087 = vmatmul.mubr.msk.f32.gmra.mrb[14].mxu0 %vm411_vm1, %v5957_v35  ;;  %v6237_v35 = vld [vmem:[#allocation2 + $0xe0] sm:$0xff] }
  0x49   : > { %4892 = vmatprep.mubr.msk.f32.mxu1 %vm411_vm1, %v5959_v36  ;;  %5115 = vmatprep.mubr.msk.f32.mxu0 %vm411_vm1, %v5961_v37  ;;  %v6225_v36 = vld [vmem:[#allocation2 + $0x18a] sm:$0xff] }
  0x4a   : > { %6906 = vst [vmem:[#allocation33_spill] sm:$0xff] %v6225_v36 }
  0x4c   : > { %4893 = vmatmul.mubr.msk.f32.gmra.mrb[18].mxu1 %vm411_vm1, %v5971_v38  ;;  %5116 = vmatmul.mubr.msk.f32.vlgmr.msra.gmra.mrb[0].mxu0 %vm411_vm1, %v5973_v39  ;;  %v6213_v38 = vld [vmem:[#allocation2 + $0x182] sm:$0xff] }
  0x4d   : > { %5164 = vmatpush3.msk.msra.mxu0 %vm653_vm0, %v5818_v30  ;;  %4895 = vmatprep.mubr.msk.f32.mxu1 %vm411_vm1, %v5975_v41  ;;  %v6012_v30 = vld [vmem:[#allocation2 + $0x111] sm:$0xff]  ;;  %v6211_v41 = vld [vmem:[#allocation2 + $0xc0] sm:$0xff]  ;;  %6905 = vst [vmem:[#allocation32_spill] sm:$0xff] %v6213_v38 }
  0x4e   : > { %5118 = vmatprep.mubr.msk.f32.mxu0 %vm411_vm1, %v5977_v42  ;;  %5213 = vmatprep.subr.msk.mxu0 %vm653_vm0, %v5982_v43  ;;  %6882 = vst [vmem:[#allocation9_spill] sm:$0xff] %v6012_v30 }
  0x50   : > { %4896 = vmatmul.mubr.msk.f32.gmra.mrb[20].mxu1 %vm411_vm1, %v5992_v44  ;;  %5119 = vmatmul.mubr.msk.f32.gmra.mrb[2].mxu0 %vm411_vm1, %v5994_v45  ;;  %v6209_v44 = vld [vmem:[#allocation2 + $0x172] sm:$0xff] }
  0x51   : > { %4898 = vmatprep.mubr.msk.f32.mxu1 %vm411_vm1, %v5998_v4  ;;  %5121 = vmatprep.mubr.msk.f32.mxu0 %vm411_vm1, %v6000_v47  ;;  %v6207_v4 = vld [vmem:[#allocation2 + $0xb0] sm:$0xff]  ;;  %6904 = vst [vmem:[#allocation31_spill] sm:$0xff] %v6209_v44 }
  0x52   : > { %6903 = vst [vmem:[#allocation30_spill] sm:$0xff] %v6207_v4 }
  0x54   : > { %4899 = vmatmul.mubr.msk.f32.gmra.mrb[22].mxu1 %vm411_vm1, %v6012_v30  ;;  %5122 = vmatmul.mubr.msk.f32.gmra.mrb[4].mxu0 %vm411_vm1, %v6014_v48  ;;  %v6197_v30 = vld [vmem:[#allocation2 + $0x16a] sm:$0xff] }
  0x55   : > { %4901 = vmatprep.mubr.msk.f32.mxu1 %vm411_vm1, %v6016_v49  ;;  %5124 = vmatprep.mubr.msk.f32.mxu0 %vm411_vm1, %v6018_v50  ;;  %v6195_v49 = vld [vmem:[#allocation2 + $0xa8] sm:$0xff] }
  0x58   : > { %4902 = vmatmul.mubr.msk.f32.gmra.mrb[24].mxu1 %vm411_vm1, %v6028_v51  ;;  %5125 = vmatmul.mubr.msk.f32.gmra.mrb[6].mxu0 %vm411_vm1, %v6030_v52  ;;  %v6193_v51 = vld [vmem:[#allocation2 + $0x15a] sm:$0xff] }
  0x59   : > { %4904 = vmatprep.mubr.msk.f32.mxu1 %vm411_vm1, %v6032_v53  ;;  %5127 = vmatprep.mubr.msk.f32.mxu0 %vm411_vm1, %v6034_v54  ;;  %v6191_v53 = vld [vmem:[#allocation2 + $0x98] sm:$0xff] }
  0x5a   : > { %6902 = vst [vmem:[#allocation29_spill] sm:$0xff] %v6191_v53 }
  0x5c   : > { %4905 = vmatmul.mubr.msk.f32.gmra.mrb[26].mxu1 %vm411_vm1, %v6044_v55  ;;  %5128 = vmatmul.mubr.msk.f32.gmra.mrb[8].mxu0 %vm411_vm1, %v6046_v56  ;;  %v6181_v55 = vld [vmem:[#allocation2 + $0x152] sm:$0xff] }
  0x5d   : > { %4907 = vmatprep.mubr.msk.f32.mxu1 %vm411_vm1, %v6048_v57  ;;  %5130 = vmatprep.mubr.msk.f32.mxu0 %vm411_vm1, %v6050_v58  ;;  %v6179_v57 = vld [vmem:[#allocation2 + $0x90] sm:$0xff] }
  0x5e   : > { %6901 = vst [vmem:[#allocation28_spill] sm:$0xff] %v6179_v57 }
  0x60   : > { %4908 = vmatmul.mubr.msk.f32.gmra.mrb[28].mxu1 %vm411_vm1, %v6060_v59  ;;  %5131 = vmatmul.mubr.msk.f32.gmra.mrb[10].mxu0 %vm411_vm1, %v6062_v60  ;;  %v6177_v59 = vld [vmem:[#allocation2 + $0x142] sm:$0xff] }
  0x61   : > { %4910 = vmatprep.mubr.msk.f32.mxu1 %vm411_vm1, %v6064_v62  ;;  %5133 = vmatprep.mubr.msk.f32.mxu0 %vm411_vm1, %v6066_v63  ;;  %v6175_v62 = vld [vmem:[#allocation2 + $0x80] sm:$0xff] }
  0x62   : > { %6900 = vst [vmem:[#allocation27_spill] sm:$0xff] %v6175_v62 }
  0x64   : > { %4911 = vmatmul.mubr.msk.f32.gmra.mrb[30].mxu1 %vm411_vm1, %v6076_v0  ;;  %5134 = vmatmul.mubr.msk.f32.gmra.mrb[12].mxu0 %vm411_vm1, %v6078_v1  ;;  %v6165_v0 = vld [vmem:[#allocation2 + $0x13a] sm:$0xff] }
  0x65   : > { %4915 = vmatprep.mubr.msk.f32.mxu1 %vm411_vm1, %v490_v3  ;;  %5136 = vmatprep.mubr.msk.f32.mxu0 %vm411_vm1, %v6080_v8  ;;  %v6161_v3 = vld [vmem:[#allocation2 + $0x12a] sm:$0xff] }
  0x68   : > { %4916 = vmatmul.mubr.msk.f32.vlgmr.msra.gmra.mrb[0].mxu1 %vm411_vm1, %v491_v9  ;;  %5137 = vmatmul.mubr.msk.f32.gmra.mrb[14].mxu0 %vm411_vm1, %v6089_v11  ;;  %v6163_v9 = vld [vmem:[#allocation2 + $0x78] sm:$0xff] }
  0x69   : > { %4918 = vmatprep.mubr.msk.f32.mxu1 %vm411_vm1, %v6091_v12  ;;  %5139 = vmatprep.mubr.msk.f32.mxu0 %vm411_vm1, %v6093_v13  ;;  %6899 = vst [vmem:[#allocation26_spill] sm:$0xff] %v6163_v9  ;;  %v6227_v12 = vld [vmem:[#allocation2 + $0xd8] sm:$0xff] }
  0x6a   : > { %4964 = vmatpush3.msk.msra.mxu1 %vm653_vm0, %v5734_v10  ;;  %v6127_v10 = vld [vmem:[#allocation2 + $0x38] sm:$0xff] }
  0x6b   : > { %5013 = vmatprep.subr.msk.mxu1 %vm653_vm0, %v6101_v14  ;;  %6894 = vst [vmem:[#allocation21_spill] sm:$0xff] %v6127_v10 }
  0x6c   : > { %4919 = vmatmul.mubr.msk.f32.gmra.mrb[2].mxu1 %vm411_vm1, %v6107_v15  ;;  %5140 = vmatmul.mubr.msk.f32.gmra.mrb[16].mxu0 %vm411_vm1, %v6109_v16  ;;  %v6223_v15 = vld [vmem:[#allocation2 + $0xc8] sm:$0xff] }
  0x6d   : > { %4921 = vmatprep.mubr.msk.f32.mxu1 %vm411_vm1, %v6113_v17  ;;  %5142 = vmatprep.mubr.msk.f32.mxu0 %vm411_vm1, %v6115_v18 }
  0x70   : > { %4922 = vmatmul.mubr.msk.f32.gmra.mrb[4].mxu1 %vm411_vm1, %v6127_v10  ;;  %5143 = vmatmul.mubr.msk.f32.gmra.mrb[18].mxu0 %vm411_vm1, %v6129_v19 }
  0x71   : > { %4924 = vmatprep.mubr.msk.f32.mxu1 %vm411_vm1, %v6131_v20  ;;  %5145 = vmatprep.mubr.msk.f32.mxu0 %vm411_vm1, %v6133_v22 }
  0x74   : > { %4925 = vmatmul.mubr.msk.f32.gmra.mrb[6].mxu1 %vm411_vm1, %v6143_v5  ;;  %5146 = vmatmul.mubr.msk.f32.gmra.mrb[20].mxu0 %vm411_vm1, %v6145_v25 }
  0x75   : > { %4927 = vmatprep.mubr.msk.f32.mxu1 %vm411_vm1, %v6147_v26  ;;  %5148 = vmatprep.mubr.msk.f32.mxu0 %vm411_vm1, %v6149_v27 }
  0x78   : > { %4928 = vmatmul.mubr.msk.f32.gmra.mrb[8].mxu1 %vm411_vm1, %v6159_v28  ;;  %5149 = vmatmul.mubr.msk.f32.gmra.mrb[22].mxu0 %vm411_vm1, %v6161_v3 }
  0x79   : > { %4930 = vmatprep.mubr.msk.f32.mxu1 %vm411_vm1, %v6163_v9  ;;  %5151 = vmatprep.mubr.msk.f32.mxu0 %vm411_vm1, %v6165_v0 }
  0x7c   : > { %4931 = vmatmul.mubr.msk.f32.gmra.mrb[10].mxu1 %vm411_vm1, %v6175_v62  ;;  %5152 = vmatmul.mubr.msk.f32.gmra.mrb[24].mxu0 %vm411_vm1, %v6177_v59 }
  0x7d   : > { %4933 = vmatprep.mubr.msk.f32.mxu1 %vm411_vm1, %v6179_v57  ;;  %5154 = vmatprep.mubr.msk.f32.mxu0 %vm411_vm1, %v6181_v55 }
  0x80   : > { %4934 = vmatmul.mubr.msk.f32.gmra.mrb[12].mxu1 %vm411_vm1, %v6191_v53  ;;  %5155 = vmatmul.mubr.msk.f32.gmra.mrb[26].mxu0 %vm411_vm1, %v6193_v51 }
  0x81   : > { %4936 = vmatprep.mubr.msk.f32.mxu1 %vm411_vm1, %v6195_v49  ;;  %5157 = vmatprep.mubr.msk.f32.mxu0 %vm411_vm1, %v6197_v30 }
  0x84   : > { %4937 = vmatmul.mubr.msk.f32.gmra.mrb[14].mxu1 %vm411_vm1, %v6207_v4  ;;  %5158 = vmatmul.mubr.msk.f32.gmra.mrb[28].mxu0 %vm411_vm1, %v6209_v44  ;;  %v6244_v44 = vld [vmem:[%s6829_s3 + $0x20] sm:$0xf] }
  0x85   : > { %4939 = vmatprep.mubr.msk.f32.mxu1 %vm411_vm1, %v6211_v41  ;;  %5160 = vmatprep.mubr.msk.f32.mxu0 %vm411_vm1, %v6213_v38  ;;  %v6239_v38 = vld [vmem:[#allocation2 + $0xf0] sm:$0xff] }
  0x88   : > { %4940 = vmatmul.mubr.msk.f32.gmra.mrb[16].mxu1 %vm411_vm1, %v6223_v15  ;;  %5161 = vmatmul.mubr.msk.f32.gmra.mrb[30].mxu0 %vm411_vm1, %v6225_v36  ;;  %v6254_v36 = vld [vmem:[#allocation2 + $0xf8] sm:$0xff] }
  0x89   : > { %4942 = vmatprep.mubr.msk.f32.mxu1 %vm411_vm1, %v6227_v12  ;;  %5165 = vmatprep.mubr.msk.f32.mxu0 %vm411_vm1, %v6113_v17  ;;  %v6258_v17 = vld [vmem:[#allocation2 + $0x108] sm:$0xff] }
  0x8c   : > { %4943 = vmatmul.mubr.msk.f32.gmra.mrb[18].mxu1 %vm411_vm1, %v6237_v35  ;;  %5166 = vmatmul.mubr.msk.f32.vlgmr.msra.gmra.mrb[0].mxu0 %vm411_vm1, %v6127_v10  ;;  %v6284_v10 = vld [vmem:[#allocation2 + $0x138] sm:$0xff] }
  0x8d   : > { %5214 = vmatpush3.msk.msra.mxu0 %vm653_vm0, %v5982_v43  ;;  %4945 = vmatprep.mubr.msk.f32.mxu1 %vm411_vm1, %v6239_v38  ;;  %v6270_v43 = vld [vmem:[#allocation2 + $0x110] sm:$0xff] }
  0x8e   : > { %5168 = vmatprep.mubr.msk.f32.mxu0 %vm411_vm1, %v6131_v20  ;;  %5263 = vmatprep.subr.msk.mxu0 %vm653_vm0, %v6244_v44  ;;  %v6272_v20 = vld [vmem:[#allocation2 + $0x120] sm:$0xff] }
  0x90   : > { %4946 = vmatmul.mubr.msk.f32.gmra.mrb[20].mxu1 %vm411_vm1, %v6254_v36  ;;  %5169 = vmatmul.mubr.msk.f32.gmra.mrb[2].mxu0 %vm411_vm1, %v6143_v5  ;;  %v6282_v5 = vld [vmem:[#allocation2 + $0x128] sm:$0xff] }
  0x91   : > { %4948 = vmatprep.mubr.msk.f32.mxu1 %vm411_vm1, %v6258_v17  ;;  %5171 = vmatprep.mubr.msk.f32.mxu0 %vm411_vm1, %v6147_v26  ;;  %v6296_v26 = vld [vmem:[#allocation2 + $0x150] sm:$0xff] }
  0x94   : > { %4949 = vmatmul.mubr.msk.f32.gmra.mrb[22].mxu1 %vm411_vm1, %v6270_v43  ;;  %5172 = vmatmul.mubr.msk.f32.gmra.mrb[4].mxu0 %vm411_vm1, %v6159_v28  ;;  %v6294_v28 = vld [vmem:[#allocation2 + $0x140] sm:$0xff] }
  0x95   : > { %4951 = vmatprep.mubr.msk.f32.mxu1 %vm411_vm1, %v6272_v20  ;;  %5174 = vmatprep.mubr.msk.f32.mxu0 %vm411_vm1, %v6163_v9  ;;  %v6308_v9 = vld [vmem:[#allocation2 + $0x168] sm:$0xff] }
  0x98   : > { %4952 = vmatmul.mubr.msk.f32.gmra.mrb[24].mxu1 %vm411_vm1, %v6282_v5  ;;  %5175 = vmatmul.mubr.msk.f32.gmra.mrb[6].mxu0 %vm411_vm1, %v6175_v62  ;;  %v6306_v62 = vld [vmem:[#allocation2 + $0x158] sm:$0xff] }
  0x99   : > { %4954 = vmatprep.mubr.msk.f32.mxu1 %vm411_vm1, %v6284_v10  ;;  %5177 = vmatprep.mubr.msk.f32.mxu0 %vm411_vm1, %v6179_v57  ;;  %v1206_v57 = vld [vmem:[#allocation2 + $0x2] sm:$0xff] }
  0x9c   : > { %4955 = vmatmul.mubr.msk.f32.gmra.mrb[26].mxu1 %vm411_vm1, %v6294_v28  ;;  %5178 = vmatmul.mubr.msk.f32.gmra.mrb[8].mxu0 %vm411_vm1, %v6191_v53  ;;  %v6318_v53 = vld [vmem:[#allocation2 + $0x170] sm:$0xff] }
  0x9d   : > { %4957 = vmatprep.mubr.msk.f32.mxu1 %vm411_vm1, %v6296_v26  ;;  %5180 = vmatprep.mubr.msk.f32.mxu0 %vm411_vm1, %v6195_v49 }
  0xa0   : > { %4958 = vmatmul.mubr.msk.f32.gmra.mrb[28].mxu1 %vm411_vm1, %v6306_v62  ;;  %5181 = vmatmul.mubr.msk.f32.gmra.mrb[10].mxu0 %vm411_vm1, %v6207_v4  ;;  %v1207_v4 = vld [vmem:[#allocation2 + $0xa] sm:$0xff] }
  0xa1   : > { %4960 = vmatprep.mubr.msk.f32.mxu1 %vm411_vm1, %v6308_v9  ;;  %5183 = vmatprep.mubr.msk.f32.mxu0 %vm411_vm1, %v6211_v41 }
  0xa4   : > { %4961 = vmatmul.mubr.msk.f32.gmra.mrb[30].mxu1 %vm411_vm1, %v6318_v53  ;;  %5184 = vmatmul.mubr.msk.f32.gmra.mrb[12].mxu0 %vm411_vm1, %v6223_v15 }
  0xa5   : > { %4965 = vmatprep.mubr.msk.f32.mxu1 %vm411_vm1, %v1206_v57  ;;  %5186 = vmatprep.mubr.msk.f32.mxu0 %vm411_vm1, %v6227_v12  ;;  %v6920_v57 = vld [vmem:[#allocation9_spill] sm:$0xff] }
  0xa8   : > { %4966 = vmatmul.mubr.msk.f32.vlgmr.msra.gmra.mrb[0].mxu1 %vm411_vm1, %v1207_v4  ;;  %5187 = vmatmul.mubr.msk.f32.gmra.mrb[14].mxu0 %vm411_vm1, %v6237_v35  ;;  %v2798_v4 = vld [vmem:[#allocation2 + $0x1a0] sm:$0xff] }
  0xa9   : > { %4968 = vmatprep.mubr.msk.f32.mxu1 %vm411_vm1, %v5961_v37  ;;  %5189 = vmatprep.mubr.msk.f32.mxu0 %vm411_vm1, %v6239_v38  ;;  %v6388_v37 = vld [vmem:[#allocation2 + $0x188] sm:$0xff] }
  0xaa   : > { %5014 = vmatpush3.msk.msra.mxu1 %vm653_vm0, %v6101_v14  ;;  %v6921_v14 = vld [vmem:[#allocation24_spill] sm:$0xff] }
  0xab   : > { %5313 = vmatprep.subr.msk.mxu1 %vm653_vm0, %v5644_v2  ;;  %v6378_v2 = vld [vmem:[#allocation2 + $0x180] sm:$0xff] }
  0xac   : > { %4969 = vmatmul.mubr.msk.f32.gmra.mrb[2].mxu1 %vm411_vm1, %v5973_v39  ;;  %5190 = vmatmul.mubr.msk.f32.gmra.mrb[16].mxu0 %vm411_vm1, %v6254_v36  ;;  %v2797_v39 = vld [vmem:[#allocation2 + $0x198] sm:$0xff] }
  0xad   : > { %4971 = vmatprep.mubr.msk.f32.mxu1 %vm411_vm1, %v5977_v42  ;;  %5192 = vmatprep.mubr.msk.f32.mxu0 %vm411_vm1, %v6258_v17 }
  0xb0   : > { %4972 = vmatmul.mubr.msk.f32.gmra.mrb[4].mxu1 %vm411_vm1, %v5994_v45  ;;  %5193 = vmatmul.mubr.msk.f32.gmra.mrb[18].mxu0 %vm411_vm1, %v6270_v43 }
  0xb1   : > { %4974 = vmatprep.mubr.msk.f32.mxu1 %vm411_vm1, %v6000_v47  ;;  %5195 = vmatprep.mubr.msk.f32.mxu0 %vm411_vm1, %v6272_v20 }
  0xb4   : > { %4975 = vmatmul.mubr.msk.f32.gmra.mrb[6].mxu1 %vm411_vm1, %v6014_v48  ;;  %5196 = vmatmul.mubr.msk.f32.gmra.mrb[20].mxu0 %vm411_vm1, %v6282_v5 }
  0xb5   : > { %4977 = vmatprep.mubr.msk.f32.mxu1 %vm411_vm1, %v6018_v50  ;;  %5198 = vmatprep.mubr.msk.f32.mxu0 %vm411_vm1, %v6284_v10 }
  0xb8   : > { %4978 = vmatmul.mubr.msk.f32.gmra.mrb[8].mxu1 %vm411_vm1, %v6030_v52  ;;  %5199 = vmatmul.mubr.msk.f32.gmra.mrb[22].mxu0 %vm411_vm1, %v6294_v28 }
  0xb9   : > { %4980 = vmatprep.mubr.msk.f32.mxu1 %vm411_vm1, %v6034_v54  ;;  %5201 = vmatprep.mubr.msk.f32.mxu0 %vm411_vm1, %v6296_v26 }
  0xbc   : > { %4981 = vmatmul.mubr.msk.f32.gmra.mrb[10].mxu1 %vm411_vm1, %v6046_v56  ;;  %5202 = vmatmul.mubr.msk.f32.gmra.mrb[24].mxu0 %vm411_vm1, %v6306_v62 }
  0xbd   : > { %4983 = vmatprep.mubr.msk.f32.mxu1 %vm411_vm1, %v6050_v58  ;;  %5204 = vmatprep.mubr.msk.f32.mxu0 %vm411_vm1, %v6308_v9 }
  0xc0   : > { %4984 = vmatmul.mubr.msk.f32.gmra.mrb[12].mxu1 %vm411_vm1, %v6062_v60  ;;  %5205 = vmatmul.mubr.msk.f32.gmra.mrb[26].mxu0 %vm411_vm1, %v6318_v53 }
  0xc1   : > { %4986 = vmatprep.mubr.msk.f32.mxu1 %vm411_vm1, %v6066_v63  ;;  %5207 = vmatprep.mubr.msk.f32.mxu0 %vm411_vm1, %v6378_v2 }
  0xc4   : > { %4987 = vmatmul.mubr.msk.f32.gmra.mrb[14].mxu1 %vm411_vm1, %v6078_v1  ;;  %5208 = vmatmul.mubr.msk.f32.gmra.mrb[28].mxu0 %vm411_vm1, %v6388_v37 }
  0xc5   : > { %4989 = vmatprep.mubr.msk.f32.mxu1 %vm411_vm1, %v6080_v8  ;;  %5210 = vmatprep.mubr.msk.f32.mxu0 %vm411_vm1, %v2797_v39  ;;  %v6922_v39 = vld [vmem:[#allocation10_spill] sm:$0xff] }
  0xc8   : > { %4990 = vmatmul.mubr.msk.f32.gmra.mrb[16].mxu1 %vm411_vm1, %v6089_v11  ;;  %5211 = vmatmul.mubr.msk.f32.gmra.mrb[30].mxu0 %vm411_vm1, %v2798_v4  ;;  %v6923_v4 = vld [vmem:[#allocation25_spill] sm:$0xff] }
  0xc9   : > { %4992 = vmatprep.mubr.msk.f32.mxu1 %vm411_vm1, %v6093_v13  ;;  %5215 = vmatprep.mubr.msk.f32.mxu0 %vm411_vm1, %v5807_v24  ;;  %v6907_v24 = vld [vmem:[#allocation31_spill] sm:$0xff] }
  0xcc   : > { %4993 = vmatmul.mubr.msk.f32.gmra.mrb[18].mxu1 %vm411_vm1, %v6109_v16  ;;  %5216 = vmatmul.mubr.msk.f32.vlgmr.msra.gmra.mrb[0].mxu0 %vm411_vm1, %v5838_v40  ;;  %v6908_v40 = vld [vmem:[#allocation3_spill] sm:$0xff] }
  0xcd   : > { %5264 = vmatpush3.msk.msra.mxu0 %vm653_vm0, %v6244_v44  ;;  %4995 = vmatprep.mubr.msk.f32.mxu1 %vm411_vm1, %v6115_v18  ;;  %v6919_v44 = vld [vmem:[#allocation23_spill] sm:$0xff] }
  0xce   : > { %5218 = vmatprep.mubr.msk.f32.mxu0 %vm411_vm1, %v5844_v46  ;;  %v6909_v46 = vld [vmem:[#allocation18_spill] sm:$0xff] }
  0xd0   : > { %4996 = vmatmul.mubr.msk.f32.gmra.mrb[20].mxu1 %vm411_vm1, %v6129_v19  ;;  %5219 = vmatmul.mubr.msk.f32.gmra.mrb[2].mxu0 %vm411_vm1, %v5872_v61  ;;  %v6910_v61 = vld [vmem:[#allocation4_spill] sm:$0xff] }
  0xd1   : > { %4998 = vmatprep.mubr.msk.f32.mxu1 %vm411_vm1, %v6133_v22  ;;  %5221 = vmatprep.mubr.msk.f32.mxu0 %vm411_vm1, %v5878_v7  ;;  %v6911_v7 = vld [vmem:[#allocation19_spill] sm:$0xff] }
  0xd4   : > { %4999 = vmatmul.mubr.msk.f32.gmra.mrb[22].mxu1 %vm411_vm1, %v6145_v25  ;;  %5222 = vmatmul.mubr.msk.f32.gmra.mrb[4].mxu0 %vm411_vm1, %v5899_v21  ;;  %v6912_v21 = vld [vmem:[#allocation5_spill] sm:$0xff] }
  0xd5   : > { %5001 = vmatprep.mubr.msk.f32.mxu1 %vm411_vm1, %v6149_v27  ;;  %5224 = vmatprep.mubr.msk.f32.mxu0 %vm411_vm1, %v5905_v23  ;;  %v6913_v23 = vld [vmem:[#allocation20_spill] sm:$0xff] }
  0xd8   : > { %5002 = vmatmul.mubr.msk.f32.gmra.mrb[24].mxu1 %vm411_vm1, %v6161_v3  ;;  %5225 = vmatmul.mubr.msk.f32.gmra.mrb[6].mxu0 %vm411_vm1, %v5919_v29  ;;  %v6914_v29 = vld [vmem:[#allocation6_spill] sm:$0xff] }
  0xd9   : > { %5004 = vmatprep.mubr.msk.f32.mxu1 %vm411_vm1, %v6165_v0  ;;  %5227 = vmatprep.mubr.msk.f32.mxu0 %vm411_vm1, %v5922_v6  ;;  %v5580_v6 = vld [vmem:[%s6829_s3 + $0x10] sm:$0xf] }
  0xdc   : > { %5005 = vmatmul.mubr.msk.f32.gmra.mrb[26].mxu1 %vm411_vm1, %v6177_v59  ;;  %5228 = vmatmul.mubr.msk.f32.gmra.mrb[8].mxu0 %vm411_vm1, %v5933_v31  ;;  %v6915_v31 = vld [vmem:[#allocation21_spill] sm:$0xff] }
  0xdd   : > { %5007 = vmatprep.mubr.msk.f32.mxu1 %vm411_vm1, %v6181_v55  ;;  %5230 = vmatprep.mubr.msk.f32.mxu0 %vm411_vm1, %v5935_v32  ;;  %v6916_v32 = vld [vmem:[#allocation7_spill] sm:$0xff] }
  0xe0   : > { %5008 = vmatmul.mubr.msk.f32.gmra.mrb[28].mxu1 %vm411_vm1, %v6193_v51  ;;  %5231 = vmatmul.mubr.msk.f32.gmra.mrb[10].mxu0 %vm411_vm1, %v5945_v33  ;;  %v6917_v33 = vld [vmem:[#allocation22_spill] sm:$0xff] }
  0xe1   : > { %5010 = vmatprep.mubr.msk.f32.mxu1 %vm411_vm1, %v6197_v30  ;;  %5233 = vmatprep.mubr.msk.f32.mxu0 %vm411_vm1, %v5947_v34  ;;  %v6918_v34 = vld [vmem:[#allocation8_spill] sm:$0xff] }
  0xe4   : > { %5011 = vmatmul.mubr.msk.f32.gmra.mrb[30].mxu1 %vm411_vm1, %v6907_v24  ;;  %5234 = vmatmul.mubr.msk.f32.gmra.mrb[12].mxu0 %vm411_vm1, %v6908_v40  ;;  %v6924_v40 = vld [vmem:[#allocation11_spill] sm:$0xff] }
  0xe5   : > { %5015 = vmatprep.mubr.msk.f32.mxu1 %vm411_vm1, %v6909_v46  ;;  %5236 = vmatprep.mubr.msk.f32.mxu0 %vm411_vm1, %v6910_v61  ;;  %v6925_v46 = vld [vmem:[#allocation26_spill] sm:$0xff]  ;;  %v6926_v61 = vld [vmem:[#allocation12_spill] sm:$0xff] }
  0xe8   : > { %5016 = vmatmul.mubr.msk.f32.vlgmr.msra.gmra.mrb[0].mxu1 %vm411_vm1, %v6911_v7  ;;  %5237 = vmatmul.mubr.msk.f32.gmra.mrb[14].mxu0 %vm411_vm1, %v6912_v21  ;;  %v6927_v7 = vld [vmem:[#allocation27_spill] sm:$0xff]  ;;  %v6928_v21 = vld [vmem:[#allocation13_spill] sm:$0xff] }
  0xe9   : > { %5018 = vmatprep.mubr.msk.f32.mxu1 %vm411_vm1, %v6913_v23  ;;  %5239 = vmatprep.mubr.msk.f32.mxu0 %vm411_vm1, %v6914_v29  ;;  %v6929_v23 = vld [vmem:[#allocation28_spill] sm:$0xff]  ;;  %v6930_v29 = vld [vmem:[#allocation14_spill] sm:$0xff] }
  0xea   : > { %5314 = vmatpush3.msk.msra.mxu1 %vm653_vm0, %v5580_v6  ;;  %v6931_v6 = vld [vmem:[#allocation29_spill] sm:$0xff] }
  0xec   : > { %5019 = vmatmul.mubr.msk.f32.gmra.mrb[2].mxu1 %vm411_vm1, %v6915_v31  ;;  %5240 = vmatmul.mubr.msk.f32.gmra.mrb[16].mxu0 %vm411_vm1, %v6916_v32  ;;  %v6932_v31 = vld [vmem:[#allocation15_spill] sm:$0xff]  ;;  %v6933_v32 = vld [vmem:[#allocation16_spill] sm:$0xff] }
  0xed   : > { %5021 = vmatprep.mubr.msk.f32.mxu1 %vm411_vm1, %v6917_v33  ;;  %5242 = vmatprep.mubr.msk.f32.mxu0 %vm411_vm1, %v6918_v34  ;;  %v6514_v33 = vld [vmem:[#allocation2 + $0x181] sm:$0xff] }
  0xf0   : > { %5022 = vmatmul.mubr.msk.f32.gmra.mrb[4].mxu1 %vm411_vm1, %v6919_v44  ;;  %5243 = vmatmul.mubr.msk.f32.gmra.mrb[18].mxu0 %vm411_vm1, %v6920_v57  ;;  %v6934_v44 = vld [vmem:[#allocation30_spill] sm:$0xff] }
  0xf1   : > { %5024 = vmatprep.mubr.msk.f32.mxu1 %vm411_vm1, %v6921_v14  ;;  %5245 = vmatprep.mubr.msk.f32.mxu0 %vm411_vm1, %v6922_v39  ;;  %v6935_v14 = vld [vmem:[#allocation17_spill] sm:$0xff] }
  0xf4   : > { %5025 = vmatmul.mubr.msk.f32.gmra.mrb[6].mxu1 %vm411_vm1, %v6923_v4  ;;  %5246 = vmatmul.mubr.msk.f32.gmra.mrb[20].mxu0 %vm411_vm1, %v6924_v40  ;;  %v6524_v4 = vld [vmem:[#allocation2 + $0x189] sm:$0xff] }
  0xf5   : > { %5027 = vmatprep.mubr.msk.f32.mxu1 %vm411_vm1, %v6925_v46  ;;  %5248 = vmatprep.mubr.msk.f32.mxu0 %vm411_vm1, %v6926_v61  ;;  %v3188_v46 = vld [vmem:[#allocation2 + $0x1a1] sm:$0xff] }
  0xf8   : > { %5028 = vmatmul.mubr.msk.f32.gmra.mrb[8].mxu1 %vm411_vm1, %v6927_v7  ;;  %5249 = vmatmul.mubr.msk.f32.gmra.mrb[22].mxu0 %vm411_vm1, %v6928_v21 }
  0xf9   : > { %5030 = vmatprep.mubr.msk.f32.mxu1 %vm411_vm1, %v6929_v23  ;;  %5251 = vmatprep.mubr.msk.f32.mxu0 %vm411_vm1, %v6930_v29 }
  0xfc   : > { %5031 = vmatmul.mubr.msk.f32.gmra.mrb[10].mxu1 %vm411_vm1, %v6931_v6  ;;  %5252 = vmatmul.mubr.msk.f32.gmra.mrb[24].mxu0 %vm411_vm1, %v6932_v31 }
  0xfd   : > { %5033 = vmatprep.mubr.msk.f32.mxu1 %vm411_vm1, %v6195_v49  ;;  %5254 = vmatprep.mubr.msk.f32.mxu0 %vm411_vm1, %v6933_v32  ;;  %v3187_v49 = vld [vmem:[#allocation2 + $0x199] sm:$0xff] }
 0x100   : > { %5034 = vmatmul.mubr.msk.f32.gmra.mrb[12].mxu1 %vm411_vm1, %v6934_v44  ;;  %5255 = vmatmul.mubr.msk.f32.gmra.mrb[26].mxu0 %vm411_vm1, %v6935_v14 }
 0x101   : > { %5036 = vmatprep.mubr.msk.f32.mxu1 %vm411_vm1, %v6211_v41  ;;  %5257 = vmatprep.mubr.msk.f32.mxu0 %vm411_vm1, %v6514_v33  ;;  %v2005_v41 = vld [vmem:[#allocation2 + $0xf9] sm:$0xff] }
 0x104   : > { %5037 = vmatmul.mubr.msk.f32.gmra.mrb[14].mxu1 %vm411_vm1, %v6223_v15  ;;  %5258 = vmatmul.mubr.msk.f32.gmra.mrb[28].mxu0 %vm411_vm1, %v6524_v4 }
 0x105   : > { %5039 = vmatprep.mubr.msk.f32.mxu1 %vm411_vm1, %v6227_v12  ;;  %5260 = vmatprep.mubr.msk.f32.mxu0 %vm411_vm1, %v3187_v49 }
 0x108   : > { %5040 = vmatmul.mubr.msk.f32.gmra.mrb[16].mxu1 %vm411_vm1, %v6237_v35  ;;  %5261 = vmatmul.mubr.msk.f32.gmra.mrb[30].mxu0 %vm411_vm1, %v3188_v46  ;;  %v2002_v35 = vld [vmem:[#allocation2 + $0xd9] sm:$0xff] }
 0x109   : > { %5042 = vmatprep.mubr.msk.f32.mxu1 %vm411_vm1, %v6239_v38  ;;  %5265 = vmatprep.mubr.msk.f32.mxu0 %vm411_vm1, %v5977_v42  ;;  %v2004_v38 = vld [vmem:[#allocation2 + $0xf1] sm:$0xff] }
 0x10a   : > { %v6936_v42 = vld [vmem:[#allocation32_spill] sm:$0xff] }
 0x10c   : > { %5043 = vmatmul.mubr.msk.f32.gmra.mrb[18].mxu1 %vm411_vm1, %v6254_v36  ;;  %5266 = vmatmul.mubr.msk.f32.vlgmr.msra.gmra.mrb[0].mxu0 %vm411_vm1, %v5994_v45  ;;  %v2003_v36 = vld [vmem:[#allocation2 + $0xe1] sm:$0xff] }
 0x10d   : > { %5045 = vmatprep.mubr.msk.f32.mxu1 %vm411_vm1, %v6258_v17  ;;  %5268 = vmatprep.mubr.msk.f32.mxu0 %vm411_vm1, %v6000_v47  ;;  %v3577_v45 = vld [vmem:[#allocation2 + $0x19a] sm:$0xff] }
 0x10e   : > { %v6937_v47 = vld [vmem:[#allocation33_spill] sm:$0xff] }
 0x110   : > { %5046 = vmatmul.mubr.msk.f32.gmra.mrb[20].mxu1 %vm411_vm1, %v6270_v43  ;;  %5269 = vmatmul.mubr.msk.f32.gmra.mrb[2].mxu0 %vm411_vm1, %v6014_v48 }
 0x111   : > { %5048 = vmatprep.mubr.msk.f32.mxu1 %vm411_vm1, %v6272_v20  ;;  %5271 = vmatprep.mubr.msk.f32.mxu0 %vm411_vm1, %v6018_v50 }
 0x114   : > { %5049 = vmatmul.mubr.msk.f32.gmra.mrb[22].mxu1 %vm411_vm1, %v6282_v5  ;;  %5272 = vmatmul.mubr.msk.f32.gmra.mrb[4].mxu0 %vm411_vm1, %v6030_v52 }
 0x115   : > { %5051 = vmatprep.mubr.msk.f32.mxu1 %vm411_vm1, %v6284_v10  ;;  %5274 = vmatprep.mubr.msk.f32.mxu0 %vm411_vm1, %v6034_v54 }
 0x118   : > { %5052 = vmatmul.mubr.msk.f32.gmra.mrb[24].mxu1 %vm411_vm1, %v6294_v28  ;;  %5275 = vmatmul.mubr.msk.f32.gmra.mrb[6].mxu0 %vm411_vm1, %v6046_v56 }
 0x119   : > { %5054 = vmatprep.mubr.msk.f32.mxu1 %vm411_vm1, %v6296_v26  ;;  %5277 = vmatprep.mubr.msk.f32.mxu0 %vm411_vm1, %v6050_v58 }
 0x11c   : > { %5055 = vmatmul.mubr.msk.f32.gmra.mrb[26].mxu1 %vm411_vm1, %v6306_v62  ;;  %5278 = vmatmul.mubr.msk.f32.gmra.mrb[8].mxu0 %vm411_vm1, %v6062_v60 }
 0x11d   : > { %5057 = vmatprep.mubr.msk.f32.mxu1 %vm411_vm1, %v6308_v9  ;;  %5280 = vmatprep.mubr.msk.f32.mxu0 %vm411_vm1, %v6066_v63 }
 0x120   : > { %5058 = vmatmul.mubr.msk.f32.gmra.mrb[28].mxu1 %vm411_vm1, %v6318_v53  ;;  %5281 = vmatmul.mubr.msk.f32.gmra.mrb[10].mxu0 %vm411_vm1, %v6078_v1 }
 0x121   : > { %5060 = vmatprep.mubr.msk.f32.mxu1 %vm411_vm1, %v6378_v2  ;;  %5283 = vmatprep.mubr.msk.f32.mxu0 %vm411_vm1, %v6080_v8 }
 0x124   : > { %5061 = vmatmul.mubr.msk.f32.gmra.mrb[30].mxu1 %vm411_vm1, %v6388_v37  ;;  %5284 = vmatmul.mubr.msk.f32.gmra.mrb[12].mxu0 %vm411_vm1, %v6089_v11 }
 0x125   : > { %5089 = vmatprep.mubr.msk.f32.mxu1 %vm411_vm1, %v2002_v35  ;;  %5286 = vmatprep.mubr.msk.f32.mxu0 %vm411_vm1, %v6093_v13 }
 0x128   : > { %5090 = vmatmul.mubr.msk.f32.vlgmr.msra.gmra.mrb[16].mxu1 %vm411_vm1, %v2003_v36  ;;  %5287 = vmatmul.mubr.msk.f32.gmra.mrb[14].mxu0 %vm411_vm1, %v6109_v16 }
 0x129   : > { %5092 = vmatprep.mubr.msk.f32.mxu1 %vm411_vm1, %v2004_v38  ;;  %5289 = vmatprep.mubr.msk.f32.mxu0 %vm411_vm1, %v6115_v18 }
 0x12c   : > { %5093 = vmatmul.mubr.msk.f32.gmra.mrb[18].mxu1 %vm411_vm1, %v2005_v41  ;;  %5290 = vmatmul.mubr.msk.f32.gmra.mrb[16].mxu0 %vm411_vm1, %v6129_v19 }
 0x12d   : > { %5095 = vmatprep.mubr.msk.f32.mxu1 %vm411_vm1, %v6918_v34  ;;  %5292 = vmatprep.mubr.msk.f32.mxu0 %vm411_vm1, %v6133_v22 }
 0x130   : > { %5096 = vmatmul.mubr.msk.f32.gmra.mrb[20].mxu1 %vm411_vm1, %v6920_v57  ;;  %5293 = vmatmul.mubr.msk.f32.gmra.mrb[18].mxu0 %vm411_vm1, %v6145_v25 }
 0x131   : > { %5098 = vmatprep.mubr.msk.f32.mxu1 %vm411_vm1, %v6922_v39  ;;  %5295 = vmatprep.mubr.msk.f32.mxu0 %vm411_vm1, %v6149_v27 }
 0x134   : > { %5099 = vmatmul.mubr.msk.f32.gmra.mrb[22].mxu1 %vm411_vm1, %v6924_v40  ;;  %5296 = vmatmul.mubr.msk.f32.gmra.mrb[20].mxu0 %vm411_vm1, %v6161_v3 }
 0x135   : > { %5101 = vmatprep.mubr.msk.f32.mxu1 %vm411_vm1, %v6926_v61  ;;  %5298 = vmatprep.mubr.msk.f32.mxu0 %vm411_vm1, %v6165_v0 }
 0x138   : > { %5102 = vmatmul.mubr.msk.f32.gmra.mrb[24].mxu1 %vm411_vm1, %v6928_v21  ;;  %5299 = vmatmul.mubr.msk.f32.gmra.mrb[22].mxu0 %vm411_vm1, %v6177_v59 }
 0x139   : > { %5104 = vmatprep.mubr.msk.f32.mxu1 %vm411_vm1, %v6930_v29  ;;  %5301 = vmatprep.mubr.msk.f32.mxu0 %vm411_vm1, %v6181_v55 }
 0x13c   : > { %5105 = vmatmul.mubr.msk.f32.gmra.mrb[26].mxu1 %vm411_vm1, %v6932_v31  ;;  %5302 = vmatmul.mubr.msk.f32.gmra.mrb[24].mxu0 %vm411_vm1, %v6193_v51 }
 0x13d   : > { %5107 = vmatprep.mubr.msk.f32.mxu1 %vm411_vm1, %v6933_v32  ;;  %5304 = vmatprep.mubr.msk.f32.mxu0 %vm411_vm1, %v6197_v30  ;;  %v3578_v30 = vld [vmem:[#allocation2 + $0x1a2] sm:$0xff] }
 0x140   : > { %5108 = vmatmul.mubr.msk.f32.gmra.mrb[28].mxu1 %vm411_vm1, %v6935_v14  ;;  %5305 = vmatmul.mubr.msk.f32.gmra.mrb[26].mxu0 %vm411_vm1, %v6907_v24 }
 0x141   : > { %5110 = vmatprep.mubr.msk.f32.mxu1 %vm411_vm1, %v6514_v33  ;;  %5307 = vmatprep.mubr.msk.f32.mxu0 %vm411_vm1, %v6936_v42 }
 0x144   : > { %5111 = vmatmul.mubr.msk.f32.gmra.mrb[30].mxu1 %vm411_vm1, %v6524_v4  ;;  %5308 = vmatmul.mubr.msk.f32.gmra.mrb[28].mxu0 %vm411_vm1, %v6937_v47 }
 0x145   : > { %5310 = vmatprep.mubr.msk.f32.mxu0 %vm411_vm1, %v3577_v45 }
 0x148   : > { %5311 = vmatmul.mubr.msk.f32.gmra.mrb[30].mxu0 %vm411_vm1, %v3578_v30 }
 0x1bb   : > { %v5017_v48 = vpop.f32.mrb[0].mxu1 }
 0x1bc   : > { %v1795_v50 = vpop.f32.mrb[1].mxu1 }
 0x1bf   : > { %v5020_v51 = vpop.f32.mrb[2].mxu1 }
 0x1c0   : > { %v1805_v52 = vpop.f32.mrb[3].mxu1 }
 0x1c3   : > { %v5023_v53 = vpop.f32.mrb[4].mxu1 }
 0x1c4   : > { %v1815_v54 = vpop.f32.mrb[5].mxu1 }
 0x1c7   : > { %v5026_v55 = vpop.f32.mrb[6].mxu1 }
 0x1c8   : > { %v1825_v56 = vpop.f32.mrb[7].mxu1 }
 0x1cb   : > { %v6654_v58 = vpop.f32.mrb[8].mxu1 }
 0x1cc   : > { %v6656_v59 = vpop.f32.mrb[9].mxu1 }
 0x1cf   : > { %v6658_v60 = vpop.f32.mrb[10].mxu1 }
 0x1d0   : > { %v6660_v62 = vpop.f32.mrb[11].mxu1 }
 0x1d3   : > { %v6662_v63 = vpop.f32.mrb[12].mxu1 }
 0x1d4   : > { %v6664_v0 = vpop.f32.mrb[13].mxu1 }
 0x1d7   : > { %v6666_v1 = vpop.f32.mrb[14].mxu1 }
 0x1d8   : > { %v6668_v8 = vpop.f32.mrb[15].mxu1 }
 0x1df   : > { %v5267_v11 = vpop.f32.mrb[0].mxu0 }
 0x1e0   : > { %v5315_v12 = vadd.f32 %v5267_v11, %v5017_v48  ;;  %v3746_v13 = vpop.f32.mrb[1].mxu0 }
 0x1e1   : > { %v5316_v15 = vadd.f32 %v3746_v13, %v1795_v50 }
 0x1e2   : > { %3938 = vst.msk [vmem:[%s6675_s9 + $0x8] sm:$0xff] %vm411_vm1, %v5315_v12  ;;  %v3970_v16 = vsel %vm411_vm1, %v5315_v12, 0.0  ;;  %v4040_v17 = vmul.f32 %v5315_v12, %v5315_v12 }
 0x1e3   : > { %3937 = vst.msk [vmem:[%s6675_s9] sm:$0xff] %vm411_vm1, %v5316_v15  ;;  %v3969_v18 = vsel %vm411_vm1, %v5316_v15, 0.0  ;;  %v4039_v10 = vmul.f32 %v5316_v15, %v5316_v15  ;;  %v5270_v19 = vpop.f32.mrb[2].mxu0 }
 0x1e4   : > { %v4072_v20 = vsel %vm411_vm1, %v4040_v17, 0.0  ;;  %v3971_v22 = vadd.f32 %v3970_v16, %v3969_v18  ;;  %v5317_v5 = vadd.f32 %v5270_v19, %v5020_v51  ;;  %v3756_v25 = vpop.f32.mrb[3].mxu0 }
 0x1e5   : > { %v4071_v26 = vsel %vm411_vm1, %v4039_v10, 0.0  ;;  %v5318_v27 = vadd.f32 %v3756_v25, %v1805_v52 }
 0x1e6   : > { %v4073_v28 = vadd.f32 %v4072_v20, %v4071_v26  ;;  %3940 = vst.msk [vmem:[%s6675_s9 + $0x18] sm:$0xff] %vm411_vm1, %v5317_v5  ;;  %v4042_v3 = vmul.f32 %v5317_v5, %v5317_v5  ;;  %v3974_v57 = vsel %vm411_vm1, %v5317_v5, 0.0 }
 0x1e7   : > { %3939 = vst.msk [vmem:[%s6675_s9 + $0x10] sm:$0xff] %vm411_vm1, %v5318_v27  ;;  %v3972_v9 = vsel %vm411_vm1, %v5318_v27, 0.0  ;;  %v4041_v43 = vmul.f32 %v5318_v27, %v5318_v27  ;;  %v5273_v2 = vpop.f32.mrb[4].mxu0 }
 0x1e8   : > { %v3973_v37 = vadd.f32 %v3972_v9, %v3971_v22  ;;  %v5319_v24 = vadd.f32 %v5273_v2, %v5023_v53  ;;  %v3766_v34 = vpop.f32.mrb[5].mxu0  ;;  %v4076_v21 = vsel %vm411_vm1, %v4042_v3, 0.0 }
 0x1e9   : > { %v4074_v39 = vsel %vm411_vm1, %v4041_v43, 0.0  ;;  %v5320_v40 = vadd.f32 %v3766_v34, %v1815_v54 }
 0x1ea   : > { %v4075_v61 = vadd.f32 %v4074_v39, %v4073_v28  ;;  %3942 = vst.msk [vmem:[%s6675_s9 + $0x28] sm:$0xff] %vm411_vm1, %v5319_v24  ;;  %v3975_v7 = vadd.f32 %v3974_v57, %v3973_v37  ;;  %v4044_v23 = vmul.f32 %v5319_v24, %v5319_v24  ;;  %v3978_v4 = vsel %vm411_vm1, %v5319_v24, 0.0 }
 0x1eb   : > { %3941 = vst.msk [vmem:[%s6675_s9 + $0x20] sm:$0xff] %vm411_vm1, %v5320_v40  ;;  %v3976_v29 = vsel %vm411_vm1, %v5320_v40, 0.0  ;;  %v4043_v6 = vmul.f32 %v5320_v40, %v5320_v40  ;;  %v5276_v31 = vpop.f32.mrb[6].mxu0 }
 0x1ec   : > { %v3977_v32 = vadd.f32 %v3976_v29, %v3975_v7  ;;  %v4077_v33 = vadd.f32 %v4076_v21, %v4075_v61  ;;  %v5321_v44 = vadd.f32 %v5276_v31, %v5026_v55  ;;  %v3776_v14 = vpop.f32.mrb[7].mxu0  ;;  %v4080_v38 = vsel %vm411_vm1, %v4044_v23, 0.0 }
 0x1ed   : > { %v4078_v49 = vsel %vm411_vm1, %v4043_v6, 0.0  ;;  %v5322_v46 = vadd.f32 %v3776_v14, %v1825_v56 }
 0x1ee   : > { %v4079_v35 = vadd.f32 %v4078_v49, %v4077_v33  ;;  %3944 = vst.msk [vmem:[%s6675_s9 + $0x38] sm:$0xff] %vm411_vm1, %v5321_v44  ;;  %v3979_v36 = vadd.f32 %v3978_v4, %v3977_v32  ;;  %v4046_v41 = vmul.f32 %v5321_v44, %v5321_v44  ;;  %v3982_v52 = vsel %vm411_vm1, %v5321_v44, 0.0 }
 0x1ef   : > { %3943 = vst.msk [vmem:[%s6675_s9 + $0x30] sm:$0xff] %vm411_vm1, %v5322_v46  ;;  %v3980_v42 = vsel %vm411_vm1, %v5322_v46, 0.0  ;;  %v4045_v45 = vmul.f32 %v5322_v46, %v5322_v46  ;;  %v5279_v47 = vpop.f32.mrb[8].mxu0 }
 0x1f0   : > { %v3981_v30 = vadd.f32 %v3980_v42, %v3979_v36  ;;  %v4081_v48 = vadd.f32 %v4080_v38, %v4079_v35  ;;  %v5323_v50 = vadd.f32 %v5279_v47, %v6654_v58  ;;  %v3786_v51 = vpop.f32.mrb[9].mxu0  ;;  %v4084_v11 = vsel %vm411_vm1, %v4046_v41, 0.0 }
 0x1f1   : > { %v4082_v53 = vsel %vm411_vm1, %v4045_v45, 0.0  ;;  %v5324_v54 = vadd.f32 %v3786_v51, %v6656_v59 }
 0x1f2   : > { %v4083_v55 = vadd.f32 %v4082_v53, %v4081_v48  ;;  %3946 = vst.msk [vmem:[%s6675_s9 + $0x48] sm:$0xff] %vm411_vm1, %v5323_v50  ;;  %v3983_v56 = vadd.f32 %v3982_v52, %v3981_v30  ;;  %v4048_v12 = vmul.f32 %v5323_v50, %v5323_v50  ;;  %v3986_v10 = vsel %vm411_vm1, %v5323_v50, 0.0 }
 0x1f3   : > { %3945 = vst.msk [vmem:[%s6675_s9 + $0x40] sm:$0xff] %vm411_vm1, %v5324_v54  ;;  %v3984_v58 = vsel %vm411_vm1, %v5324_v54, 0.0  ;;  %v4047_v13 = vmul.f32 %v5324_v54, %v5324_v54  ;;  %v5282_v15 = vpop.f32.mrb[10].mxu0 }
 0x1f4   : > { %v3985_v16 = vadd.f32 %v3984_v58, %v3983_v56  ;;  %v4085_v17 = vadd.f32 %v4084_v11, %v4083_v55  ;;  %v5325_v18 = vadd.f32 %v5282_v15, %v6658_v60  ;;  %v3796_v59 = vpop.f32.mrb[11].mxu0  ;;  %v4088_v25 = vsel %vm411_vm1, %v4048_v12, 0.0 }
 0x1f5   : > { %v4086_v19 = vsel %vm411_vm1, %v4047_v13, 0.0  ;;  %v5326_v20 = vadd.f32 %v3796_v59, %v6660_v62 }
 0x1f6   : > { %v4087_v22 = vadd.f32 %v4086_v19, %v4085_v17  ;;  %3948 = vst.msk [vmem:[%s6675_s9 + $0x58] sm:$0xff] %vm411_vm1, %v5325_v18  ;;  %v3987_v5 = vadd.f32 %v3986_v10, %v3985_v16  ;;  %v4050_v26 = vmul.f32 %v5325_v18, %v5325_v18  ;;  %v3990_v2 = vsel %vm411_vm1, %v5325_v18, 0.0 }
 0x1f7   : > { %3947 = vst.msk [vmem:[%s6675_s9 + $0x50] sm:$0xff] %vm411_vm1, %v5326_v20  ;;  %v3988_v60 = vsel %vm411_vm1, %v5326_v20, 0.0  ;;  %v4049_v27 = vmul.f32 %v5326_v20, %v5326_v20  ;;  %v5285_v28 = vpop.f32.mrb[12].mxu0 }
 0x1f8   : > { %v3989_v3 = vadd.f32 %v3988_v60, %v3987_v5  ;;  %v4089_v9 = vadd.f32 %v4088_v25, %v4087_v22  ;;  %v5327_v43 = vadd.f32 %v5285_v28, %v6662_v63  ;;  %v3806_v62 = vpop.f32.mrb[13].mxu0  ;;  %v4092_v39 = vsel %vm411_vm1, %v4050_v26, 0.0 }
 0x1f9   : > { %v4090_v37 = vsel %vm411_vm1, %v4049_v27, 0.0  ;;  %v5328_v24 = vadd.f32 %v3806_v62, %v6664_v0 }
 0x1fa   : > { %v4091_v34 = vadd.f32 %v4090_v37, %v4089_v9  ;;  %3950 = vst.msk [vmem:[%s6675_s9 + $0x68] sm:$0xff] %vm411_vm1, %v5327_v43  ;;  %v3991_v57 = vadd.f32 %v3990_v2, %v3989_v3  ;;  %v4052_v40 = vmul.f32 %v5327_v43, %v5327_v43  ;;  %v3994_v32 = vsel %vm411_vm1, %v5327_v43, 0.0 }
 0x1fb   : > { %3949 = vst.msk [vmem:[%s6675_s9 + $0x60] sm:$0xff] %vm411_vm1, %v5328_v24  ;;  %v3992_v61 = vsel %vm411_vm1, %v5328_v24, 0.0  ;;  %v4051_v63 = vmul.f32 %v5328_v24, %v5328_v24  ;;  %v5091_v7 = vpop.f32.mrb[16].mxu1  ;;  %v5288_v21 = vpop.f32.mrb[14].mxu0 }
 0x1fc   : > { %v3993_v23 = vadd.f32 %v3992_v61, %v3991_v57  ;;  %v4093_v29 = vadd.f32 %v4092_v39, %v4091_v34  ;;  %v5329_v0 = vadd.f32 %v5288_v21, %v6666_v1  ;;  %v2265_v6 = vpop.f32.mrb[17].mxu1  ;;  %v3816_v31 = vpop.f32.mrb[15].mxu0  ;;  %v4096_v49 = vsel %vm411_vm1, %v4052_v40, 0.0 }
 0x1fd   : > { %v4094_v33 = vsel %vm411_vm1, %v4051_v63, 0.0  ;;  %v5330_v44 = vadd.f32 %v3816_v31, %v6668_v8 }
 0x1fe   : > { %v4095_v14 = vadd.f32 %v4094_v33, %v4093_v29  ;;  %3952 = vst.msk [vmem:[%s6675_s9 + $0x78] sm:$0xff] %vm411_vm1, %v5329_v0  ;;  %v3995_v4 = vadd.f32 %v3994_v32, %v3993_v23  ;;  %v4054_v46 = vmul.f32 %v5329_v0, %v5329_v0  ;;  %v3998_v30 = vsel %vm411_vm1, %v5329_v0, 0.0 }
 0x1ff   : > { %3951 = vst.msk [vmem:[%s6675_s9 + $0x70] sm:$0xff] %vm411_vm1, %v5330_v44  ;;  %v3996_v1 = vsel %vm411_vm1, %v5330_v44, 0.0  ;;  %v4053_v35 = vmul.f32 %v5330_v44, %v5330_v44  ;;  %v5094_v36 = vpop.f32.mrb[18].mxu1  ;;  %v5291_v38 = vpop.f32.mrb[16].mxu0 }
 0x200   : > { %v3997_v41 = vadd.f32 %v3996_v1, %v3995_v4  ;;  %v4097_v42 = vadd.f32 %v4096_v49, %v4095_v14  ;;  %v5331_v45 = vadd.f32 %v5291_v38, %v5091_v7  ;;  %v2275_v8 = vpop.f32.mrb[19].mxu1  ;;  %v3826_v47 = vpop.f32.mrb[17].mxu0  ;;  %v4100_v53 = vsel %vm411_vm1, %v4054_v46, 0.0 }
 0x201   : > { %v4098_v48 = vsel %vm411_vm1, %v4053_v35, 0.0  ;;  %v5332_v50 = vadd.f32 %v3826_v47, %v2265_v6 }
 0x202   : > { %v4099_v51 = vadd.f32 %v4098_v48, %v4097_v42  ;;  %3954 = vst.msk [vmem:[%s6675_s9 + $0x88] sm:$0xff] %vm411_vm1, %v5331_v45  ;;  %v3999_v52 = vadd.f32 %v3998_v30, %v3997_v41  ;;  %v4056_v54 = vmul.f32 %v5331_v45, %v5331_v45  ;;  %v4002_v18 = vsel %vm411_vm1, %v5331_v45, 0.0 }
 0x203   : > { %3953 = vst.msk [vmem:[%s6675_s9 + $0x80] sm:$0xff] %vm411_vm1, %v5332_v50  ;;  %v4000_v55 = vsel %vm411_vm1, %v5332_v50, 0.0  ;;  %v4055_v56 = vmul.f32 %v5332_v50, %v5332_v50  ;;  %v5097_v11 = vpop.f32.mrb[20].mxu1  ;;  %v5294_v12 = vpop.f32.mrb[18].mxu0 }
 0x204   : > { %v4001_v58 = vadd.f32 %v4000_v55, %v3999_v52  ;;  %v4101_v13 = vadd.f32 %v4100_v53, %v4099_v51  ;;  %v5333_v15 = vadd.f32 %v5294_v12, %v5094_v36  ;;  %v2285_v16 = vpop.f32.mrb[21].mxu1  ;;  %v3836_v17 = vpop.f32.mrb[19].mxu0  ;;  %v4104_v22 = vsel %vm411_vm1, %v4056_v54, 0.0 }
 0x205   : > { %v4102_v59 = vsel %vm411_vm1, %v4055_v56, 0.0  ;;  %v5334_v10 = vadd.f32 %v3836_v17, %v2275_v8 }
 0x206   : > { %v4103_v19 = vadd.f32 %v4102_v59, %v4101_v13  ;;  %3956 = vst.msk [vmem:[%s6675_s9 + $0x98] sm:$0xff] %vm411_vm1, %v5333_v15  ;;  %v4003_v20 = vadd.f32 %v4002_v18, %v4001_v58  ;;  %v4058_v5 = vmul.f32 %v5333_v15, %v5333_v15  ;;  %v4006_v2 = vsel %vm411_vm1, %v5333_v15, 0.0 }
 0x207   : > { %3955 = vst.msk [vmem:[%s6675_s9 + $0x90] sm:$0xff] %vm411_vm1, %v5334_v10  ;;  %v4004_v25 = vsel %vm411_vm1, %v5334_v10, 0.0  ;;  %v4057_v26 = vmul.f32 %v5334_v10, %v5334_v10  ;;  %v5100_v60 = vpop.f32.mrb[22].mxu1  ;;  %v5297_v27 = vpop.f32.mrb[20].mxu0 }
 0x208   : > { %v4005_v28 = vadd.f32 %v4004_v25, %v4003_v20  ;;  %v4105_v3 = vadd.f32 %v4104_v22, %v4103_v19  ;;  %v5335_v9 = vadd.f32 %v5297_v27, %v5097_v11  ;;  %v2295_v43 = vpop.f32.mrb[23].mxu1  ;;  %v3846_v62 = vpop.f32.mrb[21].mxu0  ;;  %v4108_v39 = vsel %vm411_vm1, %v4058_v5, 0.0 }
 0x209   : > { %v4106_v37 = vsel %vm411_vm1, %v4057_v26, 0.0  ;;  %v5336_v24 = vadd.f32 %v3846_v62, %v2285_v16 }
 0x20a   : > { %v4107_v34 = vadd.f32 %v4106_v37, %v4105_v3  ;;  %3958 = vst.msk [vmem:[%s6675_s9 + $0xa8] sm:$0xff] %vm411_vm1, %v5335_v9  ;;  %v4007_v57 = vadd.f32 %v4006_v2, %v4005_v28  ;;  %v4060_v40 = vmul.f32 %v5335_v9, %v5335_v9  ;;  %v4010_v32 = vsel %vm411_vm1, %v5335_v9, 0.0 }
 0x20b   : > { %3957 = vst.msk [vmem:[%s6675_s9 + $0xa0] sm:$0xff] %vm411_vm1, %v5336_v24  ;;  %v4008_v61 = vsel %vm411_vm1, %v5336_v24, 0.0  ;;  %v4059_v63 = vmul.f32 %v5336_v24, %v5336_v24  ;;  %v5103_v7 = vpop.f32.mrb[24].mxu1  ;;  %v5300_v21 = vpop.f32.mrb[22].mxu0 }
 0x20c   : > { %v4009_v23 = vadd.f32 %v4008_v61, %v4007_v57  ;;  %v4109_v29 = vadd.f32 %v4108_v39, %v4107_v34  ;;  %v5337_v0 = vadd.f32 %v5300_v21, %v5100_v60  ;;  %v2305_v6 = vpop.f32.mrb[25].mxu1  ;;  %v3856_v31 = vpop.f32.mrb[23].mxu0  ;;  %v4112_v49 = vsel %vm411_vm1, %v4060_v40, 0.0 }
 0x20d   : > { %v4110_v33 = vsel %vm411_vm1, %v4059_v63, 0.0  ;;  %v5338_v44 = vadd.f32 %v3856_v31, %v2295_v43 }
 0x20e   : > { %v4111_v14 = vadd.f32 %v4110_v33, %v4109_v29  ;;  %3960 = vst.msk [vmem:[%s6675_s9 + $0xb8] sm:$0xff] %vm411_vm1, %v5337_v0  ;;  %v4011_v4 = vadd.f32 %v4010_v32, %v4009_v23  ;;  %v4062_v46 = vmul.f32 %v5337_v0, %v5337_v0  ;;  %v4014_v30 = vsel %vm411_vm1, %v5337_v0, 0.0 }
 0x20f   : > { %3959 = vst.msk [vmem:[%s6675_s9 + $0xb0] sm:$0xff] %vm411_vm1, %v5338_v44  ;;  %v4012_v1 = vsel %vm411_vm1, %v5338_v44, 0.0  ;;  %v4061_v35 = vmul.f32 %v5338_v44, %v5338_v44  ;;  %v5106_v36 = vpop.f32.mrb[26].mxu1  ;;  %v5303_v38 = vpop.f32.mrb[24].mxu0 }
 0x210   : > { %v4013_v41 = vadd.f32 %v4012_v1, %v4011_v4  ;;  %v4113_v42 = vadd.f32 %v4112_v49, %v4111_v14  ;;  %v5339_v45 = vadd.f32 %v5303_v38, %v5103_v7  ;;  %v2315_v8 = vpop.f32.mrb[27].mxu1  ;;  %v3866_v47 = vpop.f32.mrb[25].mxu0  ;;  %v4116_v53 = vsel %vm411_vm1, %v4062_v46, 0.0 }
 0x211   : > { %v4114_v48 = vsel %vm411_vm1, %v4061_v35, 0.0  ;;  %v5340_v50 = vadd.f32 %v3866_v47, %v2305_v6 }
 0x212   : > { %v4115_v51 = vadd.f32 %v4114_v48, %v4113_v42  ;;  %3962 = vst.msk [vmem:[%s6675_s9 + $0xc8] sm:$0xff] %vm411_vm1, %v5339_v45  ;;  %v4015_v52 = vadd.f32 %v4014_v30, %v4013_v41  ;;  %v4064_v54 = vmul.f32 %v5339_v45, %v5339_v45  ;;  %v4018_v18 = vsel %vm411_vm1, %v5339_v45, 0.0 }
 0x213   : > { %3961 = vst.msk [vmem:[%s6675_s9 + $0xc0] sm:$0xff] %vm411_vm1, %v5340_v50  ;;  %v4016_v55 = vsel %vm411_vm1, %v5340_v50, 0.0  ;;  %v4063_v56 = vmul.f32 %v5340_v50, %v5340_v50  ;;  %v5109_v11 = vpop.f32.mrb[28].mxu1  ;;  %v5306_v12 = vpop.f32.mrb[26].mxu0 }
 0x214   : > { %v4017_v58 = vadd.f32 %v4016_v55, %v4015_v52  ;;  %v4117_v13 = vadd.f32 %v4116_v53, %v4115_v51  ;;  %v5341_v15 = vadd.f32 %v5306_v12, %v5106_v36  ;;  %v2325_v16 = vpop.f32.mrb[29].mxu1  ;;  %v3876_v17 = vpop.f32.mrb[27].mxu0  ;;  %v4120_v22 = vsel %vm411_vm1, %v4064_v54, 0.0 }
 0x215   : > { %v4118_v59 = vsel %vm411_vm1, %v4063_v56, 0.0  ;;  %v5342_v10 = vadd.f32 %v3876_v17, %v2315_v8 }
 0x216   : > { %v4119_v19 = vadd.f32 %v4118_v59, %v4117_v13  ;;  %3964 = vst.msk [vmem:[%s6675_s9 + $0xd8] sm:$0xff] %vm411_vm1, %v5341_v15  ;;  %v4019_v20 = vadd.f32 %v4018_v18, %v4017_v58  ;;  %v4066_v5 = vmul.f32 %v5341_v15, %v5341_v15  ;;  %v4022_v2 = vsel %vm411_vm1, %v5341_v15, 0.0 }
 0x217   : > { %3963 = vst.msk [vmem:[%s6675_s9 + $0xd0] sm:$0xff] %vm411_vm1, %v5342_v10  ;;  %v4020_v25 = vsel %vm411_vm1, %v5342_v10, 0.0  ;;  %v4065_v26 = vmul.f32 %v5342_v10, %v5342_v10  ;;  %v5112_v60 = vpop.f32.mrb[30].mxu1  ;;  %v5309_v27 = vpop.f32.mrb[28].mxu0 }
 0x218   : > { %v4021_v28 = vadd.f32 %v4020_v25, %v4019_v20  ;;  %v4121_v3 = vadd.f32 %v4120_v22, %v4119_v19  ;;  %v5343_v9 = vadd.f32 %v5309_v27, %v5109_v11  ;;  %v2335_v43 = vpop.f32.mrb[31].mxu1  ;;  %v3886_v62 = vpop.f32.mrb[29].mxu0  ;;  %v4124_v39 = vsel %vm411_vm1, %v4066_v5, 0.0 }
 0x219   : > { %v4122_v37 = vsel %vm411_vm1, %v4065_v26, 0.0  ;;  %v5344_v24 = vadd.f32 %v3886_v62, %v2325_v16 }
 0x21a   : > { %v4123_v34 = vadd.f32 %v4122_v37, %v4121_v3  ;;  %3966 = vst.msk [vmem:[%s6675_s9 + $0xe8] sm:$0xff] %vm411_vm1, %v5343_v9  ;;  %v4023_v57 = vadd.f32 %v4022_v2, %v4021_v28  ;;  %v4068_v40 = vmul.f32 %v5343_v9, %v5343_v9  ;;  %v4026_v6 = vsel %vm411_vm1, %v5343_v9, 0.0 }
 0x21b   : > { %3965 = vst.msk [vmem:[%s6675_s9 + $0xe0] sm:$0xff] %vm411_vm1, %v5344_v24  ;;  %v4024_v61 = vsel %vm411_vm1, %v5344_v24, 0.0  ;;  %v4067_v63 = vmul.f32 %v5344_v24, %v5344_v24  ;;  %v5312_v7 = vpop.f32.mrb[30].mxu0 }
 0x21c   : > { %v4025_v21 = vadd.f32 %v4024_v61, %v4023_v57  ;;  %v4125_v23 = vadd.f32 %v4124_v39, %v4123_v34  ;;  %v5345_v29 = vadd.f32 %v5312_v7, %v5112_v60  ;;  %v3896_v0 = vpop.f32.mrb[31].mxu0  ;;  %v4128_v14 = vsel %vm411_vm1, %v4068_v40, 0.0 }
 0x21d   : > { %v4126_v31 = vsel %vm411_vm1, %v4067_v63, 0.0  ;;  %v5346_v32 = vadd.f32 %v3896_v0, %v2335_v43 }
 0x21e   : > { %v4127_v33 = vadd.f32 %v4126_v31, %v4125_v23  ;;  %3968 = vst.msk [vmem:[%s6675_s9 + $0xf8] sm:$0xff] %vm411_vm1, %v5345_v29  ;;  %v4027_v44 = vadd.f32 %v4026_v6, %v4025_v21  ;;  %v4070_v4 = vmul.f32 %v5345_v29, %v5345_v29  ;;  %v4030_v36 = vsel %vm411_vm1, %v5345_v29, 0.0 }
 0x21f   : > { %3967 = vst.msk [vmem:[%s6675_s9 + $0xf0] sm:$0xff] %vm411_vm1, %v5346_v32  ;;  %v4028_v49 = vsel %vm411_vm1, %v5346_v32, 0.0  ;;  %v4069_v46 = vmul.f32 %v5346_v32, %v5346_v32 }
 0x220   : > { %v4029_v1 = vadd.f32 %v4028_v49, %v4027_v44  ;;  %v4129_v35 = vadd.f32 %v4128_v14, %v4127_v33  ;;  %v4132_v45 = vsel %vm411_vm1, %v4070_v4, 0.0 }
 0x221   : > { %v4130_v38 = vsel %vm411_vm1, %v4069_v46, 0.0 }
 0x222   : > { %v4031_v41 = vadd.f32 %v4030_v36, %v4029_v1  ;;  %v4131_v42 = vadd.f32 %v4130_v38, %v4129_v35 }
 0x224   : > { %v4032_v8 = vrot.slane %v4031_v41, 4  ;;  %v4133_v47 = vadd.f32 %v4132_v45, %v4131_v42 }
 0x226   : > { %v4033_v30 = vadd.f32 %v4032_v8, %v4031_v41  ;;  %v4134_v48 = vrot.slane %v4133_v47, 4 }
 0x228   : > { %v4034_v50 = vrot.slane %v4033_v30, 2  ;;  %v4135_v51 = vadd.f32 %v4134_v48, %v4133_v47 }
 0x22a   : > { %v4035_v52 = vadd.f32 %v4034_v50, %v4033_v30  ;;  %v4136_v53 = vrot.slane %v4135_v51, 2 }
 0x22c   : > { %v4036_v54 = vrot.slane %v4035_v52, 1  ;;  %v4137_v55 = vadd.f32 %v4136_v53, %v4135_v51 }
 0x22e   : > { %v4037_v56 = vadd.f32 %v4036_v54, %v4035_v52  ;;  %v4138_v11 = vrot.slane %v4137_v55, 1 }
 0x230   : > { %4038 = vst.msk [vmem:[%s265_s11] sm:$0x1] %vm420_vm3, %v4037_v56  ;;  %v4139_v12 = vadd.f32 %v4138_v11, %v4137_v55 }
 0x232   : > { %4140 = vst.msk [vmem:[%s268_s14] sm:$0x1] %vm420_vm3, %v4139_v12 }
 0x233 PF: > { %s17_s21 = sadd.s32 1, %s5587_s21  }
 0x234   : > { %p14_p4 = scmp.ge.s32.totalorder %s17_s21, 4  }
 0x236   :  { %16 = sbr.rel (!%p14_p4) target bundleno = 1 (0x1), region = 101 }

</bundles_post_ra>
